<compile_context>
chip_gen: v7x
topology: tpu7x:2x2x1
jax: 0.10.0
libtpu: 0.0.40
codegen_flags: <defaults>
</compile_context>

<pallas_src>
import functools

import jax
import jax.numpy as jnp
from jax.experimental import pallas as pl
from jax.experimental.pallas import tpu as pltpu


def _empool_kernel(x_ref, o_ref, *, kh, kw, inv_t):
    """Softmax-weighted ('exponential-mean') pooling, channels-last layout.

    x_ref: (Hp, Wp, TN) input tile in VMEM, channels on lanes.
    o_ref: (o_h, o_w, TN) output tile in VMEM.  Stride is 1.
    Window shifts are static Ref slices (leading-dim / sublane base offsets),
    so no full-tile f32 copy is materialized.
    """
    o_h, o_w, _ = o_ref.shape

    def win(di, dj):
        # Leading-dim (di) / sublane (dj) offsets fold into the vld base
        # address; the cast is a no-op for f32 inputs.
        return x_ref[di:di + o_h, dj:dj + o_w, :].astype(jnp.float32)

    # Pass 1: separable running max -> kh + kw - 2 max ops instead of kh*kw-1.
    rm = x_ref[:, 0:o_w, :].astype(jnp.float32)           # row-max over dj
    for dj in range(1, kw):
        rm = jnp.maximum(rm, x_ref[:, dj:dj + o_w, :].astype(jnp.float32))
    m = rm[0:o_h]
    for di in range(1, kh):
        m = jnp.maximum(m, rm[di:di + o_h])               # col-max over di

    # Pass 2: fused, numerically-stable softmax-weighted sum.
    num = jnp.zeros_like(m)
    den = jnp.zeros_like(m)
    for di in range(kh):
        for dj in range(kw):
            wv = win(di, dj)
            d = wv - m
            e = jnp.exp(d) if inv_t == 1.0 else jnp.exp(d * inv_t)
            den = den + e
            num = num + e * wv

    # Exact divide for parity with the PyTorch module (VALU/EUP slack makes
    # the extra cost negligible; approx reciprocal failed the 2e-3 tolerance).
    o_ref[...] = (num / den).astype(o_ref.dtype)


def empool2d(x, kernel_size=3, stride=1, padding=0, temperature=1.0, same=False):
    """JAX/Pallas equivalent of EMPool2d_.forward (NCHW input)."""
    kh = kw = int(kernel_size)
    sh = sw = int(stride)
    if (sh, sw) != (1, 1):
        # TODO(synk): strided windows not implemented (module default is stride=1).
        raise NotImplementedError("only stride=1 is supported")

    B, C, H, W = x.shape

    # Replicate EMPool2d_._padding (F.pad order is (left, right, top, bottom)).
    if same:
        ph = max(kh - sh, 0) if H % sh == 0 else max(kh - H % sh, 0)
        pw = max(kw - sw, 0) if W % sw == 0 else max(kw - W % sw, 0)
        p_l, p_t = pw // 2, ph // 2
        p_r, p_b = pw - p_l, ph - p_t
    else:
        p_l = p_r = p_t = p_b = int(padding)

    if p_l or p_r or p_t or p_b:
        if max(p_t, p_b) >= H or max(p_l, p_r) >= W:
            raise ValueError("reflect padding requires pad < spatial dim")
        # PyTorch module uses F.pad(..., mode='reflect').
        x = jnp.pad(x, ((0, 0), (0, 0), (p_t, p_b), (p_l, p_r)), mode="reflect")

    Hp, Wp = H + p_t + p_b, W + p_l + p_r
    o_h, o_w = Hp - kh + 1, Wp - kw + 1
    if o_h <= 0 or o_w <= 0:
        raise ValueError("kernel larger than padded input")

    N = B * C
    # Channels-last: B*C on the lane axis -> lane-dense loads/stores; window
    # shifts become leading-dim (H) and sublane (W) Ref slices in the kernel.
    # TODO(synk): accept/emit channels-last tensors from the surrounding model
    #             to eliminate these two HBM-level transposes entirely.
    xcl = jnp.transpose(x.reshape(N, Hp, Wp), (1, 2, 0))  # (Hp, Wp, N)

    itemsize = jnp.dtype(x.dtype).itemsize

    # Generation-aware VMEM budget (v5e/v6e: 128 MiB, v7x: 64 MiB per TC).
    try:
        info = pltpu.get_tpu_info()
        vmem_cap = int(getattr(info, "vmem_capacity_bytes", 64 * 1024 * 1024))
    except Exception:
        vmem_cap = 64 * 1024 * 1024
    budget = int(0.40 * vmem_cap)

    # Bytes live per channel per grid step: double-buffered in/out blocks plus
    # the f32 intermediates (rm, m, num, den) the kernel keeps around.
    per_chan = ((2 * Hp * Wp + 2 * o_h * o_w) * itemsize
                + (Hp * o_w + 4 * o_h * o_w) * 4)
    max_tn = max(128, (budget // per_chan // 128) * 128)
    # TODO(synk): add spatial (H) tiling with a kh-1 input-row halo for feature
    #             maps so large that a single 128-lane tile exceeds the budget.

    # Lane-dense channel tiling: TN is always a multiple of 128; 256-512 lanes
    # per step amortize the ~0.35 us step overhead without bloating VMEM.
    N128 = ((N + 127) // 128) * 128
    TN = min(512, max_tn, N128)
    if N128 >= 256:
        # v7x has 2 TensorCores: keep >= 2 steps on the parallel axis when the
        # channel count allows it; also restores double-buffered DMA overlap
        # (which matters near v5e's HBM roofline).
        TN = min(TN, max(128, ((N128 // 2) // 128) * 128))
    N_pad = ((N128 + TN - 1) // TN) * TN

    if N_pad != N:
        # Padded lanes produce den = kh*kw, num = 0 -> zeros; sliced off below.
        xcl = jnp.pad(xcl, ((0, 0), (0, 0), (0, N_pad - N)))

    kernel = functools.partial(_empool_kernel, kh=kh, kw=kw,
                               inv_t=float(1.0 / float(temperature)))

    # Transcendental-heavy kernel (kh*kw exps per output): advisory hint so XLA
    # schedules the surrounding pad/transpose around the call sensibly.
    cost = pl.CostEstimate(
        flops=N * o_h * o_w * (5 * kh * kw + kh + kw + 1),
        transcendentals=N * o_h * o_w * (kh * kw + 1),
        bytes_accessed=(Hp * Wp + o_h * o_w) * N * itemsize,
    )

    out = pl.pallas_call(
        kernel,
        out_shape=jax.ShapeDtypeStruct((o_h, o_w, N_pad), x.dtype),
        grid=(N_pad // TN,),
        in_specs=[pl.BlockSpec((Hp, Wp, TN), lambda i: (0, 0, i))],
        out_specs=pl.BlockSpec((o_h, o_w, TN), lambda i: (0, 0, i)),
        compiler_params=pltpu.CompilerParams(
            dimension_semantics=("parallel",),
            vmem_limit_bytes=int(0.75 * vmem_cap),
        ),
        cost_estimate=cost,
    )(xcl)

    out = out[:, :, :N]                                   # drop channel padding
    return jnp.transpose(out, (2, 0, 1)).reshape(B, C, o_h, o_w)


def _empool2d_ref(x, kernel_size=3, temperature=1.0):
    """Pure-JAX reference (same semantics as the PyTorch module, stride=1, pad=0)."""
    k = kernel_size
    B, C, H, W = x.shape
    o_h, o_w = H - k + 1, W - k + 1
    patches = jnp.stack(
        [x[:, :, di:di + o_h, dj:dj + o_w] for di in range(k) for dj in range(k)],
        axis=-1,
    )
    w = jax.nn.softmax(patches / temperature, axis=-1)
    return jnp.sum(w * patches, axis=-1)


if __name__ == "__main__":
    key = jax.random.PRNGKey(0)
    x = jax.random.normal(key, (2, 4, 16, 16), dtype=jnp.float32)

    # Default config (kernel=3, stride=1, pad=0, t=1).
    out = empool2d(x, kernel_size=3, stride=1, padding=0, temperature=1.0, same=False)
    out = jax.block_until_ready(out)
    ref = _empool2d_ref(x, kernel_size=3, temperature=1.0)
    assert out.shape == (2, 4, 14, 14), out.shape
    assert jnp.allclose(out, ref, atol=1e-4, rtol=1e-4), \
        float(jnp.max(jnp.abs(out - ref)))

    # Non-default temperature + reflect padding path.
    out2 = empool2d(x, kernel_size=3, stride=1, padding=1, temperature=2.0, same=False)
    out2 = jax.block_until_ready(out2)
    xp = jnp.pad(x, ((0, 0), (0, 0), (1, 1), (1, 1)), mode="reflect")
    ref2 = _empool2d_ref(xp, kernel_size=3, temperature=2.0)
    assert out2.shape == (2, 4, 16, 16), out2.shape
    assert jnp.allclose(out2, ref2, atol=1e-4, rtol=1e-4), \
        float(jnp.max(jnp.abs(out2 - ref2)))

    print("KERNEL_OK")
</pallas_src>

<mosaic_0001>
module attributes {stable_mosaic.version = 11 : i64} {
  func.func @_empool_kernel(%arg0: i32, %arg1: memref<16x16x128xf32, #tpu.memory_space<vmem>>, %arg2: memref<14x14x128xf32, #tpu.memory_space<vmem>>) attributes {dimension_semantics = [#tpu.dimension_semantics<parallel>], iteration_bounds = array<i64: 1>, scalar_prefetch = 0 : i64, scratch_operands = 0 : i64, tpu.core_type = #tpu.core_type<tc>, window_params = [{transform_indices = @transform_0, window_bounds = array<i64: 16, 16, 128>}, {transform_indices = @transform_1, window_bounds = array<i64: 14, 14, 128>}]} {
    %c0 = arith.constant 0 : index
    %c0_0 = arith.constant 0 : index
    %c0_1 = arith.constant 0 : index
    %0 = vector.load %arg1[%c0, %c0_0, %c0_1] : memref<16x16x128xf32, #tpu.memory_space<vmem>>, vector<16x14x128xf32>
    %c0_2 = arith.constant 0 : index
    %c1 = arith.constant 1 : index
    %c0_3 = arith.constant 0 : index
    %1 = vector.load %arg1[%c0_2, %c1, %c0_3] : memref<16x16x128xf32, #tpu.memory_space<vmem>>, vector<16x14x128xf32>
    %2 = arith.maximumf %0, %1 : vector<16x14x128xf32>
    %c0_4 = arith.constant 0 : index
    %c2 = arith.constant 2 : index
    %c0_5 = arith.constant 0 : index
    %3 = vector.load %arg1[%c0_4, %c2, %c0_5] : memref<16x16x128xf32, #tpu.memory_space<vmem>>, vector<16x14x128xf32>
    %4 = arith.maximumf %2, %3 : vector<16x14x128xf32>
    %5 = vector.extract_strided_slice %4 {offsets = [0, 0, 0], sizes = [14, 14, 128], strides = [1, 1, 1]} : vector<16x14x128xf32> to vector<14x14x128xf32>
    %6 = vector.extract_strided_slice %4 {offsets = [1, 0, 0], sizes = [14, 14, 128], strides = [1, 1, 1]} : vector<16x14x128xf32> to vector<14x14x128xf32>
    %7 = arith.maximumf %5, %6 : vector<14x14x128xf32>
    %8 = vector.extract_strided_slice %4 {offsets = [2, 0, 0], sizes = [14, 14, 128], strides = [1, 1, 1]} : vector<16x14x128xf32> to vector<14x14x128xf32>
    %9 = arith.maximumf %7, %8 : vector<14x14x128xf32>
    %cst = arith.constant 0.000000e+00 : f32
    %10 = vector.broadcast %cst : f32 to vector<14x14x128xf32>
    %cst_6 = arith.constant 0.000000e+00 : f32
    %11 = vector.broadcast %cst_6 : f32 to vector<14x14x128xf32>
    %c0_7 = arith.constant 0 : index
    %c0_8 = arith.constant 0 : index
    %c0_9 = arith.constant 0 : index
    %12 = vector.load %arg1[%c0_7, %c0_8, %c0_9] : memref<16x16x128xf32, #tpu.memory_space<vmem>>, vector<14x14x128xf32>
    %13 = arith.subf %12, %9 : vector<14x14x128xf32>
    %14 = math.exp %13 : vector<14x14x128xf32>
    %15 = arith.addf %11, %14 : vector<14x14x128xf32>
    %16 = arith.mulf %14, %12 : vector<14x14x128xf32>
    %17 = arith.addf %10, %16 : vector<14x14x128xf32>
    %c0_10 = arith.constant 0 : index
    %c1_11 = arith.constant 1 : index
    %c0_12 = arith.constant 0 : index
    %18 = vector.load %arg1[%c0_10, %c1_11, %c0_12] : memref<16x16x128xf32, #tpu.memory_space<vmem>>, vector<14x14x128xf32>
    %19 = arith.subf %18, %9 : vector<14x14x128xf32>
    %20 = math.exp %19 : vector<14x14x128xf32>
    %21 = arith.addf %15, %20 : vector<14x14x128xf32>
    %22 = arith.mulf %20, %18 : vector<14x14x128xf32>
    %23 = arith.addf %17, %22 : vector<14x14x128xf32>
    %c0_13 = arith.constant 0 : index
    %c2_14 = arith.constant 2 : index
    %c0_15 = arith.constant 0 : index
    %24 = vector.load %arg1[%c0_13, %c2_14, %c0_15] : memref<16x16x128xf32, #tpu.memory_space<vmem>>, vector<14x14x128xf32>
    %25 = arith.subf %24, %9 : vector<14x14x128xf32>
    %26 = math.exp %25 : vector<14x14x128xf32>
    %27 = arith.addf %21, %26 : vector<14x14x128xf32>
    %28 = arith.mulf %26, %24 : vector<14x14x128xf32>
    %29 = arith.addf %23, %28 : vector<14x14x128xf32>
    %c1_16 = arith.constant 1 : index
    %c0_17 = arith.constant 0 : index
    %c0_18 = arith.constant 0 : index
    %30 = vector.load %arg1[%c1_16, %c0_17, %c0_18] : memref<16x16x128xf32, #tpu.memory_space<vmem>>, vector<14x14x128xf32>
    %31 = arith.subf %30, %9 : vector<14x14x128xf32>
    %32 = math.exp %31 : vector<14x14x128xf32>
    %33 = arith.addf %27, %32 : vector<14x14x128xf32>
    %34 = arith.mulf %32, %30 : vector<14x14x128xf32>
    %35 = arith.addf %29, %34 : vector<14x14x128xf32>
    %c1_19 = arith.constant 1 : index
    %c1_20 = arith.constant 1 : index
    %c0_21 = arith.constant 0 : index
    %36 = vector.load %arg1[%c1_19, %c1_20, %c0_21] : memref<16x16x128xf32, #tpu.memory_space<vmem>>, vector<14x14x128xf32>
    %37 = arith.subf %36, %9 : vector<14x14x128xf32>
    %38 = math.exp %37 : vector<14x14x128xf32>
    %39 = arith.addf %33, %38 : vector<14x14x128xf32>
    %40 = arith.mulf %38, %36 : vector<14x14x128xf32>
    %41 = arith.addf %35, %40 : vector<14x14x128xf32>
    %c1_22 = arith.constant 1 : index
    %c2_23 = arith.constant 2 : index
    %c0_24 = arith.constant 0 : index
    %42 = vector.load %arg1[%c1_22, %c2_23, %c0_24] : memref<16x16x128xf32, #tpu.memory_space<vmem>>, vector<14x14x128xf32>
    %43 = arith.subf %42, %9 : vector<14x14x128xf32>
    %44 = math.exp %43 : vector<14x14x128xf32>
    %45 = arith.addf %39, %44 : vector<14x14x128xf32>
    %46 = arith.mulf %44, %42 : vector<14x14x128xf32>
    %47 = arith.addf %41, %46 : vector<14x14x128xf32>
    %c2_25 = arith.constant 2 : index
    %c0_26 = arith.constant 0 : index
    %c0_27 = arith.constant 0 : index
    %48 = vector.load %arg1[%c2_25, %c0_26, %c0_27] : memref<16x16x128xf32, #tpu.memory_space<vmem>>, vector<14x14x128xf32>
    %49 = arith.subf %48, %9 : vector<14x14x128xf32>
    %50 = math.exp %49 : vector<14x14x128xf32>
    %51 = arith.addf %45, %50 : vector<14x14x128xf32>
    %52 = arith.mulf %50, %48 : vector<14x14x128xf32>
    %53 = arith.addf %47, %52 : vector<14x14x128xf32>
    %c2_28 = arith.constant 2 : index
    %c1_29 = arith.constant 1 : index
    %c0_30 = arith.constant 0 : index
    %54 = vector.load %arg1[%c2_28, %c1_29, %c0_30] : memref<16x16x128xf32, #tpu.memory_space<vmem>>, vector<14x14x128xf32>
    %55 = arith.subf %54, %9 : vector<14x14x128xf32>
    %56 = math.exp %55 : vector<14x14x128xf32>
    %57 = arith.addf %51, %56 : vector<14x14x128xf32>
    %58 = arith.mulf %56, %54 : vector<14x14x128xf32>
    %59 = arith.addf %53, %58 : vector<14x14x128xf32>
    %c2_31 = arith.constant 2 : index
    %c2_32 = arith.constant 2 : index
    %c0_33 = arith.constant 0 : index
    %60 = vector.load %arg1[%c2_31, %c2_32, %c0_33] : memref<16x16x128xf32, #tpu.memory_space<vmem>>, vector<14x14x128xf32>
    %61 = arith.subf %60, %9 : vector<14x14x128xf32>
    %62 = math.exp %61 : vector<14x14x128xf32>
    %63 = arith.addf %57, %62 : vector<14x14x128xf32>
    %64 = arith.mulf %62, %60 : vector<14x14x128xf32>
    %65 = arith.addf %59, %64 : vector<14x14x128xf32>
    %66 = arith.divf %65, %63 : vector<14x14x128xf32>
    %c0_34 = arith.constant 0 : index
    %c0_35 = arith.constant 0 : index
    %c0_36 = arith.constant 0 : index
    %67 = vector.load %arg2[%c0_34, %c0_35, %c0_36] : memref<14x14x128xf32, #tpu.memory_space<vmem>>, vector<14x14x128xf32>
    tpu.vector_store %arg2[%c0_34, %c0_35, %c0_36], %66 {strides = array<i32>} : memref<14x14x128xf32, #tpu.memory_space<vmem>>, vector<14x14x128xf32>,
    return
  }
  func.func @transform_0(%arg0: i32) -> (i32, i32, i32) {
    %c0_i32 = arith.constant 0 : i32
    %c0_i32_0 = arith.constant 0 : i32
    %c0_i32_1 = arith.constant 0 : i32
    return %c0_i32, %c0_i32_0, %arg0 : i32, i32, i32
  }
  func.func @transform_1(%arg0: i32) -> (i32, i32, i32) {
    %c0_i32 = arith.constant 0 : i32
    %c0_i32_0 = arith.constant 0 : i32
    %c0_i32_1 = arith.constant 0 : i32
    return %c0_i32, %c0_i32_0, %arg0 : i32, i32, i32
  }
}

</mosaic_0001>

<bundles_post_ra>
// kernel: tpu_custom_call.1
= control target key start
LH: loop header
LB: loop body
LE: loop exit
PB: predicated region body
PF: predicated region fallthrough
CT: control target
= control target key end

     0   :  { %6 = vsyncpa [#allocation3], 0  ;;  %s6442_s0 = inlined_call_operand.hbm [shape: f32[16,16,128], index: 0, kind: input, shape index: {}]   ;;  %s6443_s1 = inlined_call_operand.hbm [shape: f32[14,14,128], index: 1, kind: output, shape index: {}]  }
   0x1   :  { %7 = vsyncpa [#allocation4], 0  ;;  %s2680_s6 = smov [#allocation2]   ;;  %s2632_s10 = scalar_lea.hbm %s6442_s0, 4096 }
   0x2   :  { %s13_s7 = sshll.u32 %s2680_s6, 4  ;;  %p2633_p0 = scmp.ne.s32.totalorder %s6442_s0, %s2632_s10  ;;  %s14_s7 = int_to_ptr.vmem [resolvable:$true] %s13_s7 }
   0x3   :  { %p2636_p1 = scmp.lt.u32.totalorder %s2632_s10, %s6442_s0 }
   0x5   :  { %p2638_p2 = pnand %p2636_p1, %p2633_p0 }
   0x7   :  { %2641 = shalt.err (!%p2638_p2)
}
   0x8   :  { %s2642_s15 = scalar_lea.vmem %s14_s7, 4096  ;;  %p2647_p4 = scmp.lt.s32.totalorder %s14_s7, %s14_s7 }
   0x9   :  { %p2643_p3 = scmp.ne.s32.totalorder %s14_s7, %s2642_s15  ;;  %p2648_p5 = scmp.lt.s32.totalorder %s2642_s15, %s2642_s15 }
   0xb   :  { %p2649_p6 = por %p2648_p5, %p2647_p4 }
   0xd   :  { %p2650_p7 = pnand %p2649_p6, %p2643_p3 }
   0xf   :  { %2653 = shalt.err (!%p2650_p7)
}
  0x10   :  { %s2681_s16 = smov 128   ;;  %s2682_s17 = smov 8  }
  0x11   :  { %19 = dma.hbm_to_vmem [thread:$0]  %s6442_s0, 4096, %s14_s7, [#allocation3], %s2681_s16, %s2681_s16, %s2682_s17  }
  0x12   :  { %2676 = dma.done.wait [#allocation3], 4096  }
  0x13   :  { %2677 = vsyncadd [#allocation3], 4294963200  ;;  %v2709_v0 = vld [vmem:[#allocation2] sm:$0xff]  ;;  %v2711_v1 = vld [vmem:[#allocation2 + $0x8] sm:$0x3f]  ;;  %s2683_s0 = smov [#allocation5]  }
  0x14   :  { %6844 = vst [vmem:[#allocation8_spill] sm:$0xff] %v2709_v0  ;;  %6845 = vst [vmem:[#allocation9_spill] sm:$0xff] %v2711_v1  ;;  %v2713_v2 = vld [vmem:[#allocation2 + $0x10] sm:$0xff]  ;;  %v2715_v3 = vld [vmem:[#allocation2 + $0x18] sm:$0x3f]  ;;  %s2038_s20 = sshll.u32 %s2683_s0, 4  ;;  %s2039_s20 = int_to_ptr.vmem [resolvable:$true] %s2038_s20 }
  0x15   :  { %6846 = vst [vmem:[#allocation10_spill] sm:$0xff] %v2713_v2  ;;  %6847 = vst [vmem:[#allocation11_spill] sm:$0xff] %v2715_v3  ;;  %v2717_v4 = vld [vmem:[#allocation2 + $0x1] sm:$0xff]  ;;  %v2719_v5 = vld [vmem:[#allocation2 + $0x9] sm:$0x3f]  ;;  %s2654_s21 = scalar_lea.vmem %s2039_s20, 3584  ;;  %p2659_p9 = scmp.lt.s32.totalorder %s2039_s20, %s2039_s20 }
  0x16   :  { %6848 = vst [vmem:[#allocation12_spill] sm:$0xff] %v2717_v4  ;;  %6849 = vst [vmem:[#allocation13_spill] sm:$0xff] %v2719_v5  ;;  %v2721_v6 = vld [vmem:[#allocation2 + $0x11] sm:$0xff]  ;;  %v2723_v7 = vld [vmem:[#allocation2 + $0x19] sm:$0x3f]  ;;  %v87_v46 = vmax.f32 %v2709_v0, %v2717_v4  ;;  %v88_v47 = vmax.f32 %v2711_v1, %v2719_v5  ;;  %p2655_p8 = scmp.ne.s32.totalorder %s2039_s20, %s2654_s21  ;;  %p2660_p10 = scmp.lt.s32.totalorder %s2654_s21, %s2654_s21 }
  0x17   :  { %6850 = vst [vmem:[#allocation14_spill] sm:$0xff] %v2721_v6  ;;  %6851 = vst [vmem:[#allocation15_spill] sm:$0xff] %v2723_v7  ;;  %v2725_v8 = vld [vmem:[#allocation2 + $0x20] sm:$0xff]  ;;  %v2727_v9 = vld [vmem:[#allocation2 + $0x28] sm:$0x3f]  ;;  %v89_v48 = vmax.f32 %v2713_v2, %v2721_v6  ;;  %v90_v49 = vmax.f32 %v2715_v3, %v2723_v7 }
  0x18   :  { %6852 = vst [vmem:[#allocation16_spill] sm:$0xff] %v2725_v8  ;;  %6853 = vst [vmem:[#allocation17_spill] sm:$0xff] %v2727_v9  ;;  %v2729_v10 = vld [vmem:[#allocation2 + $0x30] sm:$0xff]  ;;  %v2731_v11 = vld [vmem:[#allocation2 + $0x38] sm:$0x3f]  ;;  %p2661_p11 = por %p2660_p10, %p2659_p9 }
  0x19   :  { %6854 = vst [vmem:[#allocation18_spill] sm:$0xff] %v2729_v10  ;;  %6855 = vst [vmem:[#allocation19_spill] sm:$0xff] %v2731_v11  ;;  %v2733_v12 = vld [vmem:[#allocation2 + $0x21] sm:$0xff]  ;;  %v2735_v13 = vld [vmem:[#allocation2 + $0x29] sm:$0x3f] }
  0x1a   :  { %6856 = vst [vmem:[#allocation20_spill] sm:$0xff] %v2733_v12  ;;  %6857 = vst [vmem:[#allocation21_spill] sm:$0xff] %v2735_v13  ;;  %v2737_v14 = vld [vmem:[#allocation2 + $0x31] sm:$0xff]  ;;  %v2739_v15 = vld [vmem:[#allocation2 + $0x39] sm:$0x3f]  ;;  %v91_v55 = vmax.f32 %v2725_v8, %v2733_v12  ;;  %v92_v56 = vmax.f32 %v2727_v9, %v2735_v13  ;;  %p2662_p12 = pnand %p2661_p11, %p2655_p8 }
  0x1b   :  { %6858 = vst [vmem:[#allocation22_spill] sm:$0xff] %v2737_v14  ;;  %6859 = vst [vmem:[#allocation23_spill] sm:$0xff] %v2739_v15  ;;  %v2741_v16 = vld [vmem:[#allocation2 + $0x40] sm:$0xff]  ;;  %v2743_v17 = vld [vmem:[#allocation2 + $0x48] sm:$0x3f]  ;;  %v93_v57 = vmax.f32 %v2729_v10, %v2737_v14  ;;  %v94_v58 = vmax.f32 %v2731_v11, %v2739_v15 }
  0x1c   :  { %6860 = vst [vmem:[#allocation24_spill] sm:$0xff] %v2741_v16  ;;  %6861 = vst [vmem:[#allocation25_spill] sm:$0xff] %v2743_v17  ;;  %v2745_v18 = vld [vmem:[#allocation2 + $0x50] sm:$0xff]  ;;  %v2747_v19 = vld [vmem:[#allocation2 + $0x58] sm:$0x3f] }
  0x1d   :  { %6862 = vst [vmem:[#allocation26_spill] sm:$0xff] %v2745_v18  ;;  %6863 = vst [vmem:[#allocation27_spill] sm:$0xff] %v2747_v19  ;;  %v2749_v20 = vld [vmem:[#allocation2 + $0x41] sm:$0xff]  ;;  %v2751_v21 = vld [vmem:[#allocation2 + $0x49] sm:$0x3f] }
  0x1e   :  { %6864 = vst [vmem:[#allocation28_spill] sm:$0xff] %v2749_v20  ;;  %6865 = vst [vmem:[#allocation29_spill] sm:$0xff] %v2751_v21  ;;  %v2753_v22 = vld [vmem:[#allocation2 + $0x51] sm:$0xff]  ;;  %v2755_v23 = vld [vmem:[#allocation2 + $0x59] sm:$0x3f]  ;;  %v95_v12 = vmax.f32 %v2741_v16, %v2749_v20  ;;  %v96_v13 = vmax.f32 %v2743_v17, %v2751_v21 }
  0x1f   :  { %6866 = vst [vmem:[#allocation30_spill] sm:$0xff] %v2753_v22  ;;  %6867 = vst [vmem:[#allocation31_spill] sm:$0xff] %v2755_v23  ;;  %v2757_v24 = vld [vmem:[#allocation2 + $0x60] sm:$0xff]  ;;  %v2759_v25 = vld [vmem:[#allocation2 + $0x68] sm:$0x3f]  ;;  %v97_v14 = vmax.f32 %v2745_v18, %v2753_v22 }
  0x20   :  { %6868 = vst [vmem:[#allocation32_spill] sm:$0xff] %v2757_v24  ;;  %6869 = vst [vmem:[#allocation33_spill] sm:$0xff] %v2759_v25  ;;  %v2761_v26 = vld [vmem:[#allocation2 + $0x70] sm:$0xff]  ;;  %v2763_v27 = vld [vmem:[#allocation2 + $0x78] sm:$0x3f] }
  0x21   :  { %6870 = vst [vmem:[#allocation34_spill] sm:$0xff] %v2761_v26  ;;  %6871 = vst [vmem:[#allocation35_spill] sm:$0xff] %v2763_v27  ;;  %v2765_v28 = vld [vmem:[#allocation2 + $0x61] sm:$0xff]  ;;  %v2767_v29 = vld [vmem:[#allocation2 + $0x69] sm:$0x3f] }
  0x22   :  { %6872 = vst [vmem:[#allocation36_spill] sm:$0xff] %v2765_v28  ;;  %6873 = vst [vmem:[#allocation37_spill] sm:$0xff] %v2767_v29  ;;  %v2769_v30 = vld [vmem:[#allocation2 + $0x71] sm:$0xff]  ;;  %v2771_v31 = vld [vmem:[#allocation2 + $0x79] sm:$0x3f]  ;;  %v99_v20 = vmax.f32 %v2757_v24, %v2765_v28  ;;  %v100_v21 = vmax.f32 %v2759_v25, %v2767_v29 }
  0x23   :  { %6874 = vst [vmem:[#allocation38_spill] sm:$0xff] %v2769_v30  ;;  %6875 = vst [vmem:[#allocation39_spill] sm:$0xff] %v2771_v31  ;;  %v2773_v32 = vld [vmem:[#allocation2 + $0x80] sm:$0xff]  ;;  %v2775_v33 = vld [vmem:[#allocation2 + $0x88] sm:$0x3f] }
  0x24   :  { %6876 = vst [vmem:[#allocation40_spill] sm:$0xff] %v2773_v32  ;;  %6877 = vst [vmem:[#allocation41_spill] sm:$0xff] %v2775_v33  ;;  %v2777_v34 = vld [vmem:[#allocation2 + $0x90] sm:$0xff]  ;;  %v2779_v35 = vld [vmem:[#allocation2 + $0x98] sm:$0x3f] }
  0x25   :  { %6878 = vst [vmem:[#allocation42_spill] sm:$0xff] %v2777_v34  ;;  %6879 = vst [vmem:[#allocation43_spill] sm:$0xff] %v2779_v35  ;;  %v2781_v36 = vld [vmem:[#allocation2 + $0x81] sm:$0xff]  ;;  %v2783_v37 = vld [vmem:[#allocation2 + $0x89] sm:$0x3f] }
  0x26   :  { %6880 = vst [vmem:[#allocation44_spill] sm:$0xff] %v2781_v36  ;;  %6881 = vst [vmem:[#allocation45_spill] sm:$0xff] %v2783_v37  ;;  %v2785_v38 = vld [vmem:[#allocation2 + $0x91] sm:$0xff]  ;;  %v2787_v39 = vld [vmem:[#allocation2 + $0xa0] sm:$0xff]  ;;  %v103_v28 = vmax.f32 %v2773_v32, %v2781_v36 }
  0x27   :  { %6882 = vst [vmem:[#allocation46_spill] sm:$0xff] %v2785_v38  ;;  %6883 = vst [vmem:[#allocation47_spill] sm:$0xff] %v2787_v39  ;;  %v2789_v40 = vld [vmem:[#allocation2 + $0xa8] sm:$0x3f]  ;;  %v2791_v41 = vld [vmem:[#allocation2 + $0xb0] sm:$0xff] }
  0x28   :  { %6884 = vst [vmem:[#allocation48_spill] sm:$0xff] %v2789_v40  ;;  %6885 = vst [vmem:[#allocation49_spill] sm:$0xff] %v2791_v41  ;;  %v2793_v42 = vld [vmem:[#allocation2 + $0xb8] sm:$0x3f]  ;;  %v2797_v44 = vld [vmem:[#allocation2 + $0xa1] sm:$0xff] }
  0x29   :  { %6886 = vst [vmem:[#allocation50_spill] sm:$0xff] %v2793_v42  ;;  %v2795_v43 = vld [vmem:[#allocation2 + $0x99] sm:$0x3f]  ;;  %6888 = vst [vmem:[#allocation52_spill] sm:$0xff] %v2797_v44  ;;  %v2799_v45 = vld [vmem:[#allocation2 + $0xa9] sm:$0x3f] }
  0x2a   :  { %6887 = vst [vmem:[#allocation51_spill] sm:$0xff] %v2795_v43  ;;  %6889 = vst [vmem:[#allocation53_spill] sm:$0xff] %v2799_v45  ;;  %v2809_v50 = vld [vmem:[#allocation2 + $0xc0] sm:$0xff]  ;;  %v2811_v51 = vld [vmem:[#allocation2 + $0xc8] sm:$0x3f] }
  0x2b   :  { %6890 = vst [vmem:[#allocation54_spill] sm:$0xff] %v2809_v50  ;;  %6891 = vst [vmem:[#allocation55_spill] sm:$0xff] %v2811_v51  ;;  %v2813_v52 = vld [vmem:[#allocation2 + $0xb1] sm:$0xff]  ;;  %v2815_v53 = vld [vmem:[#allocation2 + $0xb9] sm:$0x3f] }
  0x2c   :  { %6892 = vst [vmem:[#allocation56_spill] sm:$0xff] %v2813_v52  ;;  %6893 = vst [vmem:[#allocation57_spill] sm:$0xff] %v2815_v53  ;;  %v2817_v54 = vld [vmem:[#allocation2 + $0xc1] sm:$0xff]  ;;  %v2827_v59 = vld [vmem:[#allocation2 + $0xd0] sm:$0xff] }
  0x2d   :  { %6894 = vst [vmem:[#allocation58_spill] sm:$0xff] %v2817_v54  ;;  %6895 = vst [vmem:[#allocation59_spill] sm:$0xff] %v2827_v59  ;;  %v2829_v60 = vld [vmem:[#allocation2 + $0xd8] sm:$0x3f]  ;;  %v2831_v61 = vld [vmem:[#allocation2 + $0xc9] sm:$0x3f] }
  0x2e   :  { %6896 = vst [vmem:[#allocation60_spill] sm:$0xff] %v2829_v60  ;;  %6897 = vst [vmem:[#allocation61_spill] sm:$0xff] %v2831_v61  ;;  %v2833_v62 = vld [vmem:[#allocation2 + $0xd1] sm:$0xff]  ;;  %v2835_v63 = vld [vmem:[#allocation2 + $0xd9] sm:$0x3f] }
  0x2f   :  { %6898 = vst [vmem:[#allocation62_spill] sm:$0xff] %v2833_v62  ;;  %6899 = vst [vmem:[#allocation63_spill] sm:$0xff] %v2835_v63  ;;  %v2845_v7 = vld [vmem:[#allocation2 + $0xe0] sm:$0xff]  ;;  %v2847_v6 = vld [vmem:[#allocation2 + $0xe8] sm:$0x3f]  ;;  %v113_v22 = vmax.f32 %v2827_v59, %v2833_v62  ;;  %v114_v0 = vmax.f32 %v2829_v60, %v2835_v63 }
  0x30   :  { %v2849_v5 = vld [vmem:[#allocation2 + $0xf0] sm:$0xff]  ;;  %v2851_v4 = vld [vmem:[#allocation2 + $0xe1] sm:$0xff]  ;;  %v2865_v16 = vld [vmem:[#allocation2 + $0xf8] sm:$0x3f] }
  0x31   :  { %v2861_v18 = vld [vmem:[#allocation2 + $0x2] sm:$0xff]  ;;  %v2863_v17 = vld [vmem:[#allocation2 + $0x12] sm:$0xff]  ;;  %v120_v25 = vld [vmem:[#allocation2 + $0xa] sm:$0x3f] }
  0x32   :  { %6900 = vst [vmem:[#allocation64_spill] sm:$0xff] %v2861_v18  ;;  %6901 = vst [vmem:[#allocation65_spill] sm:$0xff] %v2863_v17  ;;  %v2867_v11 = vld [vmem:[#allocation2 + $0xe9] sm:$0x3f]  ;;  %v122_v24 = vld [vmem:[#allocation2 + $0x1a] sm:$0x3f]  ;;  %v2898_v36 = vmax.f32 %v87_v46, %v2861_v18  ;;  %v2901_v29 = vmax.f32 %v89_v48, %v2863_v17  ;;  %v2911_v61 = vmax.f32 %v88_v47, %v120_v25 }
  0x33   :  { %v2877_v10 = vld [vmem:[#allocation2 + $0xf1] sm:$0xff]  ;;  %v2879_v9 = vld [vmem:[#allocation2 + $0xf9] sm:$0x3f]  ;;  %v2889_v32 = vld [vmem:[#allocation2 + $0x22] sm:$0xff]  ;;  %v2913_v51 = vmax.f32 %v90_v49, %v122_v24  ;;  %v115_v46 = vmax.f32 %v2845_v7, %v2851_v4  ;;  %v116_v48 = vmax.f32 %v2847_v6, %v2867_v11 }
  0x34   :  { %6902 = vst [vmem:[#allocation66_spill] sm:$0xff] %v2889_v32  ;;  %v124_v2 = vld [vmem:[#allocation2 + $0x2a] sm:$0x3f]  ;;  %v2895_v1 = vld [vmem:[#allocation2 + $0x32] sm:$0xff]  ;;  %v126_v8 = vld [vmem:[#allocation2 + $0x3a] sm:$0x3f]  ;;  %v117_v17 = vmax.f32 %v2849_v5, %v2877_v10  ;;  %v2924_v60 = vmax.f32 %v91_v55, %v2889_v32  ;;  %v118_v24 = vmax.f32 %v2865_v16, %v2879_v9 }
  0x35   :  { %6903 = vst [vmem:[#allocation67_spill] sm:$0xff] %v2895_v1  ;;  %v2907_v15 = vld [vmem:[#allocation2 + $0x42] sm:$0xff]  ;;  %v128_v54 = vld [vmem:[#allocation2 + $0x4a] sm:$0x3f]  ;;  %v2909_v3 = vld [vmem:[#allocation2 + $0x52] sm:$0xff]  ;;  %v2932_v7 = vmax.f32 %v92_v56, %v124_v2  ;;  %v2935_v6 = vmax.f32 %v93_v57, %v2895_v1  ;;  %v2937_v5 = vmax.f32 %v94_v58, %v126_v8  ;;  %v183_v2 = vmax.f32 %v2898_v36, %v2901_v29 }
  0x36   :  { %6904 = vst [vmem:[#allocation68_spill] sm:$0xff] %v2907_v15  ;;  %6905 = vst [vmem:[#allocation69_spill] sm:$0xff] %v2909_v3  ;;  %v130_v18 = vld [vmem:[#allocation2 + $0x5a] sm:$0x3f]  ;;  %v2921_v63 = vld [vmem:[#allocation2 + $0x62] sm:$0xff]  ;;  %v2942_v55 = vmax.f32 %v95_v12, %v2907_v15  ;;  %v2944_v9 = vmax.f32 %v96_v13, %v128_v54  ;;  %v2947_v16 = vmax.f32 %v97_v14, %v2909_v3 }
  0x37   :  { %6906 = vst [vmem:[#allocation70_spill] sm:$0xff] %v2921_v63  ;;  %v132_v62 = vld [vmem:[#allocation2 + $0x6a] sm:$0x3f]  ;;  %v2928_v25 = vld [vmem:[#allocation2 + $0x72] sm:$0xff]  ;;  %v134_v47 = vld [vmem:[#allocation2 + $0x7a] sm:$0x3f]  ;;  %v6912_v58 = vmax.f32 %v2747_v19, %v2755_v23  ;;  %v2961_v12 = vmax.f32 %v99_v20, %v2921_v63  ;;  %v184_v14 = vmax.f32 %v2911_v61, %v2913_v51  ;;  %v6914_v15 = vmax.f32 %v2761_v26, %v2769_v30 }
  0x38   :  { %6907 = vst [vmem:[#allocation71_spill] sm:$0xff] %v2928_v25  ;;  %v2930_v4 = vld [vmem:[#allocation2 + $0x82] sm:$0xff]  ;;  %v136_v10 = vld [vmem:[#allocation2 + $0x8a] sm:$0x3f]  ;;  %v2939_v11 = vld [vmem:[#allocation2 + $0x92] sm:$0xff]  ;;  %v2963_v13 = vmax.f32 %v100_v21, %v132_v62  ;;  %v185_v61 = vmax.f32 %v2901_v29, %v2924_v60  ;;  %v6917_v30 = vmax.f32 %v2775_v33, %v2783_v37  ;;  %v186_v29 = vmax.f32 %v2913_v51, %v2932_v7 }
  0x39   :  { %6908 = vst [vmem:[#allocation72_spill] sm:$0xff] %v2930_v4  ;;  %6909 = vst [vmem:[#allocation73_spill] sm:$0xff] %v2939_v11  ;;  %v138_v49 = vld [vmem:[#allocation2 + $0x9a] sm:$0x3f]  ;;  %v2951_v56 = vld [vmem:[#allocation2 + $0xa2] sm:$0xff]  ;;  %v2958_v1 = vmax.f32 %v6912_v58, %v130_v18  ;;  %v2973_v32 = vmax.f32 %v6914_v15, %v2928_v25  ;;  %v6915_v18 = vmax.f32 %v2763_v27, %v2771_v31 }
  0x3a   :  { %6910 = vst [vmem:[#allocation74_spill] sm:$0xff] %v2951_v56  ;;  %v140_v57 = vld [vmem:[#allocation2 + $0xaa] sm:$0x3f]  ;;  %v2953_v8 = vld [vmem:[#allocation2 + $0xb2] sm:$0xff]  ;;  %v142_v54 = vld [vmem:[#allocation2 + $0xba] sm:$0x3f]  ;;  %v2981_v21 = vmax.f32 %v103_v28, %v2930_v4  ;;  %v168_v15 = vmax.f32 %v6917_v30, %v136_v10  ;;  %v6918_v25 = vmax.f32 %v2777_v34, %v2785_v38  ;;  %v6919_v28 = vmax.f32 %v2779_v35, %v2795_v43 }
  0x3b   :  { %6911 = vst [vmem:[#allocation75_spill] sm:$0xff] %v2953_v8  ;;  %v2967_v36 = vld [vmem:[#allocation2 + $0xc2] sm:$0xff]  ;;  %v144_v3 = vld [vmem:[#allocation2 + $0xca] sm:$0x3f]  ;;  %v2978_v20 = vmax.f32 %v6915_v18, %v134_v47  ;;  %v2985_v62 = vld [vmem:[#allocation2 + $0xd2] sm:$0xff]  ;;  %v6920_v37 = vmax.f32 %v2787_v39, %v2797_v44  ;;  %v6921_v10 = vmax.f32 %v2789_v40, %v2799_v45  ;;  %v187_v51 = vmax.f32 %v2924_v60, %v2935_v6 }
  0x3c   :  { %6913 = vst [vmem:[#allocation76_spill] sm:$0xff] %v2967_v36  ;;  %6916 = vst [vmem:[#allocation77_spill] sm:$0xff] %v2985_v62  ;;  %v146_v58 = vld [vmem:[#allocation2 + $0xda] sm:$0x3f]  ;;  %v147_v63 = vld [vmem:[#allocation2 + $0xe2] sm:$0xff]  ;;  %v169_v47 = vmax.f32 %v6918_v25, %v2939_v11  ;;  %v170_v18 = vmax.f32 %v6919_v28, %v138_v49  ;;  %v6922_v25 = vmax.f32 %v2791_v41, %v2813_v52 }
  0x3d   :  { %v148_v4 = vld [vmem:[#allocation2 + $0xea] sm:$0x3f]  ;;  %v149_v31 = vld [vmem:[#allocation2 + $0xf2] sm:$0xff]  ;;  %v150_v23 = vld [vmem:[#allocation2 + $0xfa] sm:$0x3f]  ;;  %v171_v30 = vmax.f32 %v6920_v37, %v2951_v56  ;;  %v172_v38 = vmax.f32 %v6921_v10, %v140_v57  ;;  %v6923_v28 = vmax.f32 %v2793_v42, %v2815_v53  ;;  %v188_v52 = vmax.f32 %v2932_v7, %v2937_v5 }
  0x3e   :  { %v173_v49 = vmax.f32 %v6922_v25, %v2953_v8  ;;  %v6924_v44 = vld [vmem:[#allocation58_spill] sm:$0xff]  ;;  %v6926_v43 = vld [vmem:[#allocation55_spill] sm:$0xff]  ;;  %v6927_v45 = vld [vmem:[#allocation61_spill] sm:$0xff]  ;;  %v177_v25 = vmax.f32 %v113_v22, %v2985_v62  ;;  %v178_v8 = vmax.f32 %v114_v0, %v146_v58  ;;  %v179_v59 = vmax.f32 %v115_v46, %v147_v63 }
  0x3f   :  { %v174_v11 = vmax.f32 %v6923_v28, %v142_v54  ;;  %v6925_v37 = vmax.f32 %v2809_v50, %v6924_v44  ;;  %v6928_v57 = vmax.f32 %v6926_v43, %v6927_v45  ;;  %v189_v53 = vmax.f32 %v2935_v6, %v2942_v55 }
  0x40   :  { %v180_v54 = vmax.f32 %v116_v48, %v148_v4  ;;  %v181_v28 = vmax.f32 %v117_v17, %v149_v31  ;;  %v182_v42 = vmax.f32 %v118_v24, %v150_v23  ;;  %v193_v22 = vmax.f32 %v2947_v16, %v2961_v12 }
  0x41   :  { %v175_v56 = vmax.f32 %v6925_v37, %v2967_v36  ;;  %v176_v10 = vmax.f32 %v6928_v57, %v144_v3  ;;  %v190_v37 = vmax.f32 %v2937_v5, %v2944_v9  ;;  %v191_v36 = vmax.f32 %v2942_v55, %v2947_v16 }
  0x42   :  { %v192_v3 = vmax.f32 %v2944_v9, %v2958_v1  ;;  %v194_v0 = vmax.f32 %v2958_v1, %v2963_v13  ;;  %v195_v63 = vmax.f32 %v2961_v12, %v2973_v32  ;;  %v196_v17 = vmax.f32 %v2963_v13, %v2978_v20 }
  0x43   :  { %v197_v23 = vmax.f32 %v2973_v32, %v2981_v21  ;;  %v198_v31 = vmax.f32 %v2978_v20, %v168_v15  ;;  %v199_v46 = vmax.f32 %v2981_v21, %v169_v47  ;;  %v200_v48 = vmax.f32 %v168_v15, %v170_v18 }
  0x44   :  { %v201_v24 = vmax.f32 %v169_v47, %v171_v30  ;;  %v202_v4 = vmax.f32 %v170_v18, %v172_v38  ;;  %v203_v58 = vmax.f32 %v171_v30, %v173_v49  ;;  %v204_v57 = vmax.f32 %v172_v38, %v174_v11 }
  0x45   :  { %v205_v62 = vmax.f32 %v173_v49, %v175_v56  ;;  %v206_v45 = vmax.f32 %v174_v11, %v176_v10  ;;  %v207_v44 = vmax.f32 %v175_v56, %v177_v25  ;;  %v208_v43 = vmax.f32 %v176_v10, %v178_v8 }
  0x46   :  { %v209_v50 = vmax.f32 %v177_v25, %v179_v59  ;;  %v210_v41 = vmax.f32 %v178_v8, %v180_v54  ;;  %v3046_v40 = vmax.f32 %v183_v2, %v2924_v60  ;;  %v3049_v39 = vmax.f32 %v184_v14, %v2932_v7 }
  0x47   :  { %v3052_v35 = vmax.f32 %v185_v61, %v2935_v6  ;;  %v3055_v34 = vmax.f32 %v186_v29, %v2937_v5  ;;  %v3058_v33 = vmax.f32 %v187_v51, %v2942_v55  ;;  %v3061_v27 = vmax.f32 %v188_v52, %v2944_v9  ;;  %v6958_v29 = vld [vmem:[#allocation10_spill] sm:$0xff]  ;;  %v6964_v51 = vld [vmem:[#allocation24_spill] sm:$0xff] }
  0x48   :  { %6929 = vst [vmem:[#allocation78_spill] sm:$0xff] %v3046_v40  ;;  %6930 = vst [vmem:[#allocation79_spill] sm:$0xff] %v3049_v39  ;;  %v3064_v26 = vmax.f32 %v189_v53, %v2947_v16  ;;  %v3067_v60 = vmax.f32 %v190_v37, %v2958_v1  ;;  %v3070_v7 = vmax.f32 %v191_v36, %v2961_v12 }
  0x49   :  { %6931 = vst [vmem:[#allocation80_spill] sm:$0xff] %v3052_v35  ;;  %6932 = vst [vmem:[#allocation81_spill] sm:$0xff] %v3055_v34  ;;  %v3073_v6 = vmax.f32 %v192_v3, %v2963_v13  ;;  %v3076_v5 = vmax.f32 %v193_v22, %v2973_v32  ;;  %v3079_v55 = vmax.f32 %v194_v0, %v2978_v20  ;;  %v6967_v22 = vld [vmem:[#allocation32_spill] sm:$0xff] }
  0x4a   :  { %6933 = vst [vmem:[#allocation82_spill] sm:$0xff] %v3058_v33  ;;  %6934 = vst [vmem:[#allocation83_spill] sm:$0xff] %v3064_v26  ;;  %v3082_v52 = vmax.f32 %v195_v63, %v2981_v21  ;;  %v3084_v53 = vmax.f32 %v196_v17, %v168_v15  ;;  %v3086_v9 = vmax.f32 %v197_v23, %v169_v47  ;;  %v6968_v63 = vld [vmem:[#allocation33_spill] sm:$0xff]  ;;  %v6969_v23 = vld [vmem:[#allocation34_spill] sm:$0xff] }
  0x4b   :  { %6935 = vst [vmem:[#allocation84_spill] sm:$0xff] %v3067_v60  ;;  %6936 = vst [vmem:[#allocation85_spill] sm:$0xff] %v3070_v7  ;;  %v3088_v1 = vmax.f32 %v198_v31, %v170_v18  ;;  %v3090_v16 = vmax.f32 %v199_v46, %v171_v30  ;;  %v3092_v2 = vmax.f32 %v200_v48, %v172_v38  ;;  %v6955_v38 = vld [vmem:[#allocation8_spill] sm:$0xff]  ;;  %v6962_v30 = vld [vmem:[#allocation18_spill] sm:$0xff] }
  0x4c   :  { %6937 = vst [vmem:[#allocation86_spill] sm:$0xff] %v3073_v6  ;;  %6938 = vst [vmem:[#allocation87_spill] sm:$0xff] %v3076_v5  ;;  %v3094_v12 = vmax.f32 %v201_v24, %v173_v49  ;;  %v3096_v32 = vmax.f32 %v202_v4, %v174_v11  ;;  %v3098_v13 = vmax.f32 %v203_v58, %v175_v56  ;;  %v6957_v11 = vld [vmem:[#allocation9_spill] sm:$0xff]  ;;  %v6970_v48 = vld [vmem:[#allocation35_spill] sm:$0xff] }
  0x4d   :  { %6939 = vst [vmem:[#allocation88_spill] sm:$0xff] %v3079_v55  ;;  %6940 = vst [vmem:[#allocation89_spill] sm:$0xff] %v3082_v52  ;;  %v3100_v14 = vmax.f32 %v204_v57, %v176_v10  ;;  %v3102_v36 = vmax.f32 %v205_v62, %v177_v25  ;;  %v3104_v20 = vmax.f32 %v206_v45, %v178_v8  ;;  %v6959_v45 = vld [vmem:[#allocation11_spill] sm:$0xff]  ;;  %v6965_v25 = vld [vmem:[#allocation25_spill] sm:$0xff] }
  0x4e   :  { %6941 = vst [vmem:[#allocation90_spill] sm:$0xff] %v3084_v53  ;;  %6942 = vst [vmem:[#allocation91_spill] sm:$0xff] %v3086_v9  ;;  %v3106_v21 = vmax.f32 %v207_v44, %v179_v59  ;;  %v3108_v61 = vmax.f32 %v208_v43, %v180_v54  ;;  %v3110_v15 = vmax.f32 %v209_v50, %v181_v28  ;;  %v6960_v44 = vld [vmem:[#allocation16_spill] sm:$0xff]  ;;  %v6961_v50 = vld [vmem:[#allocation17_spill] sm:$0xff] }
  0x4f   :  { %6943 = vst [vmem:[#allocation92_spill] sm:$0xff] %v3088_v1  ;;  %6944 = vst [vmem:[#allocation93_spill] sm:$0xff] %v3090_v16  ;;  %v239_v47 = vsub.f32 %v6955_v38, %v3046_v40  ;;  %v3114_v18 = vmax.f32 %v210_v41, %v182_v42  ;;  %v240_v56 = vsub.f32 %v6957_v11, %v3049_v39  ;;  %v6963_v41 = vld [vmem:[#allocation19_spill] sm:$0xff]  ;;  %v6966_v28 = vld [vmem:[#allocation26_spill] sm:$0xff] }
  0x50   :  { %6945 = vst [vmem:[#allocation94_spill] sm:$0xff] %v3092_v2  ;;  %6946 = vst [vmem:[#allocation95_spill] sm:$0xff] %v3094_v12  ;;  %v241_v62 = vsub.f32 %v6958_v29, %v3052_v35  ;;  %v242_v8 = vsub.f32 %v6959_v45, %v3055_v34  ;;  %v243_v43 = vsub.f32 %v6960_v44, %v3058_v33  ;;  %v6971_v4 = vld [vmem:[#allocation40_spill] sm:$0xff]  ;;  %v6972_v57 = vld [vmem:[#allocation41_spill] sm:$0xff] }
  0x51   :  { %6947 = vst [vmem:[#allocation96_spill] sm:$0xff] %v3096_v32  ;;  %6948 = vst [vmem:[#allocation97_spill] sm:$0xff] %v3098_v13  ;;  %v244_v59 = vsub.f32 %v6961_v50, %v3061_v27  ;;  %v245_v49 = vsub.f32 %v6962_v30, %v3064_v26  ;;  %v246_v42 = vsub.f32 %v6963_v41, %v3067_v60  ;;  %v267_v46 = vmul.f32 1.442695, %v239_v47  ;;  %v6975_v41 = vld [vmem:[#allocation47_spill] sm:$0xff]  ;;  %v6976_v30 = vld [vmem:[#allocation48_spill] sm:$0xff] }
  0x52   :  { %6949 = vst [vmem:[#allocation98_spill] sm:$0xff] %v3100_v14  ;;  %6950 = vst [vmem:[#allocation99_spill] sm:$0xff] %v3102_v36  ;;  %v247_v10 = vsub.f32 %v6964_v51, %v3070_v7  ;;  %v248_v54 = vsub.f32 %v6965_v25, %v3073_v6  ;;  %v249_v37 = vsub.f32 %v6966_v28, %v3076_v5  ;;  %v6973_v25 = vld [vmem:[#allocation42_spill] sm:$0xff]  ;;  %v6974_v51 = vld [vmem:[#allocation43_spill] sm:$0xff]  ;;  %v271_v47 = vmul.f32 1.442695, %v241_v62 }
  0x53   :  { %6951 = vst [vmem:[#allocation100_spill] sm:$0xff] %v3104_v20  ;;  %6952 = vst [vmem:[#allocation101_spill] sm:$0xff] %v3106_v21  ;;  %v250_v3 = vsub.f32 %v2747_v19, %v3079_v55  ;;  %v251_v0 = vsub.f32 %v6967_v22, %v3082_v52  ;;  %v252_v17 = vsub.f32 %v6968_v63, %v3084_v53  ;;  %v269_v19 = vmul.f32 1.442695, %v240_v56  ;;  %v6977_v50 = vld [vmem:[#allocation49_spill] sm:$0xff]  ;;  %v6978_v44 = vld [vmem:[#allocation50_spill] sm:$0xff] }
  0x54   :  { %6953 = vst [vmem:[#allocation102_spill] sm:$0xff] %v3108_v61  ;;  %6954 = vst [vmem:[#allocation103_spill] sm:$0xff] %v3110_v15  ;;  %v253_v31 = vsub.f32 %v6969_v23, %v3086_v9  ;;  %v254_v24 = vsub.f32 %v6970_v48, %v3088_v1  ;;  %v255_v58 = vsub.f32 %v6971_v4, %v3090_v16  ;;  %v273_v56 = vmul.f32 1.442695, %v242_v8  ;;  %v6981_v62 = vld [vmem:[#allocation59_spill] sm:$0xff]  ;;  %v6983_v8 = vld [vmem:[#allocation12_spill] sm:$0xff] }
  0x55   :  { %6956 = vst [vmem:[#allocation8_spill] sm:$0xff] %v3114_v18  ;;  %v256_v28 = vsub.f32 %v6972_v57, %v3092_v2  ;;  %v257_v22 = vsub.f32 %v6973_v25, %v3094_v12  ;;  %v258_v63 = vsub.f32 %v6974_v51, %v3096_v32  ;;  %v259_v23 = vsub.f32 %v6975_v41, %v3098_v13  ;;  %v6979_v2 = vld [vmem:[#allocation54_spill] sm:$0xff]  ;;  %v6980_v12 = vld [vmem:[#allocation55_spill] sm:$0xff] }
  0x56   :  { %v260_v48 = vsub.f32 %v6976_v30, %v3100_v14  ;;  %v261_v4 = vsub.f32 %v6977_v50, %v3102_v36  ;;  %v262_v57 = vsub.f32 %v6978_v44, %v3104_v20  ;;  %v263_v25 = vsub.f32 %v6979_v2, %v3106_v21  ;;  %v6982_v30 = vld [vmem:[#allocation60_spill] sm:$0xff]  ;;  %v6984_v2 = vld [vmem:[#allocation13_spill] sm:$0xff]  ;;  %v7053_v13 = vld [vmem:[#allocation26_spill] sm:$0xff] }
  0x57   :  { %v264_v51 = vsub.f32 %v6980_v12, %v3108_v61  ;;  %2054 = vpow2.f32 %v267_v46  ;;  %v275_v32 = vmul.f32 1.442695, %v243_v43  ;;  %v265_v41 = vsub.f32 %v6981_v62, %v3110_v15 }
  0x58   :  { %v266_v14 = vsub.f32 %v6982_v30, %v3114_v18  ;;  %2056 = vpow2.f32 %v269_v19  ;;  %v277_v50 = vmul.f32 1.442695, %v244_v59  ;;  %v279_v36 = vmul.f32 1.442695, %v245_v49 }
  0x59   :  { %2058 = vpow2.f32 %v271_v47  ;;  %v281_v12 = vmul.f32 1.442695, %v246_v42  ;;  %v283_v46 = vmul.f32 1.442695, %v247_v10  ;;  %v285_v43 = vmul.f32 1.442695, %v248_v54 }
  0x5a   :  { %2060 = vpow2.f32 %v273_v56  ;;  %v287_v61 = vmul.f32 1.442695, %v249_v37  ;;  %v289_v62 = vmul.f32 1.442695, %v250_v3  ;;  %v291_v15 = vmul.f32 1.442695, %v251_v0 }
  0x5b   :  { %2062 = vpow2.f32 %v275_v32  ;;  %v293_v30 = vmul.f32 1.442695, %v252_v17  ;;  %v295_v19 = vmul.f32 1.442695, %v253_v31  ;;  %v297_v59 = vmul.f32 1.442695, %v254_v24 }
  0x5c   :  { %2064 = vpow2.f32 %v277_v50  ;;  %v299_v49 = vmul.f32 1.442695, %v255_v58  ;;  %v301_v47 = vmul.f32 1.442695, %v256_v28  ;;  %v303_v18 = vmul.f32 1.442695, %v257_v22 }
  0x5d   :  { %2066 = vpow2.f32 %v279_v36  ;;  %v305_v44 = vmul.f32 1.442695, %v258_v63  ;;  %v307_v40 = vmul.f32 1.442695, %v259_v23  ;;  %v3174_v21 = vmul.f32 1.442695, %v260_v48 }
  0x5e   :  { %2068 = vpow2.f32 %v281_v12  ;;  %v3176_v42 = vmul.f32 1.442695, %v261_v4  ;;  %v3178_v32 = vmul.f32 1.442695, %v262_v57  ;;  %v3180_v10 = vmul.f32 1.442695, %v263_v25 }
  0x5f   :  { %2070 = vpow2.f32 %v283_v46  ;;  %v3182_v50 = vmul.f32 1.442695, %v264_v51  ;;  %v3184_v54 = vmul.f32 1.442695, %v265_v41  ;;  %v3186_v36 = vmul.f32 1.442695, %v266_v14 }
  0x60   :  { %2072 = vpow2.f32 %v285_v43  ;;  %v6986_v12 = vld [vmem:[#allocation14_spill] sm:$0xff]  ;;  %v6987_v3 = vld [vmem:[#allocation15_spill] sm:$0xff]  ;;  %v6988_v0 = vld [vmem:[#allocation20_spill] sm:$0xff] }
  0x61   :  { %v3188_v28 = vpop.eup %2054  ;;  %2074 = vpow2.f32 %v287_v61  ;;  %v409_v37 = vsub.f32 %v6986_v12, %v3052_v35  ;;  %v6990_v41 = vld [vmem:[#allocation21_spill] sm:$0xff]  ;;  %v6991_v14 = vld [vmem:[#allocation22_spill] sm:$0xff]  ;;  %v6992_v61 = vld [vmem:[#allocation23_spill] sm:$0xff] }
  0x62   :  { %6985 = vst [vmem:[#allocation9_spill] sm:$0xff] %v3188_v28  ;;  %v3196_v63 = vpop.eup %2056  ;;  %2076 = vpow2.f32 %v289_v62  ;;  %v6994_v48 = vld [vmem:[#allocation28_spill] sm:$0xff]  ;;  %v6995_v4 = vld [vmem:[#allocation29_spill] sm:$0xff]  ;;  %v6996_v57 = vld [vmem:[#allocation30_spill] sm:$0xff]  ;;  %v3216_v46 = vmul.f32 %v3188_v28, %v6955_v38 }
  0x63   :  { %6989 = vst [vmem:[#allocation10_spill] sm:$0xff] %v3196_v63  ;;  %v3204_v31 = vpop.eup %2058  ;;  %2078 = vpow2.f32 %v291_v15  ;;  %v6999_v43 = vld [vmem:[#allocation31_spill] sm:$0xff]  ;;  %v7000_v15 = vld [vmem:[#allocation36_spill] sm:$0xff]  ;;  %v3226_v58 = vmul.f32 %v3196_v63, %v6957_v11  ;;  %v7003_v56 = vld [vmem:[#allocation37_spill] sm:$0xff] }
  0x64   :  { %6993 = vst [vmem:[#allocation11_spill] sm:$0xff] %v3204_v31  ;;  %v3212_v62 = vpop.eup %2060  ;;  %2080 = vpow2.f32 %v293_v30  ;;  %6998 = vst [vmem:[#allocation15_spill] sm:$0xff] %v3216_v46  ;;  %v7004_v51 = vld [vmem:[#allocation38_spill] sm:$0xff]  ;;  %v3236_v23 = vmul.f32 %v3204_v31, %v6958_v29  ;;  %v7007_v17 = vld [vmem:[#allocation39_spill] sm:$0xff] }
  0x65   :  { %6997 = vst [vmem:[#allocation13_spill] sm:$0xff] %v3212_v62  ;;  %v3222_v24 = vpop.eup %2062  ;;  %2082 = vpow2.f32 %v295_v19  ;;  %7002 = vst [vmem:[#allocation23_spill] sm:$0xff] %v3226_v58  ;;  %v7008_v22 = vld [vmem:[#allocation44_spill] sm:$0xff]  ;;  %v3246_v30 = vmul.f32 %v3212_v62, %v6959_v45  ;;  %v7012_v46 = vld [vmem:[#allocation45_spill] sm:$0xff] }
  0x66   :  { %7001 = vst [vmem:[#allocation21_spill] sm:$0xff] %v3222_v24  ;;  %v3232_v25 = vpop.eup %2064  ;;  %2084 = vpow2.f32 %v297_v59  ;;  %7006 = vst [vmem:[#allocation31_spill] sm:$0xff] %v3236_v23  ;;  %v7016_v19 = vld [vmem:[#allocation16_spill] sm:$0xff]  ;;  %v7019_v28 = vld [vmem:[#allocation51_spill] sm:$0xff] }
  0x67   :  { %7005 = vst [vmem:[#allocation28_spill] sm:$0xff] %v3232_v25  ;;  %v3242_v58 = vpop.eup %2066  ;;  %2086 = vpow2.f32 %v299_v49  ;;  %7010 = vst [vmem:[#allocation104_spill] sm:$0xff] %v3246_v30  ;;  %v3256_v31 = vmul.f32 %v3222_v24, %v7016_v19  ;;  %v7018_v11 = vld [vmem:[#allocation96_spill] sm:$0xff]  ;;  %v7022_v59 = vld [vmem:[#allocation17_spill] sm:$0xff] }
  0x68   :  { %7009 = vst [vmem:[#allocation37_spill] sm:$0xff] %v3242_v58  ;;  %v3252_v23 = vpop.eup %2068  ;;  %2088 = vpow2.f32 %v301_v47  ;;  %v3266_v62 = vmul.f32 %v3232_v25, %v7022_v59  ;;  %v7025_v63 = vld [vmem:[#allocation53_spill] sm:$0xff]  ;;  %v7029_v49 = vld [vmem:[#allocation18_spill] sm:$0xff]  ;;  %v7035_v47 = vld [vmem:[#allocation19_spill] sm:$0xff] }
  0x69   :  { %7015 = vst [vmem:[#allocation45_spill] sm:$0xff] %v3252_v23  ;;  %7017 = vst [vmem:[#allocation16_spill] sm:$0xff] %v3256_v31  ;;  %v3262_v30 = vpop.eup %2070  ;;  %2090 = vpow2.f32 %v303_v18  ;;  %v3276_v24 = vmul.f32 %v3242_v58, %v7029_v49  ;;  %v7031_v45 = vld [vmem:[#allocation57_spill] sm:$0xff]  ;;  %v3286_v25 = vmul.f32 %v3252_v23, %v7035_v47  ;;  %v7037_v19 = vld [vmem:[#allocation102_spill] sm:$0xff] }
  0x6a   :  { %7021 = vst [vmem:[#allocation105_spill] sm:$0xff] %v3262_v30  ;;  %7023 = vst [vmem:[#allocation17_spill] sm:$0xff] %v3266_v62  ;;  %v3272_v31 = vpop.eup %2072  ;;  %2092 = vpow2.f32 %v305_v44  ;;  %v7038_v12 = vld [vmem:[#allocation61_spill] sm:$0xff]  ;;  %v7039_v38 = vld [vmem:[#allocation103_spill] sm:$0xff] }
  0x6b   :  { %7028 = vst [vmem:[#allocation106_spill] sm:$0xff] %v3272_v31  ;;  %7030 = vst [vmem:[#allocation18_spill] sm:$0xff] %v3276_v24  ;;  %v3282_v62 = vpop.eup %2074  ;;  %2094 = vpow2.f32 %v307_v40  ;;  %v7040_v29 = vld [vmem:[#allocation62_spill] sm:$0xff]  ;;  %v7042_v18 = vld [vmem:[#allocation24_spill] sm:$0xff] }
  0x6c   :  { %7034 = vst [vmem:[#allocation57_spill] sm:$0xff] %v3282_v62  ;;  %7036 = vst [vmem:[#allocation19_spill] sm:$0xff] %v3286_v25  ;;  %v3292_v24 = vpop.eup %2076  ;;  %2096 = vpow2.f32 %v3174_v21  ;;  %v3297_v59 = vmul.f32 %v3262_v30, %v7042_v18  ;;  %v7044_v58 = vld [vmem:[#allocation8_spill] sm:$0xff]  ;;  %v7045_v40 = vld [vmem:[#allocation63_spill] sm:$0xff]  ;;  %v7051_v21 = vsub.f32 %v6984_v2, %v3049_v39 }
  0x6d   :  { %7041 = vst [vmem:[#allocation61_spill] sm:$0xff] %v3292_v24  ;;  %v7046_v47 = vld [vmem:[#allocation78_spill] sm:$0xff]  ;;  %v3304_v35 = vpop.eup %2078  ;;  %2098 = vpow2.f32 %v3176_v42  ;;  %v7049_v49 = vld [vmem:[#allocation25_spill] sm:$0xff]  ;;  %v7055_v42 = vsub.f32 %v6987_v3, %v3055_v34 }
  0x6e   :  { %7043 = vst [vmem:[#allocation62_spill] sm:$0xff] %v3297_v59  ;;  %v7047_v25 = vsub.f32 %v6983_v8, %v7046_v47  ;;  %7048 = vst [vmem:[#allocation24_spill] sm:$0xff] %v3304_v35  ;;  %v3309_v44 = vmul.f32 %v3272_v31, %v7049_v49  ;;  %v437_v18 = vmul.f32 1.442695, %v7051_v21  ;;  %v439_v59 = vmul.f32 1.442695, %v409_v37  ;;  %v3314_v30 = vpop.eup %2080 }
  0x6f   :  { %7052 = vst [vmem:[#allocation25_spill] sm:$0xff] %v3314_v30  ;;  %2100 = vpow2.f32 %v3178_v32  ;;  %v441_v8 = vmul.f32 1.442695, %v7055_v42  ;;  %v7056_v49 = vsub.f32 %v6988_v0, %v3058_v33  ;;  %v3327_v31 = vpop.eup %2082  ;;  %v7058_v37 = vld [vmem:[#allocation27_spill] sm:$0xff]  ;;  %v3534_v47 = vld [vmem:[#allocation2 + $0x4a] sm:$0x3f] }
  0x70   :  { %v435_v23 = vmul.f32 1.442695, %v7047_v25  ;;  %7050 = vst [vmem:[#allocation63_spill] sm:$0xff] %v3309_v44  ;;  %v3319_v25 = vmul.f32 %v3282_v62, %v7053_v13  ;;  %7057 = vst [vmem:[#allocation107_spill] sm:$0xff] %v3327_v31  ;;  %2102 = vpow2.f32 %v3180_v10  ;;  %v3332_v21 = vmul.f32 %v3292_v24, %v7058_v37  ;;  %v3340_v62 = vpop.eup %2084  ;;  %v7134_v33 = vld [vmem:[#allocation60_spill] sm:$0xff] }
  0x71   :  { %v443_v44 = vmul.f32 1.442695, %v7056_v49  ;;  %v7060_v13 = vsub.f32 %v6990_v41, %v3061_v27  ;;  %7062 = vst [vmem:[#allocation108_spill] sm:$0xff] %v3340_v62  ;;  %2104 = vpow2.f32 %v3182_v50  ;;  %v7063_v49 = vld [vmem:[#allocation32_spill] sm:$0xff]  ;;  %v7065_v10 = vsub.f32 %v6992_v61, %v3067_v60  ;;  %v3353_v24 = vpop.eup %2086  ;;  %v7138_v60 = vld [vmem:[#allocation9_spill] sm:$0xff] }
  0x72   :  { %7054 = vst [vmem:[#allocation26_spill] sm:$0xff] %v3319_v25  ;;  %7059 = vst [vmem:[#allocation27_spill] sm:$0xff] %v3332_v21  ;;  %v7061_v25 = vsub.f32 %v6991_v14, %v3064_v26  ;;  %v3345_v0 = vmul.f32 %v3304_v35, %v7063_v49  ;;  %v7066_v21 = vsub.f32 %v6994_v48, %v3070_v7  ;;  %2106 = vpow2.f32 %v3184_v54  ;;  %v3368_v35 = vpop.eup %2088  ;;  %v7140_v26 = vld [vmem:[#allocation14_spill] sm:$0xff] }
  0x73   :  { %v445_v32 = vmul.f32 1.442695, %v7060_v13  ;;  %v449_v37 = vmul.f32 1.442695, %v7065_v10  ;;  %7067 = vst [vmem:[#allocation109_spill] sm:$0xff] %v3353_v24  ;;  %v7070_v50 = vsub.f32 %v6995_v4, %v3073_v6  ;;  %7072 = vst [vmem:[#allocation110_spill] sm:$0xff] %v3368_v35  ;;  %2108 = vpow2.f32 %v3186_v36 }
  0x74   :  { %v447_v42 = vmul.f32 1.442695, %v7061_v25  ;;  %7064 = vst [vmem:[#allocation32_spill] sm:$0xff] %v3345_v0  ;;  %v451_v13 = vmul.f32 1.442695, %v7066_v21  ;;  %v7068_v25 = vld [vmem:[#allocation33_spill] sm:$0xff]  ;;  %v7071_v0 = vsub.f32 %v6996_v57, %v3076_v5  ;;  %2110 = vpow2.f32 %v435_v23 }
  0x75   :  { %v3358_v14 = vmul.f32 %v3314_v30, %v7068_v25  ;;  %v453_v49 = vmul.f32 1.442695, %v7070_v50  ;;  %v7073_v21 = vld [vmem:[#allocation34_spill] sm:$0xff]  ;;  %v7075_v25 = vsub.f32 %v6999_v43, %v3079_v55  ;;  %v7076_v50 = vsub.f32 %v7000_v15, %v3082_v52  ;;  %v7078_v57 = vld [vmem:[#allocation35_spill] sm:$0xff] }
  0x76   :  { %v3366_v10 = vmul.f32 1.442695, %v7071_v0  ;;  %v3373_v54 = vmul.f32 %v3327_v31, %v7073_v21  ;;  %v3385_v0 = vpop.eup %2090  ;;  %v3389_v4 = vmul.f32 %v3340_v62, %v7078_v57  ;;  %v7080_v36 = vsub.f32 %v7003_v56, %v3084_v53 }
  0x77   :  { %7069 = vst [vmem:[#allocation33_spill] sm:$0xff] %v3358_v14  ;;  %v3378_v14 = vmul.f32 1.442695, %v7075_v25  ;;  %v3383_v30 = vmul.f32 1.442695, %v7076_v50  ;;  %7077 = vst [vmem:[#allocation111_spill] sm:$0xff] %v3385_v0  ;;  %v7081_v25 = vsub.f32 %v7004_v51, %v3086_v9  ;;  %v3401_v31 = vpop.eup %2092  ;;  %2112 = vpow2.f32 %v437_v18 }
  0x78   :  { %7074 = vst [vmem:[#allocation34_spill] sm:$0xff] %v3373_v54  ;;  %7079 = vst [vmem:[#allocation35_spill] sm:$0xff] %v3389_v4  ;;  %v3394_v21 = vmul.f32 1.442695, %v7080_v36  ;;  %v7083_v50 = vld [vmem:[#allocation40_spill] sm:$0xff]  ;;  %v7085_v23 = vsub.f32 %v7007_v17, %v3088_v1  ;;  %v7086_v36 = vsub.f32 %v7008_v22, %v3090_v16  ;;  %v3417_v62 = vpop.eup %2094  ;;  %2114 = vpow2.f32 %v439_v59  ;;  %v7091_v1 = vld [vmem:[#allocation46_spill] sm:$0xff] }
  0x79   :  { %v3399_v54 = vmul.f32 1.442695, %v7081_v25  ;;  %7082 = vst [vmem:[#allocation112_spill] sm:$0xff] %v3401_v31  ;;  %v3405_v15 = vmul.f32 %v3353_v24, %v7083_v50  ;;  %v7087_v25 = vld [vmem:[#allocation41_spill] sm:$0xff]  ;;  %v7089_v50 = vld [vmem:[#allocation94_spill] sm:$0xff]  ;;  %v3433_v16 = vpop.eup %2096  ;;  %2116 = vpow2.f32 %v441_v8  ;;  %v7096_v59 = vsub.f32 %v7019_v28, %v7018_v11  ;;  %v7104_v11 = vld [vmem:[#allocation56_spill] sm:$0xff] }
  0x7a   :  { %v3410_v57 = vmul.f32 1.442695, %v7085_v23  ;;  %v3415_v4 = vmul.f32 1.442695, %v7086_v36  ;;  %v3421_v51 = vmul.f32 %v3368_v35, %v7087_v25  ;;  %v7090_v18 = vsub.f32 %v7012_v46, %v7089_v50  ;;  %v7092_v23 = vld [vmem:[#allocation95_spill] sm:$0xff]  ;;  %v7094_v36 = vld [vmem:[#allocation42_spill] sm:$0xff] }
  0x7b   :  { %7084 = vst [vmem:[#allocation40_spill] sm:$0xff] %v3405_v15  ;;  %v7093_v24 = vsub.f32 %v7091_v1, %v7092_v23  ;;  %v3437_v22 = vmul.f32 %v3385_v0, %v7094_v36  ;;  %v3442_v25 = vmul.f32 1.442695, %v7096_v59  ;;  %v7097_v50 = vld [vmem:[#allocation52_spill] sm:$0xff]  ;;  %v3449_v23 = vpop.eup %2098  ;;  %2118 = vpow2.f32 %v443_v44  ;;  %v7102_v36 = vld [vmem:[#allocation98_spill] sm:$0xff]  ;;  %v7105_v59 = vld [vmem:[#allocation99_spill] sm:$0xff] }
  0x7c   :  { %7088 = vst [vmem:[#allocation41_spill] sm:$0xff] %v3421_v51  ;;  %v3426_v15 = vmul.f32 1.442695, %v7090_v18  ;;  %v7098_v18 = vld [vmem:[#allocation97_spill] sm:$0xff]  ;;  %v7103_v8 = vsub.f32 %v7025_v63, %v7102_v36  ;;  %v7106_v0 = vsub.f32 %v7104_v11, %v7105_v59  ;;  %2120 = vpow2.f32 %v445_v32  ;;  %v7110_v36 = vld [vmem:[#allocation58_spill] sm:$0xff]  ;;  %v7113_v11 = vld [vmem:[#allocation48_spill] sm:$0xff] }
  0x7d   :  { %v3431_v17 = vmul.f32 1.442695, %v7093_v24  ;;  %7095 = vst [vmem:[#allocation42_spill] sm:$0xff] %v3437_v22  ;;  %v7099_v51 = vsub.f32 %v7097_v50, %v7098_v18  ;;  %v7100_v24 = vld [vmem:[#allocation43_spill] sm:$0xff]  ;;  %v3465_v18 = vpop.eup %2100  ;;  %v7109_v44 = vsub.f32 %v7031_v45, %v3104_v20  ;;  %v3481_v59 = vld [vmem:[#allocation2 + $0xa] sm:$0x3f]  ;;  %2122 = vpow2.f32 %v447_v42 }
  0x7e   :  { %v3453_v1 = vmul.f32 %v3401_v31, %v7100_v24  ;;  %v3458_v22 = vmul.f32 1.442695, %v7103_v8  ;;  %v3463_v28 = vmul.f32 1.442695, %v7106_v0  ;;  %v7111_v8 = vld [vmem:[#allocation101_spill] sm:$0xff]  ;;  %v3483_v0 = vpop.eup %2102  ;;  %v3487_v31 = vmul.f32 %v3433_v16, %v7113_v11 }
  0x7f   :  { %v3447_v35 = vmul.f32 1.442695, %v7099_v51  ;;  %v7107_v51 = vld [vmem:[#allocation47_spill] sm:$0xff]  ;;  %v3474_v24 = vmul.f32 1.442695, %v7109_v44  ;;  %v7115_v32 = vsub.f32 %v7038_v12, %v7037_v19  ;;  %v7116_v44 = vsub.f32 %v7040_v29, %v7039_v38  ;;  %v7117_v20 = vld [vmem:[#allocation49_spill] sm:$0xff] }
  0x80   :  { %7101 = vst [vmem:[#allocation43_spill] sm:$0xff] %v3453_v1  ;;  %v3469_v50 = vmul.f32 %v3417_v62, %v7107_v51  ;;  %v7112_v1 = vsub.f32 %v7110_v36, %v7111_v8  ;;  %7114 = vst [vmem:[#allocation58_spill] sm:$0xff] %v3487_v31  ;;  %v3501_v8 = vpop.eup %2104  ;;  %2124 = vpow2.f32 %v449_v37  ;;  %v7119_v11 = vsub.f32 %v7045_v40, %v7044_v58  ;;  %v3512_v42 = vld [vmem:[#allocation2 + $0x2a] sm:$0x3f]  ;;  %v7121_v38 = vld [vmem:[#allocation50_spill] sm:$0xff] }
  0x81   :  { %v3492_v51 = vmul.f32 1.442695, %v7115_v32  ;;  %v3497_v36 = vmul.f32 1.442695, %v7116_v44  ;;  %v3516_v44 = vpop.eup %2106  ;;  %v3520_v19 = vmul.f32 %v3465_v18, %v7121_v38  ;;  %2126 = vpow2.f32 %v451_v13  ;;  %v7126_v31 = vld [vmem:[#allocation54_spill] sm:$0xff]  ;;  %v7129_v37 = vld [vmem:[#allocation55_spill] sm:$0xff] }
  0x82   :  { %7108 = vst [vmem:[#allocation47_spill] sm:$0xff] %v3469_v50  ;;  %v3479_v63 = vmul.f32 1.442695, %v7112_v1  ;;  %v3499_v1 = vld [vmem:[#allocation2 + $0x1a] sm:$0x3f]  ;;  %v3505_v50 = vmul.f32 %v3449_v23, %v7117_v20  ;;  %v3532_v32 = vmul.f32 %v3483_v0, %v7126_v31  ;;  %2128 = vpow2.f32 %v453_v49  ;;  %v7128_v13 = vld [vmem:[#allocation66_spill] sm:$0xff] }
  0x83   :  { %v3510_v12 = vmul.f32 1.442695, %v7119_v11  ;;  %7122 = vst [vmem:[#allocation49_spill] sm:$0xff] %v3520_v19  ;;  %v3522_v20 = vld [vmem:[#allocation2 + $0x3a] sm:$0x3f]  ;;  %v7125_v11 = vld [vmem:[#allocation65_spill] sm:$0xff]  ;;  %v3542_v39 = vmul.f32 %v3501_v8, %v7129_v37  ;;  %2130 = vpow2.f32 %v3366_v10 }
  0x84   :  { %7118 = vst [vmem:[#allocation48_spill] sm:$0xff] %v3505_v50  ;;  %7123 = vst [vmem:[#allocation50_spill] sm:$0xff] %v3522_v20  ;;  %v3528_v50 = vpop.eup %2108  ;;  %v3545_v58 = vld [vmem:[#allocation2 + $0x5a] sm:$0x3f]  ;;  %2132 = vpow2.f32 %v3378_v14  ;;  %v7136_v37 = vld [vmem:[#allocation12_spill] sm:$0xff] }
  0x85   :  { %7127 = vst [vmem:[#allocation65_spill] sm:$0xff] %v3532_v32  ;;  %v2111_v29 = vpop.eup %2110  ;;  %7130 = vst [vmem:[#allocation54_spill] sm:$0xff] %v3542_v39  ;;  %v7132_v38 = vld [vmem:[#allocation59_spill] sm:$0xff]  ;;  %v3562_v31 = vmul.f32 %v3528_v50, %v7134_v33  ;;  %2134 = vpow2.f32 %v3383_v30  ;;  %v3565_v32 = vld [vmem:[#allocation2 + $0x6a] sm:$0x3f] }
  0x86   :  { %v2113_v40 = vpop.eup %2112  ;;  %v3553_v34 = vmul.f32 %v3516_v44, %v7132_v38  ;;  %2136 = vpow2.f32 %v3394_v21  ;;  %v519_v19 = vmul.f32 %v2111_v29, %v7136_v37  ;;  %v7137_v33 = vld [vmem:[#allocation70_spill] sm:$0xff]  ;;  %v3579_v20 = vadd.f32 %v2111_v29, %v7138_v60  ;;  %v7143_v60 = vld [vmem:[#allocation11_spill] sm:$0xff] }
  0x87   :  { %v2115_v39 = vpop.eup %2114  ;;  %2138 = vpow2.f32 %v3399_v54  ;;  %v520_v38 = vmul.f32 %v2113_v40, %v6984_v2  ;;  %v7141_v21 = vld [vmem:[#allocation10_spill] sm:$0xff]  ;;  %v7145_v2 = vld [vmem:[#allocation20_spill] sm:$0xff]  ;;  %v7148_v10 = vld [vmem:[#allocation15_spill] sm:$0xff] }
  0x88   :  { %v2117_v49 = vpop.eup %2116  ;;  %7139 = vst [vmem:[#allocation66_spill] sm:$0xff] %v3579_v20  ;;  %v521_v5 = vmul.f32 %v2115_v39, %v7140_v26  ;;  %2140 = vpow2.f32 %v3410_v57  ;;  %v3585_v37 = vadd.f32 %v2113_v40, %v7141_v21  ;;  %v3592_v54 = vadd.f32 %v2115_v39, %v7143_v60  ;;  %v7146_v26 = vld [vmem:[#allocation71_spill] sm:$0xff]  ;;  %v7147_v40 = vld [vmem:[#allocation13_spill] sm:$0xff] }
  0x89   :  { %v2119_v30 = vpop.eup %2118  ;;  %v522_v7 = vmul.f32 %v2117_v49, %v6987_v3  ;;  %2142 = vpow2.f32 %v3415_v4  ;;  %v3599_v21 = vadd.f32 %v2117_v49, %v7147_v40  ;;  %v7150_v39 = vld [vmem:[#allocation21_spill] sm:$0xff]  ;;  %v7152_v20 = vld [vmem:[#allocation31_spill] sm:$0xff]  ;;  %v7153_v49 = vld [vmem:[#allocation28_spill] sm:$0xff] }
  0x8a   :  { %v2121_v14 = vpop.eup %2120  ;;  %7142 = vst [vmem:[#allocation55_spill] sm:$0xff] %v3585_v37  ;;  %7144 = vst [vmem:[#allocation59_spill] sm:$0xff] %v3592_v54  ;;  %v523_v29 = vmul.f32 %v2119_v30, %v7145_v2  ;;  %2144 = vpow2.f32 %v3426_v15  ;;  %v3603_v37 = vadd.f32 %v519_v19, %v7148_v10  ;;  %v3607_v60 = vadd.f32 %v2119_v30, %v7150_v39  ;;  %v7151_v2 = vld [vmem:[#allocation23_spill] sm:$0xff]  ;;  %v7154_v19 = vld [vmem:[#allocation22_spill] sm:$0xff] }
  0x8b   :  { %v2123_v52 = vpop.eup %2122  ;;  %v524_v3 = vmul.f32 %v2121_v14, %v6990_v41  ;;  %2146 = vpow2.f32 %v3431_v17  ;;  %v3610_v54 = vadd.f32 %v520_v38, %v7151_v2  ;;  %v3613_v9 = vadd.f32 %v521_v5, %v7152_v20  ;;  %v7155_v40 = vld [vmem:[#allocation104_spill] sm:$0xff]  ;;  %v7157_v30 = vld [vmem:[#allocation37_spill] sm:$0xff] }
  0x8c   :  { %v2125_v57 = vpop.eup %2124  ;;  %7149 = vst [vmem:[#allocation60_spill] sm:$0xff] %v3603_v37  ;;  %2148 = vpow2.f32 %v3442_v25  ;;  %v3617_v41 = vadd.f32 %v2121_v14, %v7153_v49  ;;  %v525_v10 = vmul.f32 %v2123_v52, %v7154_v19  ;;  %v3621_v37 = vadd.f32 %v522_v7, %v7155_v40  ;;  %v7158_v20 = vld [vmem:[#allocation16_spill] sm:$0xff]  ;;  %v7160_v14 = vld [vmem:[#allocation45_spill] sm:$0xff] }
  0x8d   :  { %v2127_v4 = vpop.eup %2126  ;;  %2150 = vpow2.f32 %v3447_v35  ;;  %v3625_v38 = vadd.f32 %v2123_v52, %v7157_v30  ;;  %v526_v5 = vmul.f32 %v2125_v57, %v6992_v61  ;;  %v3629_v39 = vadd.f32 %v523_v29, %v7158_v20  ;;  %v7162_v49 = vld [vmem:[#allocation17_spill] sm:$0xff]  ;;  %v7167_v30 = vld [vmem:[#allocation30_spill] sm:$0xff] }
  0x8e   :  { %v2129_v15 = vpop.eup %2128  ;;  %7156 = vst [vmem:[#allocation12_spill] sm:$0xff] %v3621_v37  ;;  %2152 = vpow2.f32 %v3458_v22  ;;  %v3633_v2 = vadd.f32 %v2125_v57, %v7160_v14  ;;  %v527_v7 = vmul.f32 %v2127_v4, %v6994_v48  ;;  %v3637_v19 = vadd.f32 %v524_v3, %v7162_v49  ;;  %v7164_v52 = vld [vmem:[#allocation105_spill] sm:$0xff]  ;;  %v7168_v22 = vld [vmem:[#allocation106_spill] sm:$0xff] }
  0x8f   :  { %v2131_v17 = vpop.eup %2130  ;;  %7159 = vst [vmem:[#allocation70_spill] sm:$0xff] %v3629_v39  ;;  %2154 = vpow2.f32 %v3463_v28  ;;  %v3641_v40 = vadd.f32 %v2127_v4, %v7164_v52  ;;  %v7166_v61 = vld [vmem:[#allocation29_spill] sm:$0xff]  ;;  %v3647_v57 = vadd.f32 %v2129_v15, %v7168_v22  ;;  %v7170_v3 = vld [vmem:[#allocation18_spill] sm:$0xff]  ;;  %v7174_v52 = vld [vmem:[#allocation36_spill] sm:$0xff] }
  0x90   :  { %v2133_v25 = vpop.eup %2132  ;;  %7161 = vst [vmem:[#allocation9_spill] sm:$0xff] %v3633_v2  ;;  %7163 = vst [vmem:[#allocation14_spill] sm:$0xff] %v3637_v19  ;;  %v528_v29 = vmul.f32 %v2129_v15, %v7166_v61  ;;  %v529_v20 = vmul.f32 %v2131_v17, %v7167_v30  ;;  %2156 = vpow2.f32 %v3474_v24  ;;  %v3651_v14 = vadd.f32 %v525_v10, %v7170_v3  ;;  %v7172_v28 = vld [vmem:[#allocation57_spill] sm:$0xff]  ;;  %v7175_v30 = vld [vmem:[#allocation19_spill] sm:$0xff] }
  0x91   :  { %v2135_v35 = vpop.eup %2134  ;;  %7165 = vst [vmem:[#allocation10_spill] sm:$0xff] %v3641_v40  ;;  %7169 = vst [vmem:[#allocation11_spill] sm:$0xff] %v3647_v57  ;;  %v530_v48 = vmul.f32 %v2133_v25, %v6999_v43  ;;  %2158 = vpow2.f32 %v3479_v63  ;;  %v3655_v4 = vadd.f32 %v2131_v17, %v7172_v28  ;;  %v3659_v40 = vadd.f32 %v526_v5, %v7175_v30  ;;  %v7177_v15 = vld [vmem:[#allocation61_spill] sm:$0xff]  ;;  %v7179_v10 = vld [vmem:[#allocation62_spill] sm:$0xff] }
  0x92   :  { %v2137_v39 = vpop.eup %2136  ;;  %7171 = vst [vmem:[#allocation20_spill] sm:$0xff] %v3651_v14  ;;  %v531_v61 = vmul.f32 %v2135_v35, %v7174_v52  ;;  %2160 = vpow2.f32 %v3492_v51  ;;  %v3663_v22 = vadd.f32 %v2133_v25, %v7177_v15  ;;  %v3667_v3 = vadd.f32 %v527_v7, %v7179_v10  ;;  %v7181_v57 = vld [vmem:[#allocation24_spill] sm:$0xff]  ;;  %v7183_v28 = vld [vmem:[#allocation38_spill] sm:$0xff]  ;;  %v7188_v25 = vld [vmem:[#allocation25_spill] sm:$0xff] }
  0x93   :  { %v2139_v49 = vpop.eup %2138  ;;  %7173 = vst [vmem:[#allocation71_spill] sm:$0xff] %v3655_v4  ;;  %7176 = vst [vmem:[#allocation13_spill] sm:$0xff] %v3659_v40  ;;  %v532_v43 = vmul.f32 %v2137_v39, %v7003_v56  ;;  %v3670_v17 = vadd.f32 %v2135_v35, %v7181_v57  ;;  %v7184_v4 = vld [vmem:[#allocation63_spill] sm:$0xff]  ;;  %v7186_v30 = vld [vmem:[#allocation26_spill] sm:$0xff]  ;;  %2162 = vpow2.f32 %v3497_v36  ;;  %v3681_v56 = vadd.f32 %v2137_v39, %v7188_v25 }
  0x94   :  { %v2141_v24 = vpop.eup %2140  ;;  %7178 = vst [vmem:[#allocation15_spill] sm:$0xff] %v3663_v22  ;;  %7180 = vst [vmem:[#allocation21_spill] sm:$0xff] %v3667_v3  ;;  %v533_v52 = vmul.f32 %v2139_v49, %v7183_v28  ;;  %v3674_v5 = vadd.f32 %v528_v29, %v7184_v4  ;;  %v3677_v40 = vadd.f32 %v529_v20, %v7186_v30  ;;  %v7190_v7 = vld [vmem:[#allocation39_spill] sm:$0xff]  ;;  %2164 = vpow2.f32 %v3510_v12  ;;  %v7195_v4 = vld [vmem:[#allocation44_spill] sm:$0xff] }
  0x95   :  { %v2143_v63 = vpop.eup %2142  ;;  %7182 = vst [vmem:[#allocation23_spill] sm:$0xff] %v3670_v17  ;;  %7189 = vst [vmem:[#allocation22_spill] sm:$0xff] %v3681_v56  ;;  %v534_v15 = vmul.f32 %v2141_v24, %v7190_v7  ;;  %v7191_v10 = vld [vmem:[#allocation27_spill] sm:$0xff]  ;;  %v7196_v28 = vld [vmem:[#allocation32_spill] sm:$0xff] }
  0x96   :  { %7185 = vst [vmem:[#allocation31_spill] sm:$0xff] %v3674_v5  ;;  %7187 = vst [vmem:[#allocation28_spill] sm:$0xff] %v3677_v40  ;;  %v2145_v51 = vpop.eup %2144  ;;  %v3685_v3 = vadd.f32 %v530_v48, %v7191_v10  ;;  %v7193_v57 = vld [vmem:[#allocation107_spill] sm:$0xff]  ;;  %v535_v20 = vmul.f32 %v2143_v63, %v7195_v4  ;;  %v3693_v30 = vadd.f32 %v531_v61, %v7196_v28  ;;  %v7198_v25 = vld [vmem:[#allocation108_spill] sm:$0xff] }
  0x97   :  { %v2147_v35 = vpop.eup %2146  ;;  %v3689_v29 = vadd.f32 %v2139_v49, %v7193_v57  ;;  %v3695_v36 = vld [vmem:[#allocation2 + $0x7a] sm:$0x3f]  ;;  %v3698_v40 = vadd.f32 %v2141_v24, %v7198_v25  ;;  %v7200_v7 = vld [vmem:[#allocation109_spill] sm:$0xff]  ;;  %v536_v10 = vmul.f32 %v2145_v51, %v7012_v46  ;;  %v7204_v57 = vld [vmem:[#allocation110_spill] sm:$0xff] }
  0x98   :  { %7192 = vst [vmem:[#allocation104_spill] sm:$0xff] %v3685_v3  ;;  %7197 = vst [vmem:[#allocation16_spill] sm:$0xff] %v3693_v30  ;;  %v2149_v39 = vpop.eup %2148  ;;  %v3701_v48 = vadd.f32 %v2143_v63, %v7200_v7  ;;  %v7202_v12 = vld [vmem:[#allocation33_spill] sm:$0xff]  ;;  %v3708_v4 = vadd.f32 %v2145_v51, %v7204_v57  ;;  %v7206_v61 = vld [vmem:[#allocation46_spill] sm:$0xff] }
  0x99   :  { %7194 = vst [vmem:[#allocation37_spill] sm:$0xff] %v3689_v29  ;;  %7199 = vst [vmem:[#allocation45_spill] sm:$0xff] %v3698_v40  ;;  %v3705_v3 = vadd.f32 %v532_v43, %v7202_v12  ;;  %v2151_v49 = vpop.eup %2150  ;;  %v537_v28 = vmul.f32 %v2147_v35, %v7206_v61  ;;  %v7207_v30 = vld [vmem:[#allocation51_spill] sm:$0xff]  ;;  %v7208_v56 = vld [vmem:[#allocation34_spill] sm:$0xff] }
  0x9a   :  { %7201 = vst [vmem:[#allocation17_spill] sm:$0xff] %v3701_v48  ;;  %7205 = vst [vmem:[#allocation29_spill] sm:$0xff] %v3708_v4  ;;  %v538_v29 = vmul.f32 %v2149_v39, %v7207_v30  ;;  %v3713_v17 = vadd.f32 %v533_v52, %v7208_v56  ;;  %v3715_v24 = vld [vmem:[#allocation2 + $0x8a] sm:$0x3f]  ;;  %v2153_v63 = vpop.eup %2152  ;;  %v7210_v25 = vld [vmem:[#allocation111_spill] sm:$0xff] }
  0x9b   :  { %7203 = vst [vmem:[#allocation105_spill] sm:$0xff] %v3705_v3  ;;  %v3718_v7 = vadd.f32 %v2147_v35, %v7210_v25  ;;  %v7212_v46 = vld [vmem:[#allocation52_spill] sm:$0xff]  ;;  %v7213_v12 = vld [vmem:[#allocation35_spill] sm:$0xff]  ;;  %v2155_v61 = vpop.eup %2154  ;;  %v7218_v52 = vld [vmem:[#allocation53_spill] sm:$0xff] }
  0x9c   :  { %7209 = vst [vmem:[#allocation30_spill] sm:$0xff] %v3713_v17  ;;  %v539_v43 = vmul.f32 %v2151_v49, %v7212_v46  ;;  %v3722_v48 = vadd.f32 %v534_v15, %v7213_v12  ;;  %v7215_v51 = vld [vmem:[#allocation92_spill] sm:$0xff]  ;;  %v540_v56 = vmul.f32 %v2153_v63, %v7218_v52  ;;  %v3733_v40 = vld [vmem:[#allocation2 + $0x9a] sm:$0x3f]  ;;  %v7221_v35 = vld [vmem:[#allocation93_spill] sm:$0xff]  ;;  %v3738_v15 = vadd.f32 %v2151_v49, %v3417_v62 }
  0x9d   :  { %7211 = vst [vmem:[#allocation106_spill] sm:$0xff] %v3718_v7  ;;  %v7216_v4 = vld [vmem:[#allocation112_spill] sm:$0xff]  ;;  %v2157_v7 = vpop.eup %2156  ;;  %v7231_v46 = vld [vmem:[#allocation43_spill] sm:$0xff]  ;;  %v3755_v62 = vld [vmem:[#allocation2 + $0xaa] sm:$0x3f] }
  0x9e   :  { %7214 = vst [vmem:[#allocation18_spill] sm:$0xff] %v3722_v48  ;;  %v3727_v30 = vadd.f32 %v2149_v39, %v7216_v4  ;;  %v7219_v17 = vld [vmem:[#allocation40_spill] sm:$0xff]  ;;  %7223 = vst [vmem:[#allocation19_spill] sm:$0xff] %v3738_v15  ;;  %v7225_v48 = vld [vmem:[#allocation41_spill] sm:$0xff]  ;;  %v2159_v52 = vpop.eup %2158  ;;  %v542_v4 = vmul.f32 %v2157_v7, %v7031_v45 }
  0x9f   :  { %v3731_v3 = vadd.f32 %v535_v20, %v7219_v17  ;;  %v7222_v25 = vld [vmem:[#allocation72_spill] sm:$0xff]  ;;  %v3742_v5 = vadd.f32 %v536_v10, %v7225_v48  ;;  %v7227_v39 = vld [vmem:[#allocation94_spill] sm:$0xff]  ;;  %v3747_v17 = vadd.f32 %v2153_v63, %v3433_v16  ;;  %7233 = vst [vmem:[#allocation63_spill] sm:$0xff] %v3755_v62  ;;  %v7234_v49 = vld [vmem:[#allocation95_spill] sm:$0xff]  ;;  %v2161_v48 = vpop.eup %2160  ;;  %v3760_v10 = vadd.f32 %v2155_v61, %v3449_v23 }
  0xa0   :  { %7217 = vst [vmem:[#allocation57_spill] sm:$0xff] %v3727_v30  ;;  %v7224_v12 = vld [vmem:[#allocation56_spill] sm:$0xff]  ;;  %v7229_v20 = vld [vmem:[#allocation42_spill] sm:$0xff]  ;;  %v3753_v30 = vadd.f32 %v538_v29, %v7231_v46  ;;  %v3769_v29 = vadd.f32 %v2157_v7, %v3465_v18  ;;  %v3774_v15 = vld [vmem:[#allocation2 + $0xba] sm:$0x3f]  ;;  %v2163_v45 = vpop.eup %2162 }
  0xa1   :  { %7220 = vst [vmem:[#allocation36_spill] sm:$0xff] %v3731_v3  ;;  %v541_v57 = vmul.f32 %v2155_v61, %v7224_v12  ;;  %7226 = vst [vmem:[#allocation61_spill] sm:$0xff] %v3742_v5  ;;  %v3750_v3 = vadd.f32 %v537_v28, %v7229_v20  ;;  %v7235_v12 = vld [vmem:[#allocation73_spill] sm:$0xff]  ;;  %v7237_v5 = vld [vmem:[#allocation47_spill] sm:$0xff] }
  0xa2   :  { %7228 = vst [vmem:[#allocation62_spill] sm:$0xff] %v3747_v17  ;;  %7232 = vst [vmem:[#allocation38_spill] sm:$0xff] %v3753_v30  ;;  %v3764_v16 = vadd.f32 %v539_v43, %v7237_v5  ;;  %v7239_v63 = vld [vmem:[#allocation96_spill] sm:$0xff]  ;;  %v7241_v30 = vld [vmem:[#allocation58_spill] sm:$0xff]  ;;  %v3779_v5 = vadd.f32 %v2159_v52, %v3483_v0 }
  0xa3   :  { %7230 = vst [vmem:[#allocation24_spill] sm:$0xff] %v3750_v3  ;;  %7236 = vst [vmem:[#allocation26_spill] sm:$0xff] %v3760_v10  ;;  %v2614_v46 = vld [vmem:[#allocation2 + $0xc1] sm:$0xff]  ;;  %v3772_v17 = vadd.f32 %v540_v56, %v7241_v30  ;;  %v7245_v61 = vld [vmem:[#allocation74_spill] sm:$0xff]  ;;  %v2165_v56 = vpop.eup %2164 }
  0xa4   :  { %7238 = vst [vmem:[#allocation25_spill] sm:$0xff] %v3764_v16  ;;  %7240 = vst [vmem:[#allocation39_spill] sm:$0xff] %v3769_v29  ;;  %v543_v20 = vmul.f32 %v2614_v46, %v2159_v52  ;;  %v7244_v23 = vld [vmem:[#allocation97_spill] sm:$0xff]  ;;  %v7247_v43 = vld [vmem:[#allocation48_spill] sm:$0xff] }
  0xa5   :  { %7242 = vst [vmem:[#allocation27_spill] sm:$0xff] %v3772_v17  ;;  %7243 = vst [vmem:[#allocation107_spill] sm:$0xff] %v3774_v15  ;;  %v3782_v16 = vadd.f32 %v541_v57, %v7247_v43  ;;  %v7249_v28 = vld [vmem:[#allocation98_spill] sm:$0xff]  ;;  %v7250_v7 = vld [vmem:[#allocation64_spill] sm:$0xff]  ;;  %v3790_v17 = vadd.f32 %v2161_v48, %v3501_v8 }
  0xa6   :  { %7246 = vst [vmem:[#allocation44_spill] sm:$0xff] %v3779_v5  ;;  %v624_v18 = vsub.f32 %v3755_v62, %v7249_v28  ;;  %v7251_v46 = vld [vmem:[#allocation78_spill] sm:$0xff]  ;;  %v2615_v3 = vld [vmem:[#allocation2 + $0xc9] sm:$0x3f]  ;;  %v7254_v22 = vld [vmem:[#allocation99_spill] sm:$0xff] }
  0xa7   :  { %7248 = vst [vmem:[#allocation32_spill] sm:$0xff] %v3782_v16  ;;  %v7252_v29 = vsub.f32 %v7250_v7, %v7251_v46  ;;  %7253 = vst [vmem:[#allocation108_spill] sm:$0xff] %v3790_v17  ;;  %v544_v10 = vmul.f32 %v2615_v3, %v2161_v48  ;;  %v7255_v14 = vld [vmem:[#allocation75_spill] sm:$0xff]  ;;  %v7258_v28 = vld [vmem:[#allocation49_spill] sm:$0xff] }
  0xa8   :  { %v625_v0 = vsub.f32 %v7255_v14, %v7254_v22  ;;  %v7256_v52 = vld [vmem:[#allocation79_spill] sm:$0xff]  ;;  %v3798_v62 = vadd.f32 %v542_v4, %v7258_v28  ;;  %v3800_v7 = vld [vmem:[#allocation2 + $0xca] sm:$0x3f]  ;;  %v7262_v17 = vld [vmem:[#allocation80_spill] sm:$0xff]  ;;  %v3808_v14 = vadd.f32 %v2163_v45, %v3516_v44 }
  0xa9   :  { %v631_v30 = vmul.f32 1.442695, %v7252_v29  ;;  %v7257_v57 = vsub.f32 %v3481_v59, %v7256_v52  ;;  %v2616_v16 = vld [vmem:[#allocation2 + $0xd1] sm:$0xff]  ;;  %7260 = vst [vmem:[#allocation33_spill] sm:$0xff] %v3800_v7  ;;  %v7261_v29 = vld [vmem:[#allocation100_spill] sm:$0xff]  ;;  %v7263_v3 = vsub.f32 %v7125_v11, %v7262_v17  ;;  %v7267_v4 = vld [vmem:[#allocation81_spill] sm:$0xff] }
  0xaa   :  { %v545_v5 = vmul.f32 %v2616_v16, %v2163_v45  ;;  %7259 = vst [vmem:[#allocation109_spill] sm:$0xff] %v3798_v62  ;;  %v626_v8 = vsub.f32 %v3774_v15, %v7261_v29  ;;  %7264 = vst [vmem:[#allocation110_spill] sm:$0xff] %v3808_v14  ;;  %v2617_v22 = vld [vmem:[#allocation2 + $0xd9] sm:$0x3f]  ;;  %v7268_v16 = vsub.f32 %v3499_v1, %v7267_v4  ;;  %v7271_v15 = vld [vmem:[#allocation101_spill] sm:$0xff] }
  0xab   :  { %v633_v43 = vmul.f32 1.442695, %v7257_v57  ;;  %v635_v48 = vmul.f32 1.442695, %v7263_v3  ;;  %v546_v19 = vmul.f32 %v2617_v22, %v2165_v56  ;;  %v7265_v57 = vld [vmem:[#allocation65_spill] sm:$0xff]  ;;  %v3817_v62 = vadd.f32 %v2165_v56, %v3528_v50  ;;  %v7272_v11 = vld [vmem:[#allocation76_spill] sm:$0xff] }
  0xac   :  { %v3811_v2 = vadd.f32 %v543_v20, %v7265_v57  ;;  %v637_v28 = vmul.f32 1.442695, %v7268_v16  ;;  %v3819_v29 = vld [vmem:[#allocation2 + $0xda] sm:$0x3f]  ;;  %v627_v3 = vsub.f32 %v7272_v11, %v7271_v15  ;;  %2166 = vpow2.f32 %v631_v30  ;;  %v7273_v44 = vld [vmem:[#allocation82_spill] sm:$0xff]  ;;  %v7281_v30 = vld [vmem:[#allocation77_spill] sm:$0xff] }
  0xad   :  { %7269 = vst [vmem:[#allocation51_spill] sm:$0xff] %v3817_v62  ;;  %7270 = vst [vmem:[#allocation34_spill] sm:$0xff] %v3819_v29  ;;  %v7274_v45 = vsub.f32 %v7128_v13, %v7273_v44  ;;  %v7275_v14 = vld [vmem:[#allocation54_spill] sm:$0xff]  ;;  %2168 = vpow2.f32 %v633_v43  ;;  %v7278_v50 = vsub.f32 %v3512_v42, %v3061_v27  ;;  %v3835_v16 = vadd.f32 %v545_v5, %v3553_v34  ;;  %v7280_v11 = vld [vmem:[#allocation103_spill] sm:$0xff] }
  0xae   :  { %7266 = vst [vmem:[#allocation46_spill] sm:$0xff] %v3811_v2  ;;  %v3827_v20 = vadd.f32 %v544_v10, %v7275_v14  ;;  %v7277_v57 = vld [vmem:[#allocation102_spill] sm:$0xff]  ;;  %v629_v15 = vsub.f32 %v7281_v30, %v7280_v11  ;;  %2170 = vpow2.f32 %v635_v48  ;;  %v7282_v13 = vld [vmem:[#allocation67_spill] sm:$0xff]  ;;  %v3843_v14 = vadd.f32 %v546_v19, %v3562_v31  ;;  %v7290_v5 = vld [vmem:[#allocation68_spill] sm:$0xff] }
  0xaf   :  { %v639_v22 = vmul.f32 1.442695, %v7274_v45  ;;  %v628_v2 = vsub.f32 %v3800_v7, %v7277_v57  ;;  %v641_v56 = vmul.f32 1.442695, %v7278_v50  ;;  %7279 = vst [vmem:[#allocation52_spill] sm:$0xff] %v3835_v16  ;;  %v7283_v45 = vld [vmem:[#allocation83_spill] sm:$0xff]  ;;  %2172 = vpow2.f32 %v637_v28 }
  0xb0   :  { %7276 = vst [vmem:[#allocation111_spill] sm:$0xff] %v3827_v20  ;;  %v7284_v62 = vsub.f32 %v7282_v13, %v7283_v45  ;;  %7285 = vst [vmem:[#allocation35_spill] sm:$0xff] %v3843_v14  ;;  %v7286_v57 = vld [vmem:[#allocation8_spill] sm:$0xff]  ;;  %v7287_v20 = vld [vmem:[#allocation50_spill] sm:$0xff]  ;;  %v7293_v13 = vsub.f32 %v3534_v47, %v3073_v6  ;;  %v7297_v28 = vsub.f32 %v3545_v58, %v3079_v55 }
  0xb1   :  { %v630_v43 = vsub.f32 %v3819_v29, %v7286_v57  ;;  %v7288_v50 = vld [vmem:[#allocation84_spill] sm:$0xff]  ;;  %2174 = vpow2.f32 %v639_v22  ;;  %v7291_v16 = vld [vmem:[#allocation85_spill] sm:$0xff]  ;;  %v7295_v31 = vld [vmem:[#allocation87_spill] sm:$0xff] }
  0xb2   :  { %v643_v10 = vmul.f32 1.442695, %v7284_v62  ;;  %v7289_v7 = vsub.f32 %v7287_v20, %v7288_v50  ;;  %v7292_v30 = vsub.f32 %v7290_v5, %v7291_v16  ;;  %v649_v62 = vmul.f32 1.442695, %v7293_v13  ;;  %v7294_v11 = vld [vmem:[#allocation69_spill] sm:$0xff]  ;;  %v3868_v37 = vld [vmem:[#allocation2 + $0x10] sm:$0xff] }
  0xb3   :  { %v7296_v19 = vsub.f32 %v7294_v11, %v7295_v31  ;;  %2176 = vpow2.f32 %v641_v56  ;;  %v653_v57 = vmul.f32 1.442695, %v7297_v28  ;;  %v7300_v5 = vsub.f32 %v3565_v32, %v3084_v53  ;;  %v7301_v13 = vld [vmem:[#allocation91_spill] sm:$0xff]  ;;  %v2618_v52 = vld [vmem:[#allocation2 + $0x2] sm:$0xff] }
  0xb4   :  { %v645_v34 = vmul.f32 1.442695, %v7289_v7  ;;  %v647_v48 = vmul.f32 1.442695, %v7292_v30  ;;  %v7298_v7 = vld [vmem:[#allocation89_spill] sm:$0xff]  ;;  %2178 = vpow2.f32 %v643_v10  ;;  %v7302_v11 = vsub.f32 %v7146_v26, %v7301_v13  ;;  %v3900_v13 = vld [vmem:[#allocation2 + $0x40] sm:$0xff] }
  0xb5   :  { %v651_v14 = vmul.f32 1.442695, %v7296_v19  ;;  %v7299_v22 = vsub.f32 %v7137_v33, %v7298_v7  ;;  %v657_v30 = vmul.f32 1.442695, %v7300_v5  ;;  %v7303_v56 = vsub.f32 %v3695_v36, %v7215_v51  ;;  %v3881_v7 = vld [vmem:[#allocation2 + $0x20] sm:$0xff]  ;;  %7309 = vst [vmem:[#allocation53_spill] sm:$0xff] %v3900_v13 }
  0xb6   :  { %v659_v19 = vmul.f32 1.442695, %v7302_v11  ;;  %v7304_v28 = vsub.f32 %v7222_v25, %v7221_v35  ;;  %v3883_v5 = vld [vmem:[#allocation2 + $0x28] sm:$0x3f]  ;;  %2180 = vpow2.f32 %v645_v34  ;;  %v7306_v10 = vsub.f32 %v3715_v24, %v7227_v39  ;;  %v3898_v35 = vld [vmem:[#allocation2 + $0x38] sm:$0x3f]  ;;  %v2167_v53 = vpop.eup %2166 }
  0xb7   :  { %v655_v29 = vmul.f32 1.442695, %v7299_v22  ;;  %v661_v55 = vmul.f32 1.442695, %v7303_v56  ;;  %v3879_v22 = vld [vmem:[#allocation2 + $0x18] sm:$0x3f]  ;;  %v7307_v11 = vsub.f32 %v7235_v12, %v7234_v49  ;;  %v7308_v56 = vsub.f32 %v3733_v40, %v7239_v63 }
  0xb8   :  { %v663_v33 = vmul.f32 1.442695, %v7304_v28  ;;  %7305 = vst [vmem:[#allocation112_spill] sm:$0xff] %v3883_v5  ;;  %v665_v26 = vmul.f32 1.442695, %v7306_v10  ;;  %v3896_v28 = vld [vmem:[#allocation2 + $0x30] sm:$0xff]  ;;  %2182 = vpow2.f32 %v647_v48  ;;  %v7310_v34 = vsub.f32 %v7245_v61, %v7244_v23 }
  0xb9   :  { %v667_v51 = vmul.f32 1.442695, %v7307_v11  ;;  %v3894_v25 = vmul.f32 1.442695, %v7308_v56  ;;  %v3907_v39 = vmul.f32 1.442695, %v624_v18  ;;  %2184 = vpow2.f32 %v649_v62 }
  0xba   :  { %v3905_v10 = vmul.f32 1.442695, %v7310_v34  ;;  %v3909_v12 = vmul.f32 1.442695, %v625_v0  ;;  %v3911_v11 = vld [vmem:[#allocation2 + $0x48] sm:$0x3f]  ;;  %2186 = vpow2.f32 %v651_v14  ;;  %v2169_v0 = vpop.eup %2168 }
  0xbb   :  { %v3913_v56 = vmul.f32 1.442695, %v626_v8  ;;  %v3915_v63 = vmul.f32 1.442695, %v627_v3  ;;  %v3917_v49 = vmul.f32 1.442695, %v628_v2  ;;  %2188 = vpow2.f32 %v653_v57  ;;  %v2171_v3 = vpop.eup %2170 }
  0xbc   :  { %v3919_v48 = vmul.f32 1.442695, %v629_v15  ;;  %v3921_v61 = vmul.f32 1.442695, %v630_v43  ;;  %v3923_v34 = vld [vmem:[#allocation2 + $0x50] sm:$0xff]  ;;  %2190 = vpow2.f32 %v655_v29  ;;  %v3935_v14 = vld [vmem:[#allocation2 + $0x60] sm:$0xff]  ;;  %v2173_v8 = vpop.eup %2172  ;;  %v715_v2 = vmul.f32 %v2618_v52, %v2167_v53 }
  0xbd   :  { %v3927_v62 = vld [vmem:[#allocation2 + $0x58] sm:$0x3f]  ;;  %7312 = vst [vmem:[#allocation72_spill] sm:$0xff] %v3935_v14  ;;  %2192 = vpow2.f32 %v657_v30  ;;  %v2175_v4 = vpop.eup %2174  ;;  %v7313_v5 = vld [vmem:[#allocation66_spill] sm:$0xff]  ;;  %v716_v57 = vmul.f32 %v2169_v0, %v3481_v59  ;;  %v718_v59 = vmul.f32 %v2173_v8, %v3499_v1 }
  0xbe   :  { %7311 = vst [vmem:[#allocation40_spill] sm:$0xff] %v3927_v62  ;;  %2194 = vpow2.f32 %v659_v19  ;;  %v3948_v43 = vadd.f32 %v2167_v53, %v7313_v5  ;;  %v2177_v45 = vpop.eup %2176  ;;  %v7315_v30 = vld [vmem:[#allocation55_spill] sm:$0xff]  ;;  %v2620_v5 = vld [vmem:[#allocation2 + $0x22] sm:$0xff] }
  0xbf   :  { %2196 = vpow2.f32 %v661_v55  ;;  %v3954_v52 = vadd.f32 %v2169_v0, %v7315_v30  ;;  %v2619_v13 = vld [vmem:[#allocation2 + $0x12] sm:$0xff]  ;;  %v2179_v16 = vpop.eup %2178  ;;  %v3963_v55 = vadd.f32 %v2173_v8, %v3599_v21  ;;  %v720_v0 = vmul.f32 %v2177_v45, %v3512_v42 }
  0xc0   :  { %7314 = vst [vmem:[#allocation56_spill] sm:$0xff] %v3948_v43  ;;  %v717_v15 = vmul.f32 %v2619_v13, %v2171_v3  ;;  %2198 = vpow2.f32 %v663_v33  ;;  %v7316_v19 = vld [vmem:[#allocation59_spill] sm:$0xff]  ;;  %v719_v43 = vmul.f32 %v2620_v5, %v2175_v4  ;;  %v2181_v18 = vpop.eup %2180  ;;  %v7317_v13 = vld [vmem:[#allocation60_spill] sm:$0xff]  ;;  %v3970_v33 = vadd.f32 %v2175_v4, %v3607_v60  ;;  %v7325_v8 = vld [vmem:[#allocation70_spill] sm:$0xff] }
  0xc1   :  { %v3959_v53 = vadd.f32 %v2171_v3, %v7316_v19  ;;  %2200 = vpow2.f32 %v665_v26  ;;  %v3967_v30 = vadd.f32 %v715_v2, %v7317_v13  ;;  %v2621_v3 = vld [vmem:[#allocation2 + $0x32] sm:$0xff]  ;;  %v3973_v1 = vadd.f32 %v716_v57, %v3610_v54  ;;  %v7323_v4 = vld [vmem:[#allocation12_spill] sm:$0xff] }
  0xc2   :  { %v2183_v29 = vpop.eup %2182  ;;  %2202 = vpow2.f32 %v667_v51  ;;  %7318 = vst [vmem:[#allocation41_spill] sm:$0xff] %v3970_v33  ;;  %v721_v19 = vmul.f32 %v2621_v3, %v2179_v16  ;;  %v3977_v21 = vadd.f32 %v2177_v45, %v3617_v41  ;;  %v722_v42 = vmul.f32 %v2181_v18, %v7287_v20  ;;  %v7327_v41 = vld [vmem:[#allocation9_spill] sm:$0xff] }
  0xc3   :  { %7319 = vst [vmem:[#allocation42_spill] sm:$0xff] %v3973_v1  ;;  %v2185_v5 = vpop.eup %2184  ;;  %2204 = vpow2.f32 %v3894_v25  ;;  %v3981_v26 = vadd.f32 %v717_v15, %v3613_v9  ;;  %v3985_v60 = vadd.f32 %v2179_v16, %v3625_v38  ;;  %v3988_v54 = vadd.f32 %v718_v59, %v7323_v4  ;;  %v2622_v9 = vld [vmem:[#allocation2 + $0x42] sm:$0xff]  ;;  %v7329_v15 = vld [vmem:[#allocation14_spill] sm:$0xff] }
  0xc4   :  { %7320 = vst [vmem:[#allocation43_spill] sm:$0xff] %v3977_v21  ;;  %v2187_v51 = vpop.eup %2186  ;;  %2206 = vpow2.f32 %v3905_v10  ;;  %v3991_v2 = vadd.f32 %v719_v43, %v7325_v8  ;;  %v3995_v20 = vadd.f32 %v2181_v18, %v7327_v41  ;;  %v723_v45 = vmul.f32 %v2622_v9, %v2183_v29  ;;  %v7331_v38 = vld [vmem:[#allocation10_spill] sm:$0xff]  ;;  %v7333_v59 = vld [vmem:[#allocation20_spill] sm:$0xff]  ;;  %v7335_v18 = vld [vmem:[#allocation11_spill] sm:$0xff] }
  0xc5   :  { %7321 = vst [vmem:[#allocation73_spill] sm:$0xff] %v3981_v26  ;;  %7322 = vst [vmem:[#allocation47_spill] sm:$0xff] %v3985_v60  ;;  %v2189_v25 = vpop.eup %2188  ;;  %2208 = vpow2.f32 %v3907_v39  ;;  %v3998_v57 = vadd.f32 %v720_v0, %v7329_v15  ;;  %v4002_v16 = vadd.f32 %v2183_v29, %v7331_v38  ;;  %v724_v43 = vmul.f32 %v2185_v5, %v3534_v47  ;;  %v2623_v4 = vld [vmem:[#allocation2 + $0x52] sm:$0xff]  ;;  %v7337_v8 = vld [vmem:[#allocation13_spill] sm:$0xff] }
  0xc6   :  { %7324 = vst [vmem:[#allocation58_spill] sm:$0xff] %v3988_v54  ;;  %7326 = vst [vmem:[#allocation74_spill] sm:$0xff] %v3991_v2  ;;  %v2191_v10 = vpop.eup %2190  ;;  %2210 = vpow2.f32 %v3909_v12  ;;  %v4006_v13 = vadd.f32 %v721_v19, %v7333_v59  ;;  %v4010_v3 = vadd.f32 %v2185_v5, %v7335_v18  ;;  %v725_v0 = vmul.f32 %v2623_v4, %v2187_v51  ;;  %v7339_v29 = vld [vmem:[#allocation71_spill] sm:$0xff]  ;;  %v2624_v19 = vld [vmem:[#allocation2 + $0x62] sm:$0xff] }
  0xc7   :  { %7328 = vst [vmem:[#allocation48_spill] sm:$0xff] %v3995_v20  ;;  %7330 = vst [vmem:[#allocation64_spill] sm:$0xff] %v3998_v57  ;;  %v2193_v39 = vpop.eup %2192  ;;  %2212 = vpow2.f32 %v3913_v56  ;;  %v4013_v41 = vadd.f32 %v722_v42, %v7337_v8  ;;  %v4017_v9 = vadd.f32 %v2187_v51, %v7339_v29  ;;  %v726_v47 = vmul.f32 %v2189_v25, %v3545_v58  ;;  %v7341_v56 = vld [vmem:[#allocation15_spill] sm:$0xff]  ;;  %v7343_v42 = vld [vmem:[#allocation21_spill] sm:$0xff] }
  0xc8   :  { %7332 = vst [vmem:[#allocation75_spill] sm:$0xff] %v4002_v16  ;;  %7334 = vst [vmem:[#allocation49_spill] sm:$0xff] %v4006_v13  ;;  %v2195_v12 = vpop.eup %2194  ;;  %2214 = vpow2.f32 %v3915_v63  ;;  %v727_v15 = vmul.f32 %v2624_v19, %v2191_v10  ;;  %v4022_v5 = vadd.f32 %v2189_v25, %v7341_v56  ;;  %v728_v59 = vmul.f32 %v2193_v39, %v3565_v32  ;;  %v2625_v63 = vld [vmem:[#allocation2 + $0x72] sm:$0xff] }
  0xc9   :  { %7336 = vst [vmem:[#allocation80_spill] sm:$0xff] %v4010_v3  ;;  %7338 = vst [vmem:[#allocation65_spill] sm:$0xff] %v4013_v41  ;;  %v2197_v38 = vpop.eup %2196  ;;  %2216 = vpow2.f32 %v3917_v49  ;;  %v4026_v18 = vadd.f32 %v723_v45, %v7343_v42  ;;  %v729_v51 = vmul.f32 %v2625_v63, %v2195_v12  ;;  %v7345_v8 = vld [vmem:[#allocation31_spill] sm:$0xff]  ;;  %v7349_v32 = vld [vmem:[#allocation22_spill] sm:$0xff]  ;;  %v7462_v33 = vsub.f32 %v3898_v35, %v3061_v27 }
  0xca   :  { %7340 = vst [vmem:[#allocation76_spill] sm:$0xff] %v4017_v9  ;;  %7342 = vst [vmem:[#allocation54_spill] sm:$0xff] %v4022_v5  ;;  %v2199_v4 = vpop.eup %2198  ;;  %2218 = vpow2.f32 %v3919_v48  ;;  %v730_v58 = vmul.f32 %v2197_v38, %v3695_v36  ;;  %v4031_v29 = vadd.f32 %v724_v43, %v7345_v8  ;;  %v7347_v49 = vld [vmem:[#allocation23_spill] sm:$0xff]  ;;  %v4038_v56 = vadd.f32 %v2193_v39, %v7349_v32  ;;  %v7351_v45 = vld [vmem:[#allocation28_spill] sm:$0xff] }
  0xcb   :  { %7344 = vst [vmem:[#allocation77_spill] sm:$0xff] %v4026_v18  ;;  %v2201_v19 = vpop.eup %2200  ;;  %2220 = vpow2.f32 %v3921_v61  ;;  %v4035_v25 = vadd.f32 %v2191_v10, %v7347_v49  ;;  %v4041_v42 = vadd.f32 %v725_v0, %v7351_v45  ;;  %v7353_v18 = vld [vmem:[#allocation37_spill] sm:$0xff]  ;;  %v7355_v43 = vld [vmem:[#allocation104_spill] sm:$0xff]  ;;  %v2627_v45 = vld [vmem:[#allocation2 + $0x92] sm:$0xff] }
  0xcc   :  { %7346 = vst [vmem:[#allocation67_spill] sm:$0xff] %v4031_v29  ;;  %7350 = vst [vmem:[#allocation68_spill] sm:$0xff] %v4038_v56  ;;  %v2203_v48 = vpop.eup %2202  ;;  %v4044_v63 = vadd.f32 %v2195_v12, %v7353_v18  ;;  %v2626_v36 = vld [vmem:[#allocation2 + $0x82] sm:$0xff]  ;;  %v4047_v8 = vadd.f32 %v726_v47, %v7355_v43  ;;  %v732_v0 = vmul.f32 %v2201_v19, %v3715_v24  ;;  %v4075_v24 = vld [vmem:[#allocation2 + $0x78] sm:$0x3f] }
  0xcd   :  { %7348 = vst [vmem:[#allocation50_spill] sm:$0xff] %v4035_v25  ;;  %7352 = vst [vmem:[#allocation69_spill] sm:$0xff] %v4041_v42  ;;  %v731_v5 = vmul.f32 %v2626_v36, %v2199_v4  ;;  %v7357_v29 = vld [vmem:[#allocation16_spill] sm:$0xff]  ;;  %v4052_v10 = vld [vmem:[#allocation2 + $0x68] sm:$0x3f]  ;;  %v2205_v49 = vpop.eup %2204  ;;  %v733_v56 = vmul.f32 %v2627_v45, %v2203_v48 }
  0xce   :  { %7354 = vst [vmem:[#allocation66_spill] sm:$0xff] %v4044_v63  ;;  %7356 = vst [vmem:[#allocation55_spill] sm:$0xff] %v4047_v8  ;;  %v4050_v61 = vadd.f32 %v727_v15, %v7357_v29  ;;  %v7360_v39 = vld [vmem:[#allocation45_spill] sm:$0xff]  ;;  %v4061_v36 = vld [vmem:[#allocation2 + $0x70] sm:$0xff]  ;;  %v2207_v47 = vpop.eup %2206 }
  0xcf   :  { %7359 = vst [vmem:[#allocation60_spill] sm:$0xff] %v4052_v10  ;;  %v4055_v32 = vadd.f32 %v2197_v38, %v7360_v39  ;;  %v7362_v12 = vld [vmem:[#allocation105_spill] sm:$0xff]  ;;  %7364 = vst [vmem:[#allocation9_spill] sm:$0xff] %v4061_v36  ;;  %v7371_v38 = vld [vmem:[#allocation18_spill] sm:$0xff]  ;;  %v2209_v45 = vpop.eup %2208 }
  0xd0   :  { %7358 = vst [vmem:[#allocation59_spill] sm:$0xff] %v4050_v61  ;;  %v4059_v18 = vadd.f32 %v728_v59, %v7362_v12  ;;  %v7365_v43 = vld [vmem:[#allocation17_spill] sm:$0xff]  ;;  %v7369_v61 = vld [vmem:[#allocation30_spill] sm:$0xff]  ;;  %v4073_v39 = vadd.f32 %v730_v58, %v7371_v38  ;;  %7373 = vst [vmem:[#allocation13_spill] sm:$0xff] %v4075_v24 }
  0xd1   :  { %7361 = vst [vmem:[#allocation12_spill] sm:$0xff] %v4055_v32  ;;  %v4064_v63 = vadd.f32 %v2199_v4, %v7365_v43  ;;  %v7367_v15 = vld [vmem:[#allocation29_spill] sm:$0xff]  ;;  %v4070_v8 = vadd.f32 %v729_v51, %v7369_v61  ;;  %v7374_v59 = vld [vmem:[#allocation106_spill] sm:$0xff]  ;;  %v4081_v43 = vld [vmem:[#allocation2 + $0x80] sm:$0xff]  ;;  %v2211_v51 = vpop.eup %2210 }
  0xd2   :  { %7363 = vst [vmem:[#allocation70_spill] sm:$0xff] %v4059_v18  ;;  %v4067_v29 = vadd.f32 %v2201_v19, %v7367_v15  ;;  %7372 = vst [vmem:[#allocation11_spill] sm:$0xff] %v4073_v39  ;;  %v4078_v12 = vadd.f32 %v2203_v48, %v7374_v59  ;;  %v734_v18 = vmul.f32 %v2205_v49, %v3733_v40  ;;  %v2628_v32 = vld [vmem:[#allocation2 + $0xa2] sm:$0xff]  ;;  %v7380_v58 = vld [vmem:[#allocation63_spill] sm:$0xff] }
  0xd3   :  { %7366 = vst [vmem:[#allocation14_spill] sm:$0xff] %v4064_v63  ;;  %7370 = vst [vmem:[#allocation20_spill] sm:$0xff] %v4070_v8  ;;  %v735_v4 = vmul.f32 %v2628_v32, %v2207_v47  ;;  %v7377_v19 = vld [vmem:[#allocation88_spill] sm:$0xff]  ;;  %v7378_v61 = vld [vmem:[#allocation57_spill] sm:$0xff]  ;;  %v736_v38 = vmul.f32 %v2209_v45, %v7380_v58  ;;  %v2213_v32 = vpop.eup %2212 }
  0xd4   :  { %7368 = vst [vmem:[#allocation10_spill] sm:$0xff] %v4067_v29  ;;  %7375 = vst [vmem:[#allocation71_spill] sm:$0xff] %v4078_v12  ;;  %v4086_v8 = vadd.f32 %v2205_v49, %v7378_v61  ;;  %v7381_v39 = vld [vmem:[#allocation36_spill] sm:$0xff]  ;;  %v4092_v48 = vld [vmem:[#allocation2 + $0x88] sm:$0x3f] }
  0xd5   :  { %7376 = vst [vmem:[#allocation15_spill] sm:$0xff] %v4081_v43  ;;  %v4090_v29 = vadd.f32 %v731_v5, %v7381_v39  ;;  %7383 = vst [vmem:[#allocation23_spill] sm:$0xff] %v4092_v48  ;;  %v7384_v59 = vld [vmem:[#allocation89_spill] sm:$0xff]  ;;  %v7385_v12 = vld [vmem:[#allocation19_spill] sm:$0xff]  ;;  %v2215_v39 = vpop.eup %2214 }
  0xd6   :  { %7379 = vst [vmem:[#allocation21_spill] sm:$0xff] %v4086_v8  ;;  %v4097_v63 = vadd.f32 %v2207_v47, %v7385_v12  ;;  %v7387_v42 = vld [vmem:[#allocation61_spill] sm:$0xff]  ;;  %v7389_v25 = vld [vmem:[#allocation24_spill] sm:$0xff]  ;;  %v4105_v61 = vld [vmem:[#allocation2 + $0x90] sm:$0xff] }
  0xd7   :  { %7382 = vst [vmem:[#allocation31_spill] sm:$0xff] %v4090_v29  ;;  %v4100_v15 = vadd.f32 %v732_v0, %v7387_v42  ;;  %v4103_v49 = vadd.f32 %v733_v56, %v7389_v25  ;;  %7391 = vst [vmem:[#allocation104_spill] sm:$0xff] %v4105_v61  ;;  %v7392_v58 = vld [vmem:[#allocation90_spill] sm:$0xff]  ;;  %v7395_v9 = vld [vmem:[#allocation107_spill] sm:$0xff]  ;;  %v2217_v25 = vpop.eup %2216 }
  0xd8   :  { %7386 = vst [vmem:[#allocation22_spill] sm:$0xff] %v4097_v63  ;;  %v7393_v29 = vld [vmem:[#allocation62_spill] sm:$0xff]  ;;  %v738_v47 = vmul.f32 %v2213_v32, %v7395_v9  ;;  %v4113_v12 = vld [vmem:[#allocation2 + $0x98] sm:$0x3f]  ;;  %v7402_v5 = vld [vmem:[#allocation25_spill] sm:$0xff] }
  0xd9   :  { %7388 = vst [vmem:[#allocation28_spill] sm:$0xff] %v4100_v15  ;;  %7390 = vst [vmem:[#allocation37_spill] sm:$0xff] %v4103_v49  ;;  %v4110_v8 = vadd.f32 %v2209_v45, %v7393_v29  ;;  %v2629_v40 = vld [vmem:[#allocation2 + $0xb2] sm:$0xff]  ;;  %v4124_v13 = vadd.f32 %v735_v4, %v7402_v5  ;;  %v4126_v29 = vld [vmem:[#allocation2 + $0xa0] sm:$0xff] }
  0xda   :  { %v737_v41 = vmul.f32 %v2629_v40, %v2211_v51  ;;  %7396 = vst [vmem:[#allocation45_spill] sm:$0xff] %v4113_v12  ;;  %v7397_v42 = vld [vmem:[#allocation91_spill] sm:$0xff]  ;;  %v7398_v56 = vld [vmem:[#allocation26_spill] sm:$0xff]  ;;  %7404 = vst [vmem:[#allocation30_spill] sm:$0xff] %v4126_v29  ;;  %v2219_v40 = vpop.eup %2218 }
  0xdb   :  { %7394 = vst [vmem:[#allocation16_spill] sm:$0xff] %v4110_v8  ;;  %v4118_v49 = vadd.f32 %v2211_v51, %v7398_v56  ;;  %v7400_v15 = vld [vmem:[#allocation38_spill] sm:$0xff]  ;;  %7403 = vst [vmem:[#allocation29_spill] sm:$0xff] %v4124_v13  ;;  %v7405_v45 = vld [vmem:[#allocation92_spill] sm:$0xff] }
  0xdc   :  { %v4121_v63 = vadd.f32 %v734_v18, %v7400_v15  ;;  %v7406_v8 = vld [vmem:[#allocation39_spill] sm:$0xff]  ;;  %v2630_v0 = vld [vmem:[#allocation2 + $0xc2] sm:$0xff]  ;;  %v2221_v15 = vpop.eup %2220  ;;  %v7427_v60 = vld [vmem:[#allocation34_spill] sm:$0xff] }
  0xdd   :  { %7399 = vst [vmem:[#allocation105_spill] sm:$0xff] %v4118_v49  ;;  %v4131_v3 = vadd.f32 %v2213_v32, %v7406_v8  ;;  %v739_v16 = vmul.f32 %v2630_v0, %v2215_v39  ;;  %v7408_v57 = vld [vmem:[#allocation27_spill] sm:$0xff]  ;;  %v4136_v56 = vld [vmem:[#allocation2 + $0xa8] sm:$0x3f]  ;;  %v7412_v5 = vld [vmem:[#allocation44_spill] sm:$0xff]  ;;  %v742_v54 = vmul.f32 %v2221_v15, %v7427_v60 }
  0xde   :  { %7401 = vst [vmem:[#allocation17_spill] sm:$0xff] %v4121_v63  ;;  %v4134_v51 = vadd.f32 %v736_v38, %v7408_v57  ;;  %7410 = vst [vmem:[#allocation57_spill] sm:$0xff] %v4136_v56  ;;  %v7411_v18 = vld [vmem:[#allocation93_spill] sm:$0xff]  ;;  %v4141_v13 = vadd.f32 %v2215_v39, %v7412_v5  ;;  %v2631_v63 = vld [vmem:[#allocation2 + $0xd2] sm:$0xff] }
  0xdf   :  { %7407 = vst [vmem:[#allocation18_spill] sm:$0xff] %v4131_v3  ;;  %v7414_v49 = vld [vmem:[#allocation33_spill] sm:$0xff]  ;;  %v741_v20 = vmul.f32 %v2631_v63, %v2219_v40  ;;  %v4144_v8 = vld [vmem:[#allocation2 + $0xb0] sm:$0xff]  ;;  %v7417_v57 = vld [vmem:[#allocation108_spill] sm:$0xff] }
  0xe0   :  { %7409 = vst [vmem:[#allocation106_spill] sm:$0xff] %v4134_v51  ;;  %7413 = vst [vmem:[#allocation63_spill] sm:$0xff] %v4141_v13  ;;  %v740_v9 = vmul.f32 %v2217_v25, %v7414_v49  ;;  %v7416_v32 = vld [vmem:[#allocation94_spill] sm:$0xff]  ;;  %v4149_v38 = vadd.f32 %v2217_v25, %v7417_v57  ;;  %v7419_v51 = vld [vmem:[#allocation32_spill] sm:$0xff] }
  0xe1   :  { %7415 = vst [vmem:[#allocation36_spill] sm:$0xff] %v4144_v8  ;;  %v817_v0 = vsub.f32 %v4113_v12, %v7416_v32  ;;  %v4152_v3 = vadd.f32 %v737_v41, %v7419_v51  ;;  %v7421_v4 = vld [vmem:[#allocation109_spill] sm:$0xff]  ;;  %v4157_v39 = vld [vmem:[#allocation2 + $0xb8] sm:$0x3f]  ;;  %v7425_v63 = vld [vmem:[#allocation110_spill] sm:$0xff]  ;;  %v7432_v51 = vsub.f32 %v3868_v37, %v7251_v46 }
  0xe2   :  { %7418 = vst [vmem:[#allocation19_spill] sm:$0xff] %v4149_v38  ;;  %v4155_v2 = vadd.f32 %v738_v47, %v7421_v4  ;;  %7423 = vst [vmem:[#allocation62_spill] sm:$0xff] %v4157_v39  ;;  %v7424_v5 = vld [vmem:[#allocation95_spill] sm:$0xff]  ;;  %v4162_v13 = vadd.f32 %v2219_v40, %v7425_v63  ;;  %v4165_v32 = vld [vmem:[#allocation2 + $0xc0] sm:$0xff] }
  0xe3   :  { %7420 = vst [vmem:[#allocation61_spill] sm:$0xff] %v4152_v3  ;;  %v818_v49 = vsub.f32 %v4126_v29, %v7424_v5  ;;  %7428 = vst [vmem:[#allocation26_spill] sm:$0xff] %v4165_v32  ;;  %v4167_v25 = vld [vmem:[#allocation2 + $0xc8] sm:$0x3f]  ;;  %v4169_v57 = vld [vmem:[#allocation2 + $0xd0] sm:$0xff] }
  0xe4   :  { %7422 = vst [vmem:[#allocation24_spill] sm:$0xff] %v4155_v2  ;;  %7426 = vst [vmem:[#allocation107_spill] sm:$0xff] %v4162_v13  ;;  %v7431_v41 = vld [vmem:[#allocation96_spill] sm:$0xff]  ;;  %v828_v4 = vmul.f32 1.442695, %v7432_v51  ;;  %v7433_v2 = vld [vmem:[#allocation51_spill] sm:$0xff]  ;;  %v820_v13 = vsub.f32 %v4144_v8, %v7244_v23 }
  0xe5   :  { %7429 = vst [vmem:[#allocation38_spill] sm:$0xff] %v4167_v25  ;;  %7430 = vst [vmem:[#allocation25_spill] sm:$0xff] %v4169_v57  ;;  %v819_v47 = vsub.f32 %v4136_v56, %v7431_v41  ;;  %v4177_v38 = vadd.f32 %v2221_v15, %v7433_v2  ;;  %v7435_v40 = vld [vmem:[#allocation46_spill] sm:$0xff]  ;;  %v4182_v60 = vld [vmem:[#allocation2 + $0xd8] sm:$0x3f] }
  0xe6   :  { %v4180_v63 = vadd.f32 %v739_v16, %v7435_v40  ;;  %7437 = vst [vmem:[#allocation44_spill] sm:$0xff] %v4182_v60  ;;  %v7438_v3 = vld [vmem:[#allocation79_spill] sm:$0xff]  ;;  %v7442_v12 = vld [vmem:[#allocation52_spill] sm:$0xff]  ;;  %v4197_v15 = vld [vmem:[#allocation2 + $0xe8] sm:$0x3f]  ;;  %2222 = vpow2.f32 %v828_v4 }
  0xe7   :  { %7434 = vst [vmem:[#allocation39_spill] sm:$0xff] %v4177_v38  ;;  %v7439_v5 = vsub.f32 %v3879_v22, %v7438_v3  ;;  %v7440_v41 = vld [vmem:[#allocation111_spill] sm:$0xff]  ;;  %v4193_v51 = vadd.f32 %v741_v20, %v7442_v12  ;;  %v4195_v2 = vld [vmem:[#allocation2 + $0xe0] sm:$0xff]  ;;  %7445 = vst [vmem:[#allocation109_spill] sm:$0xff] %v4197_v15  ;;  %v7447_v38 = vsub.f32 %v3881_v7, %v7262_v17 }
  0xe8   :  { %7436 = vst [vmem:[#allocation27_spill] sm:$0xff] %v4180_v63  ;;  %v4190_v56 = vadd.f32 %v740_v9, %v7440_v41  ;;  %7444 = vst [vmem:[#allocation32_spill] sm:$0xff] %v4195_v2  ;;  %v7446_v16 = vld [vmem:[#allocation98_spill] sm:$0xff]  ;;  %v7448_v23 = vld [vmem:[#allocation99_spill] sm:$0xff] }
  0xe9   :  { %v830_v29 = vmul.f32 1.442695, %v7439_v5  ;;  %7443 = vst [vmem:[#allocation108_spill] sm:$0xff] %v4193_v51  ;;  %v821_v40 = vsub.f32 %v4157_v39, %v7446_v16  ;;  %v832_v63 = vmul.f32 1.442695, %v7447_v38  ;;  %v822_v5 = vsub.f32 %v4165_v32, %v7448_v23  ;;  %v7449_v8 = vld [vmem:[#allocation100_spill] sm:$0xff] }
  0xea   :  { %7441 = vst [vmem:[#allocation33_spill] sm:$0xff] %v4190_v56  ;;  %v823_v9 = vsub.f32 %v4167_v25, %v7449_v8  ;;  %v7450_v41 = vld [vmem:[#allocation101_spill] sm:$0xff]  ;;  %v7451_v12 = vld [vmem:[#allocation112_spill] sm:$0xff]  ;;  %v4213_v26 = vld [vmem:[#allocation2 + $0x11] sm:$0xff]  ;;  %v7459_v8 = vsub.f32 %v3896_v28, %v7273_v44 }
  0xeb   :  { %v824_v20 = vsub.f32 %v4169_v57, %v7450_v41  ;;  %v7452_v51 = vld [vmem:[#allocation81_spill] sm:$0xff]  ;;  %7454 = vst [vmem:[#allocation110_spill] sm:$0xff] %v4213_v26  ;;  %v4215_v16 = vld [vmem:[#allocation2 + $0x19] sm:$0x3f]  ;;  %v7458_v38 = vld [vmem:[#allocation102_spill] sm:$0xff]  ;;  %2224 = vpow2.f32 %v830_v29 }
  0xec   :  { %v7453_v56 = vsub.f32 %v7451_v12, %v7452_v51  ;;  %7455 = vst [vmem:[#allocation34_spill] sm:$0xff] %v4215_v16  ;;  %v7456_v39 = vld [vmem:[#allocation35_spill] sm:$0xff]  ;;  %v825_v23 = vsub.f32 %v4182_v60, %v7458_v38  ;;  %v836_v25 = vmul.f32 1.442695, %v7459_v8  ;;  %v7461_v32 = vld [vmem:[#allocation8_spill] sm:$0xff]  ;;  %2226 = vpow2.f32 %v832_v63 }
  0xed   :  { %v4218_v1 = vadd.f32 %v742_v54, %v7456_v39  ;;  %v7460_v41 = vld [vmem:[#allocation103_spill] sm:$0xff]  ;;  %v838_v54 = vmul.f32 1.442695, %v7462_v33  ;;  %v7463_v39 = vld [vmem:[#allocation53_spill] sm:$0xff]  ;;  %v7469_v63 = vsub.f32 %v3927_v62, %v3073_v6 }
  0xee   :  { %v834_v21 = vmul.f32 1.442695, %v7453_v56  ;;  %v826_v57 = vsub.f32 %v4195_v2, %v7460_v41  ;;  %v827_v56 = vsub.f32 %v4197_v15, %v7461_v32  ;;  %v7466_v32 = vsub.f32 %v3911_v11, %v7288_v50  ;;  %v7467_v41 = vld [vmem:[#allocation85_spill] sm:$0xff]  ;;  %v4309_v62 = vld [vmem:[#allocation2 + $0x71] sm:$0xff] }
  0xef   :  { %7457 = vst [vmem:[#allocation51_spill] sm:$0xff] %v4218_v1  ;;  %v7464_v1 = vld [vmem:[#allocation83_spill] sm:$0xff]  ;;  %v7468_v15 = vsub.f32 %v3923_v34, %v7467_v41  ;;  %v846_v2 = vmul.f32 1.442695, %v7469_v63  ;;  %v4266_v26 = vld [vmem:[#allocation2 + $0x21] sm:$0xff] }
  0xf0   :  { %v7465_v38 = vsub.f32 %v7463_v39, %v7464_v1  ;;  %2228 = vpow2.f32 %v834_v21  ;;  %v842_v29 = vmul.f32 1.442695, %v7466_v32  ;;  %v7471_v21 = vsub.f32 %v4052_v10, %v7377_v19  ;;  %v4270_v10 = vld [vmem:[#allocation2 + $0x31] sm:$0xff] }
  0xf1   :  { %v844_v33 = vmul.f32 1.442695, %v7468_v15  ;;  %2230 = vpow2.f32 %v836_v25  ;;  %v7472_v32 = vsub.f32 %v4061_v36, %v7384_v59  ;;  %v7473_v15 = vsub.f32 %v4075_v24, %v7392_v58 }
  0xf2   :  { %v840_v4 = vmul.f32 1.442695, %v7465_v38  ;;  %v7470_v38 = vsub.f32 %v3935_v14, %v7295_v31  ;;  %v850_v8 = vmul.f32 1.442695, %v7471_v21  ;;  %2232 = vpow2.f32 %v838_v54  ;;  %v4268_v21 = vld [vmem:[#allocation2 + $0x29] sm:$0x3f] }
  0xf3   :  { %v852_v3 = vmul.f32 1.442695, %v7472_v32  ;;  %v854_v16 = vmul.f32 1.442695, %v7473_v15  ;;  %v7474_v25 = vsub.f32 %v4081_v43, %v7397_v42  ;;  %v7476_v54 = vsub.f32 %v4105_v61, %v7411_v18  ;;  %v4277_v43 = vld [vmem:[#allocation2 + $0x39] sm:$0x3f] }
  0xf4   :  { %v848_v60 = vmul.f32 1.442695, %v7470_v38  ;;  %v7475_v38 = vsub.f32 %v4092_v48, %v7405_v45  ;;  %2234 = vpow2.f32 %v840_v4  ;;  %v862_v15 = vmul.f32 1.442695, %v817_v0  ;;  %v4281_v45 = vld [vmem:[#allocation2 + $0x49] sm:$0x3f] }
  0xf5   :  { %v856_v63 = vmul.f32 1.442695, %v7474_v25  ;;  %v860_v32 = vmul.f32 1.442695, %v7476_v54  ;;  %v4275_v24 = vmul.f32 1.442695, %v818_v49  ;;  %2236 = vpow2.f32 %v842_v29  ;;  %v2223_v29 = vpop.eup %2222 }
  0xf6   :  { %v858_v46 = vmul.f32 1.442695, %v7475_v38  ;;  %v4279_v25 = vld [vmem:[#allocation2 + $0x41] sm:$0xff]  ;;  %v4283_v38 = vmul.f32 1.442695, %v819_v47  ;;  %v4289_v4 = vld [vmem:[#allocation2 + $0x51] sm:$0xff]  ;;  %2238 = vpow2.f32 %v844_v33 }
  0xf7   :  { %v4285_v48 = vmul.f32 1.442695, %v820_v13  ;;  %v4287_v36 = vmul.f32 1.442695, %v821_v40  ;;  %v4291_v18 = vld [vmem:[#allocation2 + $0x59] sm:$0x3f]  ;;  %2240 = vpow2.f32 %v846_v2  ;;  %v2225_v2 = vpop.eup %2224 }
  0xf8   :  { %v4293_v0 = vld [vmem:[#allocation2 + $0x61] sm:$0xff]  ;;  %v4295_v49 = vmul.f32 1.442695, %v822_v5  ;;  %v4297_v54 = vmul.f32 1.442695, %v823_v9  ;;  %2242 = vpow2.f32 %v848_v60  ;;  %v912_v60 = vmul.f32 %v2223_v29, %v3868_v37 }
  0xf9   :  { %v4299_v61 = vmul.f32 1.442695, %v824_v20  ;;  %v4301_v47 = vmul.f32 1.442695, %v825_v23  ;;  %v4303_v13 = vmul.f32 1.442695, %v826_v57  ;;  %2244 = vpow2.f32 %v850_v8 }
  0xfa   :  { %v4305_v40 = vmul.f32 1.442695, %v827_v56  ;;  %v4307_v14 = vld [vmem:[#allocation2 + $0x69] sm:$0x3f]  ;;  %v2227_v56 = vpop.eup %2226  ;;  %2246 = vpow2.f32 %v852_v3  ;;  %v4323_v33 = vld [vmem:[#allocation2 + $0x79] sm:$0x3f]  ;;  %v913_v23 = vmul.f32 %v2225_v2, %v3879_v22  ;;  %v4344_v37 = vadd.f32 %v2225_v2, %v3954_v52 }
  0xfb   :  { %v2229_v57 = vpop.eup %2228  ;;  %2248 = vpow2.f32 %v854_v16  ;;  %v4332_v5 = vld [vmem:[#allocation2 + $0x81] sm:$0xff]  ;;  %v914_v8 = vmul.f32 %v2227_v56, %v3881_v7 }
  0xfc   :  { %7477 = vst [vmem:[#allocation46_spill] sm:$0xff] %v4332_v5  ;;  %v2231_v50 = vpop.eup %2230  ;;  %2250 = vpow2.f32 %v856_v63  ;;  %v7478_v9 = vld [vmem:[#allocation56_spill] sm:$0xff]  ;;  %7479 = vst [vmem:[#allocation111_spill] sm:$0xff] %v4344_v37  ;;  %v915_v31 = vmul.f32 %v2229_v57, %v7451_v12  ;;  %v4350_v63 = vadd.f32 %v2227_v56, %v3959_v53  ;;  %v4360_v12 = vadd.f32 %v912_v60, %v3967_v30  ;;  %v7483_v53 = vld [vmem:[#allocation41_spill] sm:$0xff] }
  0xfd   :  { %v4339_v41 = vadd.f32 %v2223_v29, %v7478_v9  ;;  %v2233_v16 = vpop.eup %2232  ;;  %2252 = vpow2.f32 %v858_v46  ;;  %v916_v29 = vmul.f32 %v2231_v50, %v3896_v28  ;;  %v4356_v46 = vadd.f32 %v2229_v57, %v3963_v55  ;;  %v7485_v28 = vld [vmem:[#allocation42_spill] sm:$0xff]  ;;  %v7487_v56 = vld [vmem:[#allocation73_spill] sm:$0xff]  ;;  %v7489_v55 = vld [vmem:[#allocation43_spill] sm:$0xff] }
  0xfe   :  { %v2235_v20 = vpop.eup %2234  ;;  %2254 = vpow2.f32 %v860_v32  ;;  %7480 = vst [vmem:[#allocation52_spill] sm:$0xff] %v4350_v63  ;;  %v917_v52 = vmul.f32 %v2233_v16, %v3898_v35  ;;  %7482 = vst [vmem:[#allocation81_spill] sm:$0xff] %v4360_v12  ;;  %v4364_v32 = vadd.f32 %v2231_v50, %v7483_v53  ;;  %v4367_v2 = vadd.f32 %v913_v23, %v7485_v28  ;;  %v7491_v57 = vld [vmem:[#allocation58_spill] sm:$0xff]  ;;  %v7493_v50 = vld [vmem:[#allocation47_spill] sm:$0xff] }
  0xff   :  { %v2237_v22 = vpop.eup %2236  ;;  %2256 = vpow2.f32 %v862_v15  ;;  %7481 = vst [vmem:[#allocation112_spill] sm:$0xff] %v4356_v46  ;;  %v4370_v7 = vadd.f32 %v914_v8, %v7487_v56  ;;  %v4374_v35 = vadd.f32 %v2233_v16, %v7489_v55  ;;  %v918_v30 = vmul.f32 %v2235_v20, %v7463_v39  ;;  %v7495_v53 = vld [vmem:[#allocation74_spill] sm:$0xff]  ;;  %v7497_v16 = vld [vmem:[#allocation48_spill] sm:$0xff]  ;;  %v7617_v46 = vld [vmem:[#allocation107_spill] sm:$0xff] }
 0x100   :  { %v2239_v9 = vpop.eup %2238  ;;  %2258 = vpow2.f32 %v4275_v24  ;;  %7484 = vst [vmem:[#allocation35_spill] sm:$0xff] %v4364_v32  ;;  %7486 = vst [vmem:[#allocation53_spill] sm:$0xff] %v4367_v2  ;;  %v4378_v60 = vadd.f32 %v915_v31, %v7491_v57  ;;  %v4382_v23 = vadd.f32 %v2235_v20, %v7493_v50  ;;  %v919_v8 = vmul.f32 %v2237_v22, %v3911_v11  ;;  %v7499_v39 = vld [vmem:[#allocation64_spill] sm:$0xff]  ;;  %v7501_v20 = vld [vmem:[#allocation75_spill] sm:$0xff] }
 0x101   :  { %7488 = vst [vmem:[#allocation56_spill] sm:$0xff] %v4370_v7  ;;  %v2241_v15 = vpop.eup %2240  ;;  %2260 = vpow2.f32 %v4283_v38  ;;  %7490 = vst [vmem:[#allocation41_spill] sm:$0xff] %v4374_v35  ;;  %v4386_v28 = vadd.f32 %v916_v29, %v7495_v53  ;;  %v4390_v56 = vadd.f32 %v2237_v22, %v7497_v16  ;;  %v920_v31 = vmul.f32 %v2239_v9, %v3923_v34  ;;  %v7503_v11 = vld [vmem:[#allocation40_spill] sm:$0xff]  ;;  %v7584_v7 = vld [vmem:[#allocation29_spill] sm:$0xff] }
 0x102   :  { %7492 = vst [vmem:[#allocation42_spill] sm:$0xff] %v4378_v60  ;;  %v2243_v24 = vpop.eup %2242  ;;  %2262 = vpow2.f32 %v4285_v48  ;;  %7494 = vst [vmem:[#allocation73_spill] sm:$0xff] %v4382_v23  ;;  %v4394_v55 = vadd.f32 %v917_v52, %v7499_v39  ;;  %v4398_v57 = vadd.f32 %v2239_v9, %v7501_v20  ;;  %v921_v29 = vmul.f32 %v2241_v15, %v7503_v11  ;;  %v7504_v50 = vld [vmem:[#allocation72_spill] sm:$0xff]  ;;  %v7508_v52 = vld [vmem:[#allocation49_spill] sm:$0xff] }
 0x103   :  { %7496 = vst [vmem:[#allocation43_spill] sm:$0xff] %v4386_v28  ;;  %v2245_v38 = vpop.eup %2244  ;;  %2264 = vpow2.f32 %v4287_v36  ;;  %7498 = vst [vmem:[#allocation58_spill] sm:$0xff] %v4390_v56  ;;  %v922_v53 = vmul.f32 %v2243_v24, %v7504_v50  ;;  %v7505_v36 = vld [vmem:[#allocation80_spill] sm:$0xff]  ;;  %v4408_v39 = vadd.f32 %v918_v30, %v7508_v52  ;;  %v7512_v20 = vld [vmem:[#allocation9_spill] sm:$0xff] }
 0x104   :  { %7500 = vst [vmem:[#allocation47_spill] sm:$0xff] %v4394_v55  ;;  %v2247_v48 = vpop.eup %2246  ;;  %2266 = vpow2.f32 %v4295_v49  ;;  %7502 = vst [vmem:[#allocation74_spill] sm:$0xff] %v4398_v57  ;;  %v4404_v22 = vadd.f32 %v2241_v15, %v7505_v36  ;;  %v7507_v34 = vld [vmem:[#allocation60_spill] sm:$0xff]  ;;  %v7513_v50 = vld [vmem:[#allocation65_spill] sm:$0xff] }
 0x105   :  { %v2249_v3 = vpop.eup %2248  ;;  %2268 = vpow2.f32 %v4297_v54  ;;  %v923_v16 = vmul.f32 %v2245_v38, %v7507_v34  ;;  %7509 = vst [vmem:[#allocation64_spill] sm:$0xff] %v4408_v39  ;;  %v7510_v49 = vld [vmem:[#allocation76_spill] sm:$0xff]  ;;  %v924_v11 = vmul.f32 %v2247_v48, %v7512_v20  ;;  %v4416_v57 = vadd.f32 %v919_v8, %v7513_v50  ;;  %v7515_v15 = vld [vmem:[#allocation54_spill] sm:$0xff]  ;;  %v7517_v34 = vld [vmem:[#allocation13_spill] sm:$0xff] }
 0x106   :  { %7506 = vst [vmem:[#allocation48_spill] sm:$0xff] %v4404_v22  ;;  %v2251_v55 = vpop.eup %2250  ;;  %2270 = vpow2.f32 %v4299_v61  ;;  %v4412_v9 = vadd.f32 %v2243_v24, %v7510_v49  ;;  %v4420_v36 = vadd.f32 %v2245_v38, %v7515_v15  ;;  %v925_v30 = vmul.f32 %v2249_v3, %v7517_v34  ;;  %v7518_v52 = vld [vmem:[#allocation77_spill] sm:$0xff]  ;;  %v7520_v39 = vld [vmem:[#allocation50_spill] sm:$0xff]  ;;  %v7522_v49 = vld [vmem:[#allocation15_spill] sm:$0xff] }
 0x107   :  { %7514 = vst [vmem:[#allocation40_spill] sm:$0xff] %v4416_v57  ;;  %v2253_v54 = vpop.eup %2252  ;;  %2272 = vpow2.f32 %v4301_v47  ;;  %v4424_v22 = vadd.f32 %v920_v31, %v7518_v52  ;;  %v4427_v24 = vadd.f32 %v2247_v48, %v7520_v39  ;;  %v926_v20 = vmul.f32 %v2251_v55, %v7522_v49  ;;  %v7525_v50 = vld [vmem:[#allocation69_spill] sm:$0xff]  ;;  %v7527_v38 = vld [vmem:[#allocation68_spill] sm:$0xff]  ;;  %v7529_v31 = vld [vmem:[#allocation23_spill] sm:$0xff] }
 0x108   :  { %7511 = vst [vmem:[#allocation75_spill] sm:$0xff] %v4412_v9  ;;  %7516 = vst [vmem:[#allocation72_spill] sm:$0xff] %v4420_v36  ;;  %v2255_v61 = vpop.eup %2254  ;;  %v7523_v9 = vld [vmem:[#allocation67_spill] sm:$0xff]  ;;  %v4434_v57 = vadd.f32 %v922_v53, %v7525_v50  ;;  %2274 = vpow2.f32 %v4303_v13  ;;  %v4438_v15 = vadd.f32 %v2249_v3, %v7527_v38  ;;  %v927_v34 = vmul.f32 %v2253_v54, %v7529_v31  ;;  %v7532_v39 = vld [vmem:[#allocation66_spill] sm:$0xff] }
 0x109   :  { %7519 = vst [vmem:[#allocation80_spill] sm:$0xff] %v4424_v22  ;;  %7521 = vst [vmem:[#allocation60_spill] sm:$0xff] %v4427_v24  ;;  %v4431_v8 = vadd.f32 %v921_v29, %v7523_v9  ;;  %v2257_v47 = vpop.eup %2256  ;;  %v7530_v52 = vld [vmem:[#allocation55_spill] sm:$0xff]  ;;  %2276 = vpow2.f32 %v4305_v40  ;;  %v4446_v29 = vadd.f32 %v2251_v55, %v7532_v39  ;;  %v7534_v9 = vld [vmem:[#allocation104_spill] sm:$0xff] }
 0x10a   :  { %7526 = vst [vmem:[#allocation76_spill] sm:$0xff] %v4434_v57  ;;  %7528 = vst [vmem:[#allocation9_spill] sm:$0xff] %v4438_v15  ;;  %v4442_v22 = vadd.f32 %v923_v16, %v7530_v52  ;;  %v2259_v48 = vpop.eup %2258  ;;  %v928_v53 = vmul.f32 %v2255_v61, %v7534_v9  ;;  %v7535_v49 = vld [vmem:[#allocation59_spill] sm:$0xff]  ;;  %v4452_v13 = vld [vmem:[#allocation2 + $0x89] sm:$0x3f] }
 0x10b   :  { %7524 = vst [vmem:[#allocation49_spill] sm:$0xff] %v4431_v8  ;;  %7533 = vst [vmem:[#allocation54_spill] sm:$0xff] %v4446_v29  ;;  %v4450_v50 = vadd.f32 %v924_v11, %v7535_v49  ;;  %v2261_v3 = vpop.eup %2260  ;;  %v7538_v38 = vld [vmem:[#allocation12_spill] sm:$0xff]  ;;  %v7540_v31 = vld [vmem:[#allocation14_spill] sm:$0xff] }
 0x10c   :  { %7531 = vst [vmem:[#allocation65_spill] sm:$0xff] %v4442_v22  ;;  %7537 = vst [vmem:[#allocation77_spill] sm:$0xff] %v4452_v13  ;;  %v4455_v57 = vadd.f32 %v2253_v54, %v7538_v38  ;;  %v4458_v16 = vadd.f32 %v2255_v61, %v7540_v31  ;;  %v7542_v52 = vld [vmem:[#allocation45_spill] sm:$0xff]  ;;  %v7543_v40 = vld [vmem:[#allocation70_spill] sm:$0xff]  ;;  %v2263_v39 = vpop.eup %2262 }
 0x10d   :  { %7536 = vst [vmem:[#allocation13_spill] sm:$0xff] %v4450_v50  ;;  %v929_v22 = vmul.f32 %v2257_v47, %v7542_v52  ;;  %v4462_v15 = vadd.f32 %v925_v30, %v7543_v40  ;;  %v4464_v55 = vld [vmem:[#allocation2 + $0x91] sm:$0xff]  ;;  %v7549_v29 = vld [vmem:[#allocation57_spill] sm:$0xff]  ;;  %v7550_v54 = vld [vmem:[#allocation20_spill] sm:$0xff]  ;;  %v2265_v31 = vpop.eup %2264 }
 0x10e   :  { %7539 = vst [vmem:[#allocation50_spill] sm:$0xff] %v4455_v57  ;;  %7541 = vst [vmem:[#allocation15_spill] sm:$0xff] %v4458_v16  ;;  %v7546_v9 = vld [vmem:[#allocation10_spill] sm:$0xff]  ;;  %v931_v24 = vmul.f32 %v2261_v3, %v7549_v29  ;;  %v4472_v38 = vadd.f32 %v926_v20, %v7550_v54  ;;  %v4474_v61 = vld [vmem:[#allocation2 + $0x99] sm:$0x3f]  ;;  %v2267_v29 = vpop.eup %2266 }
 0x10f   :  { %7544 = vst [vmem:[#allocation67_spill] sm:$0xff] %v4462_v15  ;;  %7545 = vst [vmem:[#allocation69_spill] sm:$0xff] %v4464_v55  ;;  %v4467_v11 = vadd.f32 %v2257_v47, %v7546_v9  ;;  %v7548_v49 = vld [vmem:[#allocation30_spill] sm:$0xff]  ;;  %v7552_v52 = vld [vmem:[#allocation71_spill] sm:$0xff] }
 0x110   :  { %v930_v50 = vmul.f32 %v2259_v48, %v7548_v49  ;;  %7551 = vst [vmem:[#allocation23_spill] sm:$0xff] %v4472_v38  ;;  %v4477_v16 = vadd.f32 %v2259_v48, %v7552_v52  ;;  %v7554_v30 = vld [vmem:[#allocation36_spill] sm:$0xff]  ;;  %v7555_v15 = vld [vmem:[#allocation11_spill] sm:$0xff]  ;;  %v7561_v54 = vld [vmem:[#allocation62_spill] sm:$0xff] }
 0x111   :  { %7547 = vst [vmem:[#allocation68_spill] sm:$0xff] %v4467_v11  ;;  %v932_v40 = vmul.f32 %v2263_v39, %v7554_v30  ;;  %v4481_v57 = vadd.f32 %v927_v34, %v7555_v15  ;;  %v4483_v47 = vld [vmem:[#allocation2 + $0xa1] sm:$0xff]  ;;  %v933_v38 = vmul.f32 %v2265_v31, %v7561_v54  ;;  %v7562_v8 = vld [vmem:[#allocation31_spill] sm:$0xff]  ;;  %v4494_v48 = vld [vmem:[#allocation2 + $0xa9] sm:$0x3f]  ;;  %v2269_v34 = vpop.eup %2268 }
 0x112   :  { %7553 = vst [vmem:[#allocation55_spill] sm:$0xff] %v4477_v16  ;;  %7557 = vst [vmem:[#allocation104_spill] sm:$0xff] %v4483_v47  ;;  %v7558_v9 = vld [vmem:[#allocation92_spill] sm:$0xff]  ;;  %v7559_v11 = vld [vmem:[#allocation21_spill] sm:$0xff]  ;;  %v4492_v36 = vadd.f32 %v928_v53, %v7562_v8  ;;  %v2271_v53 = vpop.eup %2270 }
 0x113   :  { %7556 = vst [vmem:[#allocation66_spill] sm:$0xff] %v4481_v57  ;;  %v4488_v20 = vadd.f32 %v2261_v3, %v7559_v11  ;;  %7564 = vst [vmem:[#allocation14_spill] sm:$0xff] %v4494_v48  ;;  %v7565_v52 = vld [vmem:[#allocation93_spill] sm:$0xff]  ;;  %v7566_v30 = vld [vmem:[#allocation22_spill] sm:$0xff] }
 0x114   :  { %7563 = vst [vmem:[#allocation12_spill] sm:$0xff] %v4492_v36  ;;  %v4499_v16 = vadd.f32 %v2263_v39, %v7566_v30  ;;  %v7568_v57 = vld [vmem:[#allocation26_spill] sm:$0xff]  ;;  %v7569_v56 = vld [vmem:[#allocation28_spill] sm:$0xff]  ;;  %v7577_v60 = vld [vmem:[#allocation17_spill] sm:$0xff] }
 0x115   :  { %7560 = vst [vmem:[#allocation59_spill] sm:$0xff] %v4488_v20  ;;  %v934_v49 = vmul.f32 %v2267_v29, %v7568_v57  ;;  %v4503_v28 = vadd.f32 %v929_v22, %v7569_v56  ;;  %v4505_v3 = vld [vmem:[#allocation2 + $0xb1] sm:$0xff]  ;;  %v7573_v54 = vld [vmem:[#allocation16_spill] sm:$0xff]  ;;  %v7575_v20 = vld [vmem:[#allocation37_spill] sm:$0xff]  ;;  %v4516_v39 = vadd.f32 %v931_v24, %v7577_v60  ;;  %v2273_v22 = vpop.eup %2272 }
 0x116   :  { %7567 = vst [vmem:[#allocation45_spill] sm:$0xff] %v4499_v16  ;;  %7571 = vst [vmem:[#allocation10_spill] sm:$0xff] %v4505_v3  ;;  %v7572_v11 = vld [vmem:[#allocation94_spill] sm:$0xff]  ;;  %v4510_v36 = vadd.f32 %v2265_v31, %v7573_v54  ;;  %v4513_v15 = vadd.f32 %v930_v50, %v7575_v20  ;;  %v4518_v30 = vld [vmem:[#allocation2 + $0xb9] sm:$0x3f]  ;;  %v4527_v31 = vadd.f32 %v932_v40, %v7584_v7  ;;  %v2275_v7 = vpop.eup %2274 }
 0x117   :  { %7570 = vst [vmem:[#allocation70_spill] sm:$0xff] %v4503_v28  ;;  %7578 = vst [vmem:[#allocation20_spill] sm:$0xff] %v4516_v39  ;;  %v7580_v57 = vld [vmem:[#allocation95_spill] sm:$0xff]  ;;  %v7581_v28 = vld [vmem:[#allocation105_spill] sm:$0xff] }
 0x118   :  { %7574 = vst [vmem:[#allocation30_spill] sm:$0xff] %v4510_v36  ;;  %7576 = vst [vmem:[#allocation57_spill] sm:$0xff] %v4513_v15  ;;  %v4523_v16 = vadd.f32 %v2267_v29, %v7581_v28  ;;  %v7583_v8 = vld [vmem:[#allocation38_spill] sm:$0xff]  ;;  %v4529_v54 = vld [vmem:[#allocation2 + $0xc1] sm:$0xff] }
 0x119   :  { %7579 = vst [vmem:[#allocation71_spill] sm:$0xff] %v4518_v30  ;;  %v935_v23 = vmul.f32 %v2269_v34, %v7583_v8  ;;  %7585 = vst [vmem:[#allocation11_spill] sm:$0xff] %v4527_v31  ;;  %v7587_v50 = vld [vmem:[#allocation96_spill] sm:$0xff]  ;;  %v7588_v24 = vld [vmem:[#allocation18_spill] sm:$0xff] }
 0x11a   :  { %7582 = vst [vmem:[#allocation36_spill] sm:$0xff] %v4523_v16  ;;  %7586 = vst [vmem:[#allocation21_spill] sm:$0xff] %v4529_v54  ;;  %v1015_v60 = vsub.f32 %v4494_v48, %v7587_v50  ;;  %v4534_v20 = vadd.f32 %v2269_v34, %v7588_v24  ;;  %v7590_v39 = vld [vmem:[#allocation25_spill] sm:$0xff]  ;;  %v7591_v56 = vld [vmem:[#allocation106_spill] sm:$0xff] }
 0x11b   :  { %v936_v36 = vmul.f32 %v2271_v53, %v7590_v39  ;;  %v4538_v15 = vadd.f32 %v933_v38, %v7591_v56  ;;  %v4540_v28 = vld [vmem:[#allocation2 + $0xc9] sm:$0x3f]  ;;  %v7595_v40 = vld [vmem:[#allocation63_spill] sm:$0xff]  ;;  %v7599_v50 = vld [vmem:[#allocation98_spill] sm:$0xff]  ;;  %v2277_v56 = vpop.eup %2276 }
 0x11c   :  { %7589 = vst [vmem:[#allocation62_spill] sm:$0xff] %v4534_v20  ;;  %7593 = vst [vmem:[#allocation22_spill] sm:$0xff] %v4540_v28  ;;  %v7594_v29 = vld [vmem:[#allocation97_spill] sm:$0xff]  ;;  %v4545_v31 = vadd.f32 %v2271_v53, %v7595_v40  ;;  %v1017_v34 = vsub.f32 %v4518_v30, %v7599_v50  ;;  %v7600_v24 = vld [vmem:[#allocation110_spill] sm:$0xff] }
 0x11d   :  { %7592 = vst [vmem:[#allocation31_spill] sm:$0xff] %v4538_v15  ;;  %v1016_v8 = vsub.f32 %v4505_v3, %v7594_v29  ;;  %v7597_v16 = vld [vmem:[#allocation61_spill] sm:$0xff]  ;;  %v7601_v39 = vld [vmem:[#allocation78_spill] sm:$0xff]  ;;  %v7603_v15 = vld [vmem:[#allocation19_spill] sm:$0xff] }
 0x11e   :  { %7596 = vst [vmem:[#allocation26_spill] sm:$0xff] %v4545_v31  ;;  %v4548_v35 = vadd.f32 %v934_v49, %v7597_v16  ;;  %v7602_v20 = vsub.f32 %v7600_v24, %v7601_v39  ;;  %v4556_v48 = vadd.f32 %v2273_v22, %v7603_v15  ;;  %v7605_v2 = vld [vmem:[#allocation44_spill] sm:$0xff]  ;;  %v4559_v3 = vld [vmem:[#allocation2 + $0xd1] sm:$0xff] }
 0x11f   :  { %v937_v29 = vmul.f32 %v2273_v22, %v7605_v2  ;;  %7606 = vst [vmem:[#allocation37_spill] sm:$0xff] %v4559_v3  ;;  %v7607_v53 = vld [vmem:[#allocation99_spill] sm:$0xff]  ;;  %v7608_v16 = vld [vmem:[#allocation34_spill] sm:$0xff]  ;;  %v7611_v50 = vld [vmem:[#allocation32_spill] sm:$0xff]  ;;  %v7616_v2 = vsub.f32 %v4266_v26, %v7262_v17 }
 0x120   :  { %7598 = vst [vmem:[#allocation28_spill] sm:$0xff] %v4548_v35  ;;  %v1024_v38 = vmul.f32 1.442695, %v7602_v20  ;;  %7604 = vst [vmem:[#allocation16_spill] sm:$0xff] %v4556_v48  ;;  %v1018_v40 = vsub.f32 %v4529_v54, %v7607_v53  ;;  %v7609_v49 = vld [vmem:[#allocation79_spill] sm:$0xff]  ;;  %v938_v30 = vmul.f32 %v2275_v7, %v7611_v50  ;;  %v7612_v32 = vld [vmem:[#allocation24_spill] sm:$0xff]  ;;  %v4578_v53 = vadd.f32 %v2275_v7, %v7617_v46 }
 0x121   :  { %v7610_v35 = vsub.f32 %v7608_v16, %v7609_v49  ;;  %v4568_v12 = vadd.f32 %v935_v23, %v7612_v32  ;;  %v4570_v20 = vld [vmem:[#allocation2 + $0xd9] sm:$0x3f]  ;;  %v7615_v15 = vld [vmem:[#allocation100_spill] sm:$0xff]  ;;  %v1028_v22 = vmul.f32 1.442695, %v7616_v2  ;;  %v7619_v54 = vld [vmem:[#allocation109_spill] sm:$0xff]  ;;  %v7623_v32 = vsub.f32 %v4268_v21, %v7452_v51 }
 0x122   :  { %7614 = vst [vmem:[#allocation105_spill] sm:$0xff] %v4570_v20  ;;  %v1019_v48 = vsub.f32 %v4540_v28, %v7615_v15  ;;  %7618 = vst [vmem:[#allocation38_spill] sm:$0xff] %v4578_v53  ;;  %v939_v63 = vmul.f32 %v2277_v56, %v7619_v54  ;;  %v4584_v50 = vld [vmem:[#allocation2 + $0xe1] sm:$0xff]  ;;  %v4592_v28 = vld [vmem:[#allocation2 + $0xe9] sm:$0x3f]  ;;  %2278 = vpow2.f32 %v1024_v38  ;;  %v7628_v54 = vsub.f32 %v4270_v10, %v7273_v44 }
 0x123   :  { %v1026_v31 = vmul.f32 1.442695, %v7610_v35  ;;  %7613 = vst [vmem:[#allocation17_spill] sm:$0xff] %v4568_v12  ;;  %v7620_v35 = vld [vmem:[#allocation27_spill] sm:$0xff]  ;;  %7622 = vst [vmem:[#allocation18_spill] sm:$0xff] %v4584_v50  ;;  %v7627_v2 = vld [vmem:[#allocation101_spill] sm:$0xff] }
 0x124   :  { %v4582_v37 = vadd.f32 %v936_v36, %v7620_v35  ;;  %v1030_v23 = vmul.f32 1.442695, %v7623_v32  ;;  %v7624_v12 = vld [vmem:[#allocation39_spill] sm:$0xff]  ;;  %7626 = vst [vmem:[#allocation106_spill] sm:$0xff] %v4592_v28  ;;  %v1020_v46 = vsub.f32 %v4559_v3, %v7627_v2  ;;  %v1032_v36 = vmul.f32 1.442695, %v7628_v54 }
 0x125   :  { %v4590_v15 = vadd.f32 %v2277_v56, %v7624_v12  ;;  %v7629_v7 = vld [vmem:[#allocation33_spill] sm:$0xff]  ;;  %2280 = vpow2.f32 %v1026_v31  ;;  %v7632_v12 = vsub.f32 %v4277_v43, %v3061_v27  ;;  %v7633_v32 = vld [vmem:[#allocation108_spill] sm:$0xff]  ;;  %v7635_v2 = vld [vmem:[#allocation103_spill] sm:$0xff]  ;;  %v7636_v54 = vsub.f32 %v4279_v25, %v7464_v1 }
 0x126   :  { %7621 = vst [vmem:[#allocation29_spill] sm:$0xff] %v4582_v37  ;;  %v4600_v35 = vadd.f32 %v937_v29, %v7629_v7  ;;  %v7631_v37 = vld [vmem:[#allocation102_spill] sm:$0xff]  ;;  %v1022_v38 = vsub.f32 %v4584_v50, %v7635_v2  ;;  %2282 = vpow2.f32 %v1028_v22  ;;  %v7637_v7 = vld [vmem:[#allocation51_spill] sm:$0xff] }
 0x127   :  { %7625 = vst [vmem:[#allocation25_spill] sm:$0xff] %v4590_v15  ;;  %v1021_v53 = vsub.f32 %v4570_v20, %v7631_v37  ;;  %v1034_v56 = vmul.f32 1.442695, %v7632_v12  ;;  %v4608_v15 = vadd.f32 %v938_v30, %v7633_v32  ;;  %v1036_v29 = vmul.f32 1.442695, %v7636_v54  ;;  %v7639_v37 = vld [vmem:[#allocation8_spill] sm:$0xff] }
 0x128   :  { %7630 = vst [vmem:[#allocation63_spill] sm:$0xff] %v4600_v35  ;;  %v4616_v35 = vadd.f32 %v939_v63, %v7637_v7  ;;  %v1023_v31 = vsub.f32 %v4592_v28, %v7639_v37  ;;  %2284 = vpow2.f32 %v1030_v23  ;;  %v7640_v12 = vld [vmem:[#allocation84_spill] sm:$0xff]  ;;  %v7642_v32 = vld [vmem:[#allocation85_spill] sm:$0xff]  ;;  %v7645_v63 = vld [vmem:[#allocation87_spill] sm:$0xff]  ;;  %v7647_v23 = vsub.f32 %v4307_v14, %v7377_v19 }
 0x129   :  { %7634 = vst [vmem:[#allocation61_spill] sm:$0xff] %v4608_v15  ;;  %v7641_v20 = vsub.f32 %v4281_v45, %v7640_v12  ;;  %2286 = vpow2.f32 %v1032_v36  ;;  %v7643_v2 = vsub.f32 %v4289_v4, %v7642_v32  ;;  %v7644_v15 = vsub.f32 %v4291_v18, %v3073_v6  ;;  %v4641_v50 = vld [vmem:[#allocation2 + $0x12] sm:$0xff]  ;;  %v4654_v19 = vld [vmem:[#allocation2 + $0x22] sm:$0xff] }
 0x12a   :  { %7638 = vst [vmem:[#allocation110_spill] sm:$0xff] %v4616_v35  ;;  %v7646_v7 = vsub.f32 %v4293_v0, %v7645_v63  ;;  %2288 = vpow2.f32 %v1034_v56  ;;  %v1046_v37 = vmul.f32 1.442695, %v7647_v23  ;;  %v7651_v56 = vsub.f32 %v4452_v13, %v7558_v9 }
 0x12b   :  { %v1038_v30 = vmul.f32 1.442695, %v7641_v20  ;;  %v1040_v22 = vmul.f32 1.442695, %v7643_v2  ;;  %v1042_v54 = vmul.f32 1.442695, %v7644_v15  ;;  %v7648_v20 = vsub.f32 %v4309_v62, %v7384_v59 }
 0x12c   :  { %v1044_v35 = vmul.f32 1.442695, %v7646_v7  ;;  %v7649_v2 = vsub.f32 %v4323_v33, %v7392_v58  ;;  %2290 = vpow2.f32 %v1036_v29  ;;  %v7650_v15 = vsub.f32 %v4332_v5, %v7397_v42  ;;  %v4664_v58 = vld [vmem:[#allocation2 + $0x32] sm:$0xff]  ;;  %v4674_v5 = vld [vmem:[#allocation2 + $0x4a] sm:$0x3f] }
 0x12d   :  { %v1048_v36 = vmul.f32 1.442695, %v7648_v20  ;;  %v1054_v3 = vmul.f32 1.442695, %v7651_v56  ;;  %v7652_v23 = vsub.f32 %v4464_v55, %v7565_v52  ;;  %v4652_v20 = vld [vmem:[#allocation2 + $0x1a] sm:$0x3f]  ;;  %2292 = vpow2.f32 %v1038_v30 }
 0x12e   :  { %v1050_v28 = vmul.f32 1.442695, %v7649_v2  ;;  %v1052_v7 = vmul.f32 1.442695, %v7650_v15  ;;  %v4656_v2 = vld [vmem:[#allocation2 + $0x2a] sm:$0x3f]  ;;  %v7653_v29 = vsub.f32 %v4474_v61, %v7572_v11  ;;  %v7654_v15 = vsub.f32 %v4483_v47, %v7580_v57 }
 0x12f   :  { %v1056_v59 = vmul.f32 1.442695, %v7652_v23  ;;  %v1062_v56 = vmul.f32 1.442695, %v1015_v60  ;;  %v4666_v52 = vld [vmem:[#allocation2 + $0x3a] sm:$0x3f]  ;;  %2294 = vpow2.f32 %v1040_v22 }
 0x130   :  { %v1058_v42 = vmul.f32 1.442695, %v7653_v29  ;;  %v1060_v9 = vmul.f32 1.442695, %v7654_v15  ;;  %v4668_v23 = vld [vmem:[#allocation2 + $0x42] sm:$0xff]  ;;  %2296 = vpow2.f32 %v1042_v54  ;;  %v2279_v15 = vpop.eup %2278 }
 0x131   :  { %v1064_v55 = vmul.f32 1.442695, %v1016_v8  ;;  %v4670_v13 = vmul.f32 1.442695, %v1017_v34  ;;  %v4672_v30 = vmul.f32 1.442695, %v1018_v40  ;;  %2298 = vpow2.f32 %v1044_v35  ;;  %v2281_v40 = vpop.eup %2280 }
 0x132   :  { %v4676_v29 = vmul.f32 1.442695, %v1019_v48  ;;  %v4678_v57 = vmul.f32 1.442695, %v1020_v46  ;;  %v4680_v60 = vmul.f32 1.442695, %v1021_v53  ;;  %2300 = vpow2.f32 %v1046_v37  ;;  %v2283_v35 = vpop.eup %2282 }
 0x133   :  { %v4682_v11 = vmul.f32 1.442695, %v1022_v38  ;;  %v4684_v47 = vmul.f32 1.442695, %v1023_v31  ;;  %v4686_v8 = vld [vmem:[#allocation2 + $0x52] sm:$0xff]  ;;  %2302 = vpow2.f32 %v1048_v36  ;;  %v4698_v38 = vld [vmem:[#allocation2 + $0x62] sm:$0xff]  ;;  %v2285_v48 = vpop.eup %2284  ;;  %v1108_v53 = vmul.f32 %v2279_v15, %v7600_v24 }
 0x134   :  { %v4690_v22 = vld [vmem:[#allocation2 + $0x5a] sm:$0x3f]  ;;  %7655 = vst [vmem:[#allocation19_spill] sm:$0xff] %v4698_v38  ;;  %2304 = vpow2.f32 %v1050_v28  ;;  %v2287_v34 = vpop.eup %2286  ;;  %v4712_v31 = vadd.f32 %v2279_v15, %v4339_v41  ;;  %v1109_v37 = vmul.f32 %v2281_v40, %v7608_v16  ;;  %v1110_v46 = vmul.f32 %v2283_v35, %v4266_v26  ;;  %v7661_v26 = vld [vmem:[#allocation81_spill] sm:$0xff] }
 0x135   :  { %2306 = vpow2.f32 %v1052_v7  ;;  %v2289_v1 = vpop.eup %2288  ;;  %v7657_v28 = vld [vmem:[#allocation111_spill] sm:$0xff]  ;;  %v7659_v7 = vld [vmem:[#allocation52_spill] sm:$0xff]  ;;  %v1111_v16 = vmul.f32 %v2285_v48, %v4268_v21  ;;  %v1112_v15 = vmul.f32 %v2287_v34, %v4270_v10  ;;  %v7664_v21 = vld [vmem:[#allocation53_spill] sm:$0xff] }
 0x136   :  { %7656 = vst [vmem:[#allocation44_spill] sm:$0xff] %v4712_v31  ;;  %2308 = vpow2.f32 %v1054_v3  ;;  %v4718_v24 = vadd.f32 %v2281_v40, %v7657_v28  ;;  %v2291_v32 = vpop.eup %2290  ;;  %v4724_v41 = vadd.f32 %v2283_v35, %v7659_v7  ;;  %v7660_v3 = vld [vmem:[#allocation112_spill] sm:$0xff]  ;;  %v1113_v40 = vmul.f32 %v2289_v1, %v4277_v43 }
 0x137   :  { %2310 = vpow2.f32 %v1056_v59  ;;  %v2293_v54 = vpop.eup %2292  ;;  %v4729_v31 = vadd.f32 %v2285_v48, %v7660_v3  ;;  %v4733_v28 = vadd.f32 %v1108_v53, %v7661_v26  ;;  %v7662_v59 = vld [vmem:[#allocation35_spill] sm:$0xff]  ;;  %v1114_v35 = vmul.f32 %v2291_v32, %v4279_v25  ;;  %v7668_v3 = vld [vmem:[#allocation56_spill] sm:$0xff] }
 0x138   :  { %7658 = vst [vmem:[#allocation34_spill] sm:$0xff] %v4718_v24  ;;  %2312 = vpow2.f32 %v1058_v42  ;;  %v4736_v24 = vadd.f32 %v2287_v34, %v7662_v59  ;;  %v4740_v7 = vadd.f32 %v1109_v37, %v7664_v21  ;;  %v7666_v42 = vld [vmem:[#allocation41_spill] sm:$0xff]  ;;  %v1115_v43 = vmul.f32 %v2293_v54, %v4281_v45  ;;  %v7672_v59 = vld [vmem:[#allocation42_spill] sm:$0xff]  ;;  %v7674_v37 = vld [vmem:[#allocation43_spill] sm:$0xff] }
 0x139   :  { %v2295_v36 = vpop.eup %2294  ;;  %2314 = vpow2.f32 %v1060_v9  ;;  %v4743_v48 = vadd.f32 %v2289_v1, %v7666_v42  ;;  %v4747_v53 = vadd.f32 %v1110_v46, %v7668_v3  ;;  %v7670_v9 = vld [vmem:[#allocation73_spill] sm:$0xff]  ;;  %v4753_v25 = vadd.f32 %v1111_v16, %v7672_v59  ;;  %v7676_v1 = vld [vmem:[#allocation58_spill] sm:$0xff]  ;;  %v7678_v46 = vld [vmem:[#allocation47_spill] sm:$0xff] }
 0x13a   :  { %7663 = vst [vmem:[#allocation32_spill] sm:$0xff] %v4736_v24  ;;  %7665 = vst [vmem:[#allocation24_spill] sm:$0xff] %v4740_v7  ;;  %v2297_v10 = vpop.eup %2296  ;;  %2316 = vpow2.f32 %v1062_v56  ;;  %v4750_v34 = vadd.f32 %v2291_v32, %v7670_v9  ;;  %v4756_v21 = vadd.f32 %v1112_v15, %v7674_v37  ;;  %v4760_v42 = vadd.f32 %v2293_v54, %v7676_v1  ;;  %v7680_v32 = vld [vmem:[#allocation74_spill] sm:$0xff]  ;;  %v7682_v9 = vld [vmem:[#allocation64_spill] sm:$0xff] }
 0x13b   :  { %7667 = vst [vmem:[#allocation107_spill] sm:$0xff] %v4743_v48  ;;  %7669 = vst [vmem:[#allocation109_spill] sm:$0xff] %v4747_v53  ;;  %v2299_v26 = vpop.eup %2298  ;;  %2318 = vpow2.f32 %v1064_v55  ;;  %v1116_v45 = vmul.f32 %v2295_v36, %v4289_v4  ;;  %v4764_v3 = vadd.f32 %v1113_v40, %v7678_v46  ;;  %v4768_v16 = vadd.f32 %v2295_v36, %v7680_v32  ;;  %v7684_v54 = vld [vmem:[#allocation48_spill] sm:$0xff]  ;;  %v7688_v36 = vld [vmem:[#allocation75_spill] sm:$0xff] }
 0x13c   :  { %7671 = vst [vmem:[#allocation27_spill] sm:$0xff] %v4750_v34  ;;  %7673 = vst [vmem:[#allocation39_spill] sm:$0xff] %v4753_v25  ;;  %v2301_v56 = vpop.eup %2300  ;;  %2320 = vpow2.f32 %v4670_v13  ;;  %v1117_v15 = vmul.f32 %v2297_v10, %v4291_v18  ;;  %v4772_v59 = vadd.f32 %v1114_v35, %v7682_v9  ;;  %v4776_v37 = vadd.f32 %v2297_v10, %v7684_v54  ;;  %v7686_v40 = vld [vmem:[#allocation40_spill] sm:$0xff]  ;;  %v7785_v48 = vld [vmem:[#allocation106_spill] sm:$0xff] }
 0x13d   :  { %7675 = vst [vmem:[#allocation33_spill] sm:$0xff] %v4756_v21  ;;  %7677 = vst [vmem:[#allocation108_spill] sm:$0xff] %v4760_v42  ;;  %v2303_v55 = vpop.eup %2302  ;;  %2322 = vpow2.f32 %v4672_v30  ;;  %v1118_v4 = vmul.f32 %v2299_v26, %v4293_v0  ;;  %v4780_v1 = vadd.f32 %v1115_v43, %v7686_v40  ;;  %v4784_v46 = vadd.f32 %v2299_v26, %v7688_v36  ;;  %v7692_v43 = vld [vmem:[#allocation80_spill] sm:$0xff]  ;;  %v7695_v40 = vld [vmem:[#allocation77_spill] sm:$0xff] }
 0x13e   :  { %7679 = vst [vmem:[#allocation51_spill] sm:$0xff] %v4764_v3  ;;  %7681 = vst [vmem:[#allocation111_spill] sm:$0xff] %v4768_v16  ;;  %v2305_v13 = vpop.eup %2304  ;;  %2324 = vpow2.f32 %v4676_v29  ;;  %v1119_v18 = vmul.f32 %v2301_v56, %v4307_v14  ;;  %v1120_v35 = vmul.f32 %v2303_v55, %v4309_v62  ;;  %v7690_v29 = vld [vmem:[#allocation72_spill] sm:$0xff]  ;;  %v4794_v9 = vadd.f32 %v1116_v45, %v7692_v43  ;;  %v7696_v36 = vld [vmem:[#allocation49_spill] sm:$0xff] }
 0x13f   :  { %7683 = vst [vmem:[#allocation52_spill] sm:$0xff] %v4772_v59  ;;  %7685 = vst [vmem:[#allocation112_spill] sm:$0xff] %v4776_v37  ;;  %v2307_v30 = vpop.eup %2306  ;;  %2326 = vpow2.f32 %v4678_v57  ;;  %v4790_v10 = vadd.f32 %v2301_v56, %v7690_v29  ;;  %v1121_v0 = vmul.f32 %v2305_v13, %v4323_v33  ;;  %v7694_v57 = vld [vmem:[#allocation46_spill] sm:$0xff]  ;;  %v4800_v62 = vadd.f32 %v1117_v15, %v7696_v36  ;;  %v7700_v33 = vld [vmem:[#allocation9_spill] sm:$0xff] }
 0x140   :  { %7687 = vst [vmem:[#allocation81_spill] sm:$0xff] %v4780_v1  ;;  %7689 = vst [vmem:[#allocation35_spill] sm:$0xff] %v4784_v46  ;;  %v2309_v32 = vpop.eup %2308  ;;  %2328 = vpow2.f32 %v4680_v60  ;;  %v1122_v26 = vmul.f32 %v2307_v30, %v7694_v57  ;;  %v7698_v60 = vld [vmem:[#allocation60_spill] sm:$0xff]  ;;  %v4807_v29 = vadd.f32 %v2305_v13, %v7700_v33  ;;  %v7707_v15 = vld [vmem:[#allocation65_spill] sm:$0xff]  ;;  %v7818_v24 = vsub.f32 %v4666_v52, %v3061_v27 }
 0x141   :  { %7691 = vst [vmem:[#allocation53_spill] sm:$0xff] %v4790_v10  ;;  %7693 = vst [vmem:[#allocation41_spill] sm:$0xff] %v4794_v9  ;;  %v2311_v54 = vpop.eup %2310  ;;  %2330 = vpow2.f32 %v4682_v11  ;;  %v1123_v14 = vmul.f32 %v2309_v32, %v7695_v40  ;;  %v4804_v56 = vadd.f32 %v2303_v55, %v7698_v60  ;;  %v7702_v45 = vld [vmem:[#allocation76_spill] sm:$0xff]  ;;  %v7704_v9 = vld [vmem:[#allocation54_spill] sm:$0xff]  ;;  %v4817_v36 = vadd.f32 %v1119_v18, %v7707_v15 }
 0x142   :  { %7697 = vst [vmem:[#allocation56_spill] sm:$0xff] %v4800_v62  ;;  %v2313_v1 = vpop.eup %2312  ;;  %2332 = vpow2.f32 %v4684_v47  ;;  %7701 = vst [vmem:[#allocation42_spill] sm:$0xff] %v4807_v29  ;;  %v4810_v43 = vadd.f32 %v1118_v4, %v7702_v45  ;;  %v4813_v57 = vadd.f32 %v2307_v30, %v7704_v9  ;;  %v7706_v40 = vld [vmem:[#allocation69_spill] sm:$0xff]  ;;  %v7712_v13 = vld [vmem:[#allocation50_spill] sm:$0xff] }
 0x143   :  { %7699 = vst [vmem:[#allocation73_spill] sm:$0xff] %v4804_v56  ;;  %v2315_v11 = vpop.eup %2314  ;;  %v1124_v10 = vmul.f32 %v2311_v54, %v7706_v40  ;;  %7708 = vst [vmem:[#allocation47_spill] sm:$0xff] %v4817_v36  ;;  %v7709_v62 = vld [vmem:[#allocation13_spill] sm:$0xff]  ;;  %v4825_v33 = vadd.f32 %v2309_v32, %v7712_v13  ;;  %v1125_v4 = vmul.f32 %v2313_v1, %v4474_v61  ;;  %v7714_v45 = vld [vmem:[#allocation104_spill] sm:$0xff] }
 0x144   :  { %7703 = vst [vmem:[#allocation43_spill] sm:$0xff] %v4810_v43  ;;  %7705 = vst [vmem:[#allocation58_spill] sm:$0xff] %v4813_v57  ;;  %v4820_v47 = vadd.f32 %v1120_v35, %v7709_v62  ;;  %v4822_v55 = vld [vmem:[#allocation2 + $0x6a] sm:$0x3f]  ;;  %v2317_v60 = vpop.eup %2316  ;;  %v1126_v29 = vmul.f32 %v2315_v11, %v7714_v45  ;;  %v7715_v30 = vld [vmem:[#allocation67_spill] sm:$0xff] }
 0x145   :  { %7711 = vst [vmem:[#allocation64_spill] sm:$0xff] %v4822_v55  ;;  %7713 = vst [vmem:[#allocation48_spill] sm:$0xff] %v4825_v33  ;;  %v4830_v9 = vadd.f32 %v1121_v0, %v7715_v30  ;;  %v4832_v40 = vld [vmem:[#allocation2 + $0x72] sm:$0xff]  ;;  %v2319_v18 = vpop.eup %2318  ;;  %v7720_v35 = vld [vmem:[#allocation68_spill] sm:$0xff] }
 0x146   :  { %7710 = vst [vmem:[#allocation74_spill] sm:$0xff] %v4820_v47  ;;  %7717 = vst [vmem:[#allocation75_spill] sm:$0xff] %v4832_v40  ;;  %v7718_v15 = vld [vmem:[#allocation15_spill] sm:$0xff]  ;;  %v4838_v62 = vadd.f32 %v2313_v1, %v7720_v35  ;;  %v7724_v32 = vld [vmem:[#allocation66_spill] sm:$0xff]  ;;  %v2321_v45 = vpop.eup %2320 }
 0x147   :  { %7716 = vst [vmem:[#allocation40_spill] sm:$0xff] %v4830_v9  ;;  %v4835_v57 = vadd.f32 %v2311_v54, %v7718_v15  ;;  %v7722_v47 = vld [vmem:[#allocation23_spill] sm:$0xff]  ;;  %v4844_v13 = vadd.f32 %v1123_v14, %v7724_v32  ;;  %v7729_v9 = vld [vmem:[#allocation14_spill] sm:$0xff]  ;;  %v4853_v15 = vld [vmem:[#allocation2 + $0x82] sm:$0xff] }
 0x148   :  { %7721 = vst [vmem:[#allocation80_spill] sm:$0xff] %v4838_v62  ;;  %v4841_v36 = vadd.f32 %v1122_v26, %v7722_v47  ;;  %v4846_v61 = vld [vmem:[#allocation2 + $0x7a] sm:$0x3f]  ;;  %v1127_v33 = vmul.f32 %v2317_v60, %v7729_v9  ;;  %v7730_v43 = vld [vmem:[#allocation10_spill] sm:$0xff]  ;;  %7731 = vst [vmem:[#allocation9_spill] sm:$0xff] %v4853_v15  ;;  %v2323_v26 = vpop.eup %2322 }
 0x149   :  { %7719 = vst [vmem:[#allocation72_spill] sm:$0xff] %v4835_v57  ;;  %7725 = vst [vmem:[#allocation77_spill] sm:$0xff] %v4844_v13  ;;  %v7727_v0 = vld [vmem:[#allocation55_spill] sm:$0xff]  ;;  %v1128_v54 = vmul.f32 %v2319_v18, %v7730_v43  ;;  %v7732_v1 = vld [vmem:[#allocation88_spill] sm:$0xff]  ;;  %v2325_v43 = vpop.eup %2324 }
 0x14a   :  { %7723 = vst [vmem:[#allocation46_spill] sm:$0xff] %v4841_v36  ;;  %7726 = vst [vmem:[#allocation49_spill] sm:$0xff] %v4846_v61  ;;  %v4849_v30 = vadd.f32 %v2315_v11, %v7727_v0  ;;  %v7733_v47 = vld [vmem:[#allocation59_spill] sm:$0xff]  ;;  %v7736_v13 = vld [vmem:[#allocation12_spill] sm:$0xff] }
 0x14b   :  { %v4858_v36 = vadd.f32 %v2317_v60, %v7733_v47  ;;  %v7735_v14 = vld [vmem:[#allocation71_spill] sm:$0xff]  ;;  %v4862_v62 = vadd.f32 %v1124_v10, %v7736_v13  ;;  %v4864_v11 = vld [vmem:[#allocation2 + $0x8a] sm:$0x3f]  ;;  %v7742_v56 = vld [vmem:[#allocation70_spill] sm:$0xff]  ;;  %v2327_v13 = vpop.eup %2326 }
 0x14c   :  { %7728 = vst [vmem:[#allocation60_spill] sm:$0xff] %v4849_v30  ;;  %v1129_v32 = vmul.f32 %v2321_v45, %v7735_v14  ;;  %7738 = vst [vmem:[#allocation69_spill] sm:$0xff] %v4864_v11  ;;  %v7739_v0 = vld [vmem:[#allocation89_spill] sm:$0xff]  ;;  %v4872_v35 = vadd.f32 %v1125_v4, %v7742_v56  ;;  %v4877_v47 = vld [vmem:[#allocation2 + $0x92] sm:$0xff] }
 0x14d   :  { %7734 = vst [vmem:[#allocation76_spill] sm:$0xff] %v4858_v36  ;;  %7737 = vst [vmem:[#allocation54_spill] sm:$0xff] %v4862_v62  ;;  %v7740_v30 = vld [vmem:[#allocation45_spill] sm:$0xff]  ;;  %v7747_v14 = vld [vmem:[#allocation90_spill] sm:$0xff] }
 0x14e   :  { %v4869_v57 = vadd.f32 %v2319_v18, %v7740_v30  ;;  %7743 = vst [vmem:[#allocation13_spill] sm:$0xff] %v4872_v35  ;;  %v7744_v46 = vld [vmem:[#allocation57_spill] sm:$0xff]  ;;  %7746 = vst [vmem:[#allocation104_spill] sm:$0xff] %v4877_v47  ;;  %v7748_v62 = vld [vmem:[#allocation30_spill] sm:$0xff] }
 0x14f   :  { %v4875_v60 = vadd.f32 %v1126_v29, %v7744_v46  ;;  %v4882_v36 = vadd.f32 %v2321_v45, %v7748_v62  ;;  %v7750_v9 = vld [vmem:[#allocation21_spill] sm:$0xff]  ;;  %v7751_v37 = vld [vmem:[#allocation22_spill] sm:$0xff]  ;;  %v4886_v30 = vld [vmem:[#allocation2 + $0x9a] sm:$0x3f]  ;;  %v2329_v46 = vpop.eup %2328 }
 0x150   :  { %7741 = vst [vmem:[#allocation65_spill] sm:$0xff] %v4869_v57  ;;  %v1130_v59 = vmul.f32 %v2323_v26, %v7750_v9  ;;  %v1131_v18 = vmul.f32 %v2325_v43, %v7751_v37  ;;  %7752 = vst [vmem:[#allocation15_spill] sm:$0xff] %v4886_v30  ;;  %v7753_v56 = vld [vmem:[#allocation91_spill] sm:$0xff]  ;;  %v7754_v29 = vld [vmem:[#allocation36_spill] sm:$0xff]  ;;  %v2331_v9 = vpop.eup %2330 }
 0x151   :  { %7745 = vst [vmem:[#allocation50_spill] sm:$0xff] %v4875_v60  ;;  %7749 = vst [vmem:[#allocation67_spill] sm:$0xff] %v4882_v36  ;;  %v4891_v60 = vadd.f32 %v2323_v26, %v7754_v29  ;;  %v7756_v35 = vld [vmem:[#allocation20_spill] sm:$0xff]  ;;  %v7758_v10 = vld [vmem:[#allocation11_spill] sm:$0xff] }
 0x152   :  { %v4894_v57 = vadd.f32 %v1127_v33, %v7756_v35  ;;  %v4897_v16 = vadd.f32 %v1128_v54, %v7758_v10  ;;  %v4899_v62 = vld [vmem:[#allocation2 + $0xa2] sm:$0xff]  ;;  %v7762_v36 = vld [vmem:[#allocation62_spill] sm:$0xff]  ;;  %v7765_v21 = vld [vmem:[#allocation31_spill] sm:$0xff]  ;;  %v2333_v35 = vpop.eup %2332 }
 0x153   :  { %7755 = vst [vmem:[#allocation68_spill] sm:$0xff] %v4891_v60  ;;  %7760 = vst [vmem:[#allocation55_spill] sm:$0xff] %v4899_v62  ;;  %v7761_v45 = vld [vmem:[#allocation92_spill] sm:$0xff]  ;;  %v4904_v3 = vadd.f32 %v2325_v43, %v7762_v36  ;;  %v7764_v4 = vld [vmem:[#allocation37_spill] sm:$0xff]  ;;  %v4908_v26 = vadd.f32 %v1129_v32, %v7765_v21  ;;  %v1135_v53 = vmul.f32 %v2333_v35, %v7785_v48 }
 0x154   :  { %7757 = vst [vmem:[#allocation23_spill] sm:$0xff] %v4894_v57  ;;  %7759 = vst [vmem:[#allocation66_spill] sm:$0xff] %v4897_v16  ;;  %v1132_v42 = vmul.f32 %v2327_v13, %v7764_v4  ;;  %v4910_v29 = vld [vmem:[#allocation2 + $0xaa] sm:$0x3f]  ;;  %v7769_v10 = vld [vmem:[#allocation26_spill] sm:$0xff] }
 0x155   :  { %7763 = vst [vmem:[#allocation14_spill] sm:$0xff] %v4904_v3  ;;  %7766 = vst [vmem:[#allocation10_spill] sm:$0xff] %v4908_v26  ;;  %v7768_v33 = vld [vmem:[#allocation93_spill] sm:$0xff]  ;;  %v4915_v16 = vadd.f32 %v2327_v13, %v7769_v10  ;;  %v7772_v57 = vld [vmem:[#allocation18_spill] sm:$0xff] }
 0x156   :  { %7767 = vst [vmem:[#allocation59_spill] sm:$0xff] %v4910_v29  ;;  %v7771_v60 = vld [vmem:[#allocation105_spill] sm:$0xff]  ;;  %v1134_v34 = vmul.f32 %v2331_v9, %v7772_v57  ;;  %v4919_v36 = vld [vmem:[#allocation2 + $0xb2] sm:$0xff]  ;;  %v7775_v21 = vld [vmem:[#allocation16_spill] sm:$0xff] }
 0x157   :  { %7770 = vst [vmem:[#allocation71_spill] sm:$0xff] %v4915_v16  ;;  %v1133_v37 = vmul.f32 %v2329_v46, %v7771_v60  ;;  %7773 = vst [vmem:[#allocation12_spill] sm:$0xff] %v4919_v36  ;;  %v7774_v43 = vld [vmem:[#allocation94_spill] sm:$0xff]  ;;  %v4924_v32 = vadd.f32 %v2329_v46, %v7775_v21  ;;  %v7777_v26 = vld [vmem:[#allocation28_spill] sm:$0xff] }
 0x158   :  { %v1209_v4 = vsub.f32 %v4886_v30, %v7774_v43  ;;  %v4927_v3 = vadd.f32 %v1130_v59, %v7777_v26  ;;  %v7779_v54 = vld [vmem:[#allocation17_spill] sm:$0xff]  ;;  %v4932_v13 = vld [vmem:[#allocation2 + $0xba] sm:$0x3f]  ;;  %v7783_v57 = vld [vmem:[#allocation38_spill] sm:$0xff]  ;;  %v7790_v26 = vsub.f32 %v4641_v50, %v7601_v39 }
 0x159   :  { %7776 = vst [vmem:[#allocation45_spill] sm:$0xff] %v4924_v32  ;;  %v4930_v25 = vadd.f32 %v1131_v18, %v7779_v54  ;;  %7781 = vst [vmem:[#allocation30_spill] sm:$0xff] %v4932_v13  ;;  %v7782_v10 = vld [vmem:[#allocation95_spill] sm:$0xff]  ;;  %v4937_v16 = vadd.f32 %v2331_v9, %v7783_v57  ;;  %v4940_v43 = vld [vmem:[#allocation2 + $0xc2] sm:$0xff] }
 0x15a   :  { %7778 = vst [vmem:[#allocation70_spill] sm:$0xff] %v4927_v3  ;;  %v1210_v60 = vsub.f32 %v4899_v62, %v7782_v10  ;;  %7786 = vst [vmem:[#allocation22_spill] sm:$0xff] %v4940_v43  ;;  %v4942_v46 = vld [vmem:[#allocation2 + $0xca] sm:$0x3f]  ;;  %v4944_v21 = vld [vmem:[#allocation2 + $0xd2] sm:$0xff]  ;;  %v7797_v10 = vsub.f32 %v4652_v20, %v7609_v49 }
 0x15b   :  { %7780 = vst [vmem:[#allocation57_spill] sm:$0xff] %v4930_v25  ;;  %7784 = vst [vmem:[#allocation21_spill] sm:$0xff] %v4937_v16  ;;  %v7789_v59 = vld [vmem:[#allocation96_spill] sm:$0xff]  ;;  %v1220_v54 = vmul.f32 1.442695, %v7790_v26  ;;  %v7791_v25 = vld [vmem:[#allocation25_spill] sm:$0xff] }
 0x15c   :  { %7787 = vst [vmem:[#allocation36_spill] sm:$0xff] %v4942_v46  ;;  %7788 = vst [vmem:[#allocation20_spill] sm:$0xff] %v4944_v21  ;;  %v1211_v18 = vsub.f32 %v4910_v29, %v7789_v59  ;;  %v4952_v32 = vadd.f32 %v2333_v35, %v7791_v25  ;;  %v7793_v9 = vld [vmem:[#allocation29_spill] sm:$0xff]  ;;  %v4957_v48 = vld [vmem:[#allocation2 + $0xda] sm:$0x3f] }
 0x15d   :  { %v4955_v57 = vadd.f32 %v1132_v42, %v7793_v9  ;;  %7795 = vst [vmem:[#allocation37_spill] sm:$0xff] %v4957_v48  ;;  %v7796_v16 = vld [vmem:[#allocation97_spill] sm:$0xff]  ;;  %v1222_v62 = vmul.f32 1.442695, %v7797_v10  ;;  %v7798_v59 = vld [vmem:[#allocation63_spill] sm:$0xff]  ;;  %v7804_v42 = vld [vmem:[#allocation98_spill] sm:$0xff]  ;;  %2334 = vpow2.f32 %v1220_v54 }
 0x15e   :  { %7792 = vst [vmem:[#allocation11_spill] sm:$0xff] %v4952_v32  ;;  %v1212_v3 = vsub.f32 %v4919_v36, %v7796_v16  ;;  %v4965_v29 = vadd.f32 %v1133_v37, %v7798_v59  ;;  %v7800_v30 = vld [vmem:[#allocation61_spill] sm:$0xff]  ;;  %v1213_v9 = vsub.f32 %v4932_v13, %v7804_v42  ;;  %v7805_v32 = vsub.f32 %v4654_v19, %v7262_v17  ;;  %v7806_v16 = vld [vmem:[#allocation99_spill] sm:$0xff]  ;;  %v7807_v36 = vld [vmem:[#allocation100_spill] sm:$0xff] }
 0x15f   :  { %7794 = vst [vmem:[#allocation62_spill] sm:$0xff] %v4955_v57  ;;  %v4968_v26 = vadd.f32 %v1134_v34, %v7800_v30  ;;  %v4970_v25 = vld [vmem:[#allocation2 + $0xe2] sm:$0xff]  ;;  %v4972_v35 = vld [vmem:[#allocation2 + $0xea] sm:$0x3f]  ;;  %v1214_v10 = vsub.f32 %v4940_v43, %v7806_v16  ;;  %v1215_v37 = vsub.f32 %v4942_v46, %v7807_v36  ;;  %v7809_v30 = vsub.f32 %v4656_v2, %v7452_v51  ;;  %v7812_v13 = vld [vmem:[#allocation110_spill] sm:$0xff] }
 0x160   :  { %7799 = vst [vmem:[#allocation31_spill] sm:$0xff] %v4965_v29  ;;  %7802 = vst [vmem:[#allocation105_spill] sm:$0xff] %v4970_v25  ;;  %v1224_v57 = vmul.f32 1.442695, %v7805_v32  ;;  %v7808_v59 = vld [vmem:[#allocation101_spill] sm:$0xff]  ;;  %v4988_v29 = vld [vmem:[#allocation2 + $0x20] sm:$0xff]  ;;  %v4993_v7 = vadd.f32 %v1135_v53, %v7812_v13  ;;  %v7815_v36 = vsub.f32 %v4664_v58, %v7273_v44  ;;  %2336 = vpow2.f32 %v1222_v62 }
 0x161   :  { %7801 = vst [vmem:[#allocation26_spill] sm:$0xff] %v4968_v26  ;;  %7803 = vst [vmem:[#allocation18_spill] sm:$0xff] %v4972_v35  ;;  %v1216_v34 = vsub.f32 %v4944_v21, %v7808_v59  ;;  %v1226_v26 = vmul.f32 1.442695, %v7809_v30  ;;  %v4990_v42 = vld [vmem:[#allocation2 + $0x28] sm:$0x3f] }
 0x162   :  { %7810 = vst [vmem:[#allocation16_spill] sm:$0xff] %v4988_v29  ;;  %7811 = vst [vmem:[#allocation28_spill] sm:$0xff] %v4990_v42  ;;  %v7814_v32 = vld [vmem:[#allocation102_spill] sm:$0xff]  ;;  %v1228_v46 = vmul.f32 1.442695, %v7815_v36  ;;  %v7816_v59 = vld [vmem:[#allocation103_spill] sm:$0xff]  ;;  %2338 = vpow2.f32 %v1224_v57  ;;  %v7824_v57 = vsub.f32 %v4690_v22, %v3073_v6 }
 0x163   :  { %7813 = vst [vmem:[#allocation17_spill] sm:$0xff] %v4993_v7  ;;  %v1217_v16 = vsub.f32 %v4957_v48, %v7814_v32  ;;  %v1218_v21 = vsub.f32 %v4970_v25, %v7816_v59  ;;  %v7817_v43 = vld [vmem:[#allocation8_spill] sm:$0xff]  ;;  %v1230_v53 = vmul.f32 1.442695, %v7818_v24  ;;  %v7819_v13 = vld [vmem:[#allocation83_spill] sm:$0xff]  ;;  %2340 = vpow2.f32 %v1226_v26  ;;  %v7822_v59 = vld [vmem:[#allocation85_spill] sm:$0xff] }
 0x164   :  { %v1219_v30 = vsub.f32 %v4972_v35, %v7817_v43  ;;  %v7820_v7 = vsub.f32 %v4668_v23, %v7819_v13  ;;  %v7821_v43 = vsub.f32 %v4674_v5, %v7640_v12  ;;  %v7823_v35 = vsub.f32 %v4686_v8, %v7822_v59  ;;  %v5041_v39 = vld [vmem:[#allocation2 + $0x30] sm:$0xff]  ;;  %v5045_v29 = vld [vmem:[#allocation2 + $0x40] sm:$0xff] }
 0x165   :  { %v1238_v25 = vmul.f32 1.442695, %v7824_v57  ;;  %2342 = vpow2.f32 %v1228_v46  ;;  %v7826_v26 = vsub.f32 %v4822_v55, %v7732_v1  ;;  %v7829_v46 = vsub.f32 %v4853_v15, %v7753_v56  ;;  %v5052_v15 = vld [vmem:[#allocation2 + $0x48] sm:$0x3f]  ;;  %v5082_v55 = vld [vmem:[#allocation2 + $0x78] sm:$0x3f] }
 0x166   :  { %v1232_v54 = vmul.f32 1.442695, %v7820_v7  ;;  %v1234_v62 = vmul.f32 1.442695, %v7821_v43  ;;  %v1236_v24 = vmul.f32 1.442695, %v7823_v35  ;;  %v7825_v7 = vsub.f32 %v4698_v38, %v7645_v63 }
 0x167   :  { %v1242_v36 = vmul.f32 1.442695, %v7826_v26  ;;  %v7827_v43 = vsub.f32 %v4832_v40, %v7739_v0  ;;  %2344 = vpow2.f32 %v1230_v53  ;;  %v7828_v35 = vsub.f32 %v4846_v61, %v7747_v14  ;;  %v5043_v26 = vld [vmem:[#allocation2 + $0x38] sm:$0x3f]  ;;  %v5084_v38 = vld [vmem:[#allocation2 + $0x80] sm:$0xff] }
 0x168   :  { %v1240_v32 = vmul.f32 1.442695, %v7825_v7  ;;  %v1248_v57 = vmul.f32 1.442695, %v7829_v46  ;;  %v7830_v7 = vsub.f32 %v4864_v11, %v7761_v45  ;;  %2346 = vpow2.f32 %v1232_v54  ;;  %v5054_v46 = vld [vmem:[#allocation2 + $0x50] sm:$0xff]  ;;  %v5064_v54 = vld [vmem:[#allocation2 + $0x60] sm:$0xff] }
 0x169   :  { %v1244_v49 = vmul.f32 1.442695, %v7827_v43  ;;  %v1246_v42 = vmul.f32 1.442695, %v7828_v35  ;;  %v7831_v53 = vsub.f32 %v4877_v47, %v7768_v33  ;;  %v1254_v35 = vmul.f32 1.442695, %v1209_v4 }
 0x16a   :  { %v1250_v48 = vmul.f32 1.442695, %v7830_v7  ;;  %v5050_v61 = vmul.f32 1.442695, %v1210_v60  ;;  %v5056_v45 = vld [vmem:[#allocation2 + $0x58] sm:$0x3f]  ;;  %2348 = vpow2.f32 %v1234_v62  ;;  %v2335_v62 = vpop.eup %2334 }
 0x16b   :  { %v1252_v43 = vmul.f32 1.442695, %v7831_v53  ;;  %v5058_v7 = vmul.f32 1.442695, %v1211_v18  ;;  %v5060_v11 = vmul.f32 1.442695, %v1212_v3  ;;  %2350 = vpow2.f32 %v1236_v24 }
 0x16c   :  { %v5062_v40 = vmul.f32 1.442695, %v1213_v9  ;;  %v5066_v33 = vld [vmem:[#allocation2 + $0x68] sm:$0x3f]  ;;  %v5068_v4 = vld [vmem:[#allocation2 + $0x70] sm:$0xff]  ;;  %2352 = vpow2.f32 %v1238_v25  ;;  %7833 = vst [vmem:[#allocation106_spill] sm:$0xff] %v5084_v38  ;;  %v2337_v25 = vpop.eup %2336 }
 0x16d   :  { %7832 = vst [vmem:[#allocation38_spill] sm:$0xff] %v5068_v4  ;;  %v5070_v60 = vmul.f32 1.442695, %v1214_v10  ;;  %v5072_v53 = vmul.f32 1.442695, %v1215_v37  ;;  %2354 = vpow2.f32 %v1240_v32  ;;  %v5107_v10 = vld [vmem:[#allocation2 + $0x90] sm:$0xff] }
 0x16e   :  { %v5074_v47 = vmul.f32 1.442695, %v1216_v34  ;;  %v5076_v18 = vmul.f32 1.442695, %v1217_v16  ;;  %v5078_v3 = vmul.f32 1.442695, %v1218_v21  ;;  %2356 = vpow2.f32 %v1242_v36 }
 0x16f   :  { %v5080_v9 = vmul.f32 1.442695, %v1219_v30  ;;  %v2339_v30 = vpop.eup %2338  ;;  %2358 = vpow2.f32 %v1244_v49  ;;  %v5098_v24 = vld [vmem:[#allocation2 + $0x88] sm:$0x3f]  ;;  %v1304_v34 = vmul.f32 %v2335_v62, %v4641_v50  ;;  %7834 = vst [vmem:[#allocation25_spill] sm:$0xff] %v5107_v10  ;;  %v7835_v37 = vld [vmem:[#allocation44_spill] sm:$0xff]  ;;  %v1305_v16 = vmul.f32 %v2337_v25, %v4652_v20 }
 0x170   :  { %v2341_v21 = vpop.eup %2340  ;;  %2360 = vpow2.f32 %v1246_v42  ;;  %v5114_v59 = vadd.f32 %v2335_v62, %v7835_v37  ;;  %v1306_v36 = vmul.f32 %v2339_v30, %v4654_v19  ;;  %v7836_v50 = vld [vmem:[#allocation34_spill] sm:$0xff] }
 0x171   :  { %v2343_v12 = vpop.eup %2342  ;;  %2362 = vpow2.f32 %v1248_v57  ;;  %v5119_v63 = vadd.f32 %v2337_v25, %v7836_v50  ;;  %v1307_v4 = vmul.f32 %v2341_v21, %v4656_v2  ;;  %v5125_v57 = vadd.f32 %v2339_v30, %v4724_v41  ;;  %v7840_v41 = vld [vmem:[#allocation32_spill] sm:$0xff]  ;;  %v7844_v50 = vld [vmem:[#allocation109_spill] sm:$0xff] }
 0x172   :  { %v2345_v42 = vpop.eup %2344  ;;  %2364 = vpow2.f32 %v1250_v48  ;;  %v1308_v62 = vmul.f32 %v2343_v12, %v4664_v58  ;;  %v5131_v48 = vadd.f32 %v2341_v21, %v4729_v31  ;;  %v5135_v37 = vadd.f32 %v1304_v34, %v4733_v28  ;;  %v7842_v58 = vld [vmem:[#allocation24_spill] sm:$0xff]  ;;  %v7846_v31 = vld [vmem:[#allocation107_spill] sm:$0xff] }
 0x173   :  { %v2347_v32 = vpop.eup %2346  ;;  %2366 = vpow2.f32 %v1252_v43  ;;  %7837 = vst [vmem:[#allocation29_spill] sm:$0xff] %v5125_v57  ;;  %v1309_v2 = vmul.f32 %v2345_v42, %v4666_v52  ;;  %v5139_v43 = vadd.f32 %v2343_v12, %v7840_v41  ;;  %v5142_v30 = vadd.f32 %v1305_v16, %v7842_v58  ;;  %v7848_v21 = vld [vmem:[#allocation39_spill] sm:$0xff]  ;;  %v7852_v41 = vld [vmem:[#allocation33_spill] sm:$0xff] }
 0x174   :  { %v2349_v20 = vpop.eup %2348  ;;  %2368 = vpow2.f32 %v1254_v35  ;;  %7838 = vst [vmem:[#allocation63_spill] sm:$0xff] %v5131_v48  ;;  %7839 = vst [vmem:[#allocation61_spill] sm:$0xff] %v5135_v37  ;;  %v5145_v19 = vadd.f32 %v1306_v36, %v7844_v50  ;;  %v5149_v52 = vadd.f32 %v2345_v42, %v7846_v31  ;;  %v1310_v28 = vmul.f32 %v2347_v32, %v4668_v23  ;;  %v7850_v12 = vld [vmem:[#allocation27_spill] sm:$0xff]  ;;  %v7854_v42 = vld [vmem:[#allocation108_spill] sm:$0xff] }
 0x175   :  { %v2351_v25 = vpop.eup %2350  ;;  %2370 = vpow2.f32 %v5050_v61  ;;  %7841 = vst [vmem:[#allocation110_spill] sm:$0xff] %v5139_v43  ;;  %7843 = vst [vmem:[#allocation44_spill] sm:$0xff] %v5142_v30  ;;  %v5153_v34 = vadd.f32 %v1307_v4, %v7848_v21  ;;  %v5157_v16 = vadd.f32 %v2347_v32, %v7850_v12  ;;  %v1311_v36 = vmul.f32 %v2349_v20, %v4674_v5  ;;  %v7856_v4 = vld [vmem:[#allocation51_spill] sm:$0xff]  ;;  %v7968_v30 = vld [vmem:[#allocation57_spill] sm:$0xff] }
 0x176   :  { %7845 = vst [vmem:[#allocation34_spill] sm:$0xff] %v5145_v19  ;;  %v2353_v35 = vpop.eup %2352  ;;  %2372 = vpow2.f32 %v5058_v7  ;;  %7847 = vst [vmem:[#allocation32_spill] sm:$0xff] %v5149_v52  ;;  %v5161_v58 = vadd.f32 %v1308_v62, %v7852_v41  ;;  %v5165_v50 = vadd.f32 %v2349_v20, %v7854_v42  ;;  %v1312_v23 = vmul.f32 %v2351_v25, %v4686_v8  ;;  %v7858_v32 = vld [vmem:[#allocation111_spill] sm:$0xff]  ;;  %v7863_v8 = vld [vmem:[#allocation64_spill] sm:$0xff] }
 0x177   :  { %7849 = vst [vmem:[#allocation24_spill] sm:$0xff] %v5153_v34  ;;  %v2355_v61 = vpop.eup %2354  ;;  %2374 = vpow2.f32 %v5060_v11  ;;  %7851 = vst [vmem:[#allocation109_spill] sm:$0xff] %v5157_v16  ;;  %v5169_v31 = vadd.f32 %v1309_v2, %v7856_v4  ;;  %v5173_v21 = vadd.f32 %v2351_v25, %v7858_v32  ;;  %v1313_v5 = vmul.f32 %v2353_v35, %v4690_v22  ;;  %v7860_v62 = vld [vmem:[#allocation19_spill] sm:$0xff]  ;;  %v7864_v2 = vld [vmem:[#allocation52_spill] sm:$0xff] }
 0x178   :  { %7853 = vst [vmem:[#allocation107_spill] sm:$0xff] %v5161_v58  ;;  %v2357_v7 = vpop.eup %2356  ;;  %2376 = vpow2.f32 %v5062_v40  ;;  %7855 = vst [vmem:[#allocation39_spill] sm:$0xff] %v5165_v50  ;;  %v1314_v12 = vmul.f32 %v2355_v61, %v7860_v62  ;;  %v7861_v40 = vld [vmem:[#allocation112_spill] sm:$0xff]  ;;  %v5183_v4 = vadd.f32 %v1310_v28, %v7864_v2  ;;  %v7868_v22 = vld [vmem:[#allocation75_spill] sm:$0xff] }
 0x179   :  { %7857 = vst [vmem:[#allocation27_spill] sm:$0xff] %v5169_v31  ;;  %v2359_v11 = vpop.eup %2358  ;;  %2378 = vpow2.f32 %v5070_v60  ;;  %7859 = vst [vmem:[#allocation33_spill] sm:$0xff] %v5173_v21  ;;  %v5179_v20 = vadd.f32 %v2353_v35, %v7861_v40  ;;  %v1315_v42 = vmul.f32 %v2357_v7, %v7863_v8  ;;  %v7866_v60 = vld [vmem:[#allocation35_spill] sm:$0xff]  ;;  %v7869_v62 = vld [vmem:[#allocation81_spill] sm:$0xff] }
 0x17a   :  { %v2361_v41 = vpop.eup %2360  ;;  %2380 = vpow2.f32 %v5072_v53  ;;  %7865 = vst [vmem:[#allocation51_spill] sm:$0xff] %v5183_v4  ;;  %v5187_v25 = vadd.f32 %v2355_v61, %v7866_v60  ;;  %v1316_v32 = vmul.f32 %v2359_v11, %v7868_v22  ;;  %v5191_v21 = vadd.f32 %v1311_v36, %v7869_v62  ;;  %v7871_v35 = vld [vmem:[#allocation53_spill] sm:$0xff]  ;;  %v7881_v62 = vld [vmem:[#allocation43_spill] sm:$0xff]  ;;  %v7940_v16 = vld [vmem:[#allocation66_spill] sm:$0xff] }
 0x17b   :  { %7862 = vst [vmem:[#allocation108_spill] sm:$0xff] %v5179_v20  ;;  %v2363_v49 = vpop.eup %2362  ;;  %2382 = vpow2.f32 %v5074_v47  ;;  %v5195_v40 = vadd.f32 %v2357_v7, %v7871_v35  ;;  %v7873_v8 = vld [vmem:[#allocation49_spill] sm:$0xff]  ;;  %v7883_v7 = vld [vmem:[#allocation42_spill] sm:$0xff]  ;;  %v7933_v58 = vld [vmem:[#allocation23_spill] sm:$0xff] }
 0x17c   :  { %7867 = vst [vmem:[#allocation111_spill] sm:$0xff] %v5187_v25  ;;  %7870 = vst [vmem:[#allocation19_spill] sm:$0xff] %v5191_v21  ;;  %v2365_v53 = vpop.eup %2364  ;;  %2384 = vpow2.f32 %v5076_v18  ;;  %v1317_v28 = vmul.f32 %v2361_v41, %v7873_v8  ;;  %v7874_v2 = vld [vmem:[#allocation41_spill] sm:$0xff]  ;;  %v7879_v25 = vld [vmem:[#allocation56_spill] sm:$0xff]  ;;  %v5209_v21 = vadd.f32 %v1314_v12, %v7881_v62  ;;  %v5213_v35 = vadd.f32 %v2361_v41, %v7883_v7 }
 0x17d   :  { %7872 = vst [vmem:[#allocation112_spill] sm:$0xff] %v5195_v40  ;;  %v5199_v20 = vadd.f32 %v1312_v23, %v7874_v2  ;;  %v2367_v47 = vpop.eup %2366  ;;  %v7876_v4 = vld [vmem:[#allocation73_spill] sm:$0xff]  ;;  %v5206_v36 = vadd.f32 %v1313_v5, %v7879_v25  ;;  %2386 = vpow2.f32 %v5078_v3  ;;  %v7886_v2 = vld [vmem:[#allocation47_spill] sm:$0xff]  ;;  %v7890_v25 = vld [vmem:[#allocation104_spill] sm:$0xff] }
 0x17e   :  { %v5202_v61 = vadd.f32 %v2359_v11, %v7876_v4  ;;  %v7878_v60 = vld [vmem:[#allocation9_spill] sm:$0xff]  ;;  %7882 = vst [vmem:[#allocation75_spill] sm:$0xff] %v5209_v21  ;;  %v2369_v18 = vpop.eup %2368  ;;  %7884 = vst [vmem:[#allocation81_spill] sm:$0xff] %v5213_v35  ;;  %2388 = vpow2.f32 %v5080_v9  ;;  %v7888_v4 = vld [vmem:[#allocation58_spill] sm:$0xff]  ;;  %v1320_v12 = vmul.f32 %v2367_v47, %v7890_v25 }
 0x17f   :  { %7875 = vst [vmem:[#allocation64_spill] sm:$0xff] %v5199_v20  ;;  %v1318_v22 = vmul.f32 %v2363_v49, %v7878_v60  ;;  %7880 = vst [vmem:[#allocation35_spill] sm:$0xff] %v5206_v36  ;;  %v7885_v23 = vld [vmem:[#allocation69_spill] sm:$0xff]  ;;  %v5217_v20 = vadd.f32 %v1315_v42, %v7886_v2  ;;  %v2371_v11 = vpop.eup %2370  ;;  %v5221_v5 = vadd.f32 %v2363_v49, %v7888_v4  ;;  %v7891_v60 = vld [vmem:[#allocation74_spill] sm:$0xff] }
 0x180   :  { %7877 = vst [vmem:[#allocation52_spill] sm:$0xff] %v5202_v61  ;;  %v1319_v8 = vmul.f32 %v2365_v53, %v7885_v23  ;;  %v5225_v62 = vadd.f32 %v1316_v32, %v7891_v60  ;;  %v5227_v3 = vld [vmem:[#allocation2 + $0x98] sm:$0x3f]  ;;  %v2373_v41 = vpop.eup %2372  ;;  %v7894_v7 = vld [vmem:[#allocation48_spill] sm:$0xff]  ;;  %v7918_v36 = vld [vmem:[#allocation54_spill] sm:$0xff] }
 0x181   :  { %7887 = vst [vmem:[#allocation53_spill] sm:$0xff] %v5217_v20  ;;  %7889 = vst [vmem:[#allocation49_spill] sm:$0xff] %v5221_v5  ;;  %v5230_v21 = vadd.f32 %v2365_v53, %v7894_v7  ;;  %v7896_v23 = vld [vmem:[#allocation72_spill] sm:$0xff]  ;;  %v7898_v2 = vld [vmem:[#allocation15_spill] sm:$0xff]  ;;  %v2375_v4 = vpop.eup %2374  ;;  %v5267_v40 = vadd.f32 %v1320_v12, %v7918_v36 }
 0x182   :  { %7892 = vst [vmem:[#allocation41_spill] sm:$0xff] %v5225_v62  ;;  %7893 = vst [vmem:[#allocation73_spill] sm:$0xff] %v5227_v3  ;;  %v5233_v42 = vadd.f32 %v2367_v47, %v7896_v23  ;;  %v1321_v20 = vmul.f32 %v2369_v18, %v7898_v2  ;;  %v7899_v9 = vld [vmem:[#allocation40_spill] sm:$0xff]  ;;  %v7904_v60 = vld [vmem:[#allocation55_spill] sm:$0xff]  ;;  %v2377_v23 = vpop.eup %2376 }
 0x183   :  { %7895 = vst [vmem:[#allocation9_spill] sm:$0xff] %v5230_v21  ;;  %v5237_v35 = vadd.f32 %v1317_v28, %v7899_v9  ;;  %v5239_v49 = vld [vmem:[#allocation2 + $0xa0] sm:$0xff]  ;;  %v1322_v62 = vmul.f32 %v2371_v11, %v7904_v60  ;;  %v7905_v5 = vld [vmem:[#allocation59_spill] sm:$0xff]  ;;  %v7906_v53 = vld [vmem:[#allocation46_spill] sm:$0xff] }
 0x184   :  { %7897 = vst [vmem:[#allocation56_spill] sm:$0xff] %v5233_v42  ;;  %7901 = vst [vmem:[#allocation42_spill] sm:$0xff] %v5239_v49  ;;  %v7902_v25 = vld [vmem:[#allocation80_spill] sm:$0xff]  ;;  %v1323_v61 = vmul.f32 %v2373_v41, %v7905_v5  ;;  %v5247_v7 = vadd.f32 %v1318_v22, %v7906_v53  ;;  %v5249_v47 = vld [vmem:[#allocation2 + $0xa8] sm:$0x3f]  ;;  %v2379_v5 = vpop.eup %2378 }
 0x185   :  { %7900 = vst [vmem:[#allocation43_spill] sm:$0xff] %v5237_v35  ;;  %v5242_v32 = vadd.f32 %v2369_v18, %v7902_v25  ;;  %v7908_v2 = vld [vmem:[#allocation60_spill] sm:$0xff]  ;;  %v7911_v35 = vld [vmem:[#allocation77_spill] sm:$0xff]  ;;  %v5258_v18 = vld [vmem:[#allocation2 + $0xb0] sm:$0xff] }
 0x186   :  { %7907 = vst [vmem:[#allocation47_spill] sm:$0xff] %v5247_v7  ;;  %v5252_v42 = vadd.f32 %v2371_v11, %v7908_v2  ;;  %v7910_v28 = vld [vmem:[#allocation12_spill] sm:$0xff]  ;;  %v5256_v21 = vadd.f32 %v1319_v8, %v7911_v35  ;;  %7913 = vst [vmem:[#allocation74_spill] sm:$0xff] %v5258_v18  ;;  %v7917_v53 = vld [vmem:[#allocation30_spill] sm:$0xff]  ;;  %v2381_v8 = vpop.eup %2380 }
 0x187   :  { %7903 = vst [vmem:[#allocation69_spill] sm:$0xff] %v5242_v32  ;;  %v1324_v9 = vmul.f32 %v2375_v4, %v7910_v28  ;;  %v7914_v25 = vld [vmem:[#allocation92_spill] sm:$0xff]  ;;  %v1325_v7 = vmul.f32 %v2377_v23, %v7917_v53  ;;  %7919 = vst [vmem:[#allocation72_spill] sm:$0xff] %v5267_v40  ;;  %v5269_v11 = vld [vmem:[#allocation2 + $0xb8] sm:$0x3f]  ;;  %v2383_v12 = vpop.eup %2382 }
 0x188   :  { %7909 = vst [vmem:[#allocation58_spill] sm:$0xff] %v5252_v42  ;;  %7912 = vst [vmem:[#allocation104_spill] sm:$0xff] %v5256_v21  ;;  %v7915_v32 = vld [vmem:[#allocation76_spill] sm:$0xff]  ;;  %v7921_v2 = vld [vmem:[#allocation93_spill] sm:$0xff] }
 0x189   :  { %v5263_v22 = vadd.f32 %v2373_v41, %v7915_v32  ;;  %7920 = vst [vmem:[#allocation15_spill] sm:$0xff] %v5269_v11  ;;  %v7922_v28 = vld [vmem:[#allocation65_spill] sm:$0xff]  ;;  %v7924_v21 = vld [vmem:[#allocation22_spill] sm:$0xff]  ;;  %v5280_v41 = vld [vmem:[#allocation2 + $0xc0] sm:$0xff] }
 0x18a   :  { %v5274_v42 = vadd.f32 %v2375_v4, %v7922_v28  ;;  %v1326_v60 = vmul.f32 %v2379_v5, %v7924_v21  ;;  %v7925_v31 = vld [vmem:[#allocation13_spill] sm:$0xff]  ;;  %7927 = vst [vmem:[#allocation55_spill] sm:$0xff] %v5280_v41  ;;  %v7928_v32 = vld [vmem:[#allocation94_spill] sm:$0xff]  ;;  %v7929_v53 = vld [vmem:[#allocation67_spill] sm:$0xff]  ;;  %v5291_v4 = vadd.f32 %v1323_v61, %v7933_v58 }
 0x18b   :  { %7916 = vst [vmem:[#allocation48_spill] sm:$0xff] %v5263_v22  ;;  %v5278_v50 = vadd.f32 %v1321_v20, %v7925_v31  ;;  %v5285_v40 = vadd.f32 %v2377_v23, %v7929_v53  ;;  %v7931_v22 = vld [vmem:[#allocation50_spill] sm:$0xff]  ;;  %v5293_v28 = vld [vmem:[#allocation2 + $0xc8] sm:$0x3f]  ;;  %v7936_v21 = vld [vmem:[#allocation95_spill] sm:$0xff]  ;;  %v2385_v20 = vpop.eup %2384  ;;  %v5302_v23 = vadd.f32 %v1324_v9, %v7940_v16 }
 0x18c   :  { %7923 = vst [vmem:[#allocation40_spill] sm:$0xff] %v5274_v42  ;;  %v5288_v35 = vadd.f32 %v1322_v62, %v7931_v22  ;;  %7934 = vst [vmem:[#allocation60_spill] sm:$0xff] %v5291_v4  ;;  %v7939_v36 = vld [vmem:[#allocation36_spill] sm:$0xff]  ;;  %v5304_v53 = vld [vmem:[#allocation2 + $0xd0] sm:$0xff]  ;;  %v2387_v16 = vpop.eup %2386 }
 0x18d   :  { %7926 = vst [vmem:[#allocation80_spill] sm:$0xff] %v5278_v50  ;;  %7930 = vst [vmem:[#allocation59_spill] sm:$0xff] %v5285_v40  ;;  %v7937_v50 = vld [vmem:[#allocation68_spill] sm:$0xff]  ;;  %v1327_v34 = vmul.f32 %v2381_v8, %v7939_v36  ;;  %v7944_v61 = vld [vmem:[#allocation14_spill] sm:$0xff] }
 0x18e   :  { %7932 = vst [vmem:[#allocation46_spill] sm:$0xff] %v5288_v35  ;;  %7935 = vst [vmem:[#allocation12_spill] sm:$0xff] %v5293_v28  ;;  %v5298_v42 = vadd.f32 %v2379_v5, %v7937_v50  ;;  %v7943_v62 = vld [vmem:[#allocation96_spill] sm:$0xff]  ;;  %v5309_v22 = vadd.f32 %v2381_v8, %v7944_v61  ;;  %v7947_v31 = vld [vmem:[#allocation10_spill] sm:$0xff] }
 0x18f   :  { %7941 = vst [vmem:[#allocation76_spill] sm:$0xff] %v5302_v23  ;;  %7942 = vst [vmem:[#allocation30_spill] sm:$0xff] %v5304_v53  ;;  %v1408_v58 = vsub.f32 %v5269_v11, %v7943_v62  ;;  %v7946_v4 = vld [vmem:[#allocation20_spill] sm:$0xff]  ;;  %v5313_v35 = vadd.f32 %v1325_v7, %v7947_v31  ;;  %v5315_v50 = vld [vmem:[#allocation2 + $0xd8] sm:$0x3f]  ;;  %v2389_v31 = vpop.eup %2388  ;;  %v5343_v43 = vadd.f32 %v1327_v34, %v7968_v30 }
 0x190   :  { %7938 = vst [vmem:[#allocation77_spill] sm:$0xff] %v5298_v42  ;;  %7945 = vst [vmem:[#allocation54_spill] sm:$0xff] %v5309_v22  ;;  %v1328_v40 = vmul.f32 %v2383_v12, %v7946_v4  ;;  %v7950_v5 = vld [vmem:[#allocation97_spill] sm:$0xff]  ;;  %v7951_v9 = vld [vmem:[#allocation71_spill] sm:$0xff]  ;;  %v7979_v30 = vsub.f32 %v5043_v26, %v7452_v51 }
 0x191   :  { %7948 = vst [vmem:[#allocation65_spill] sm:$0xff] %v5313_v35  ;;  %7949 = vst [vmem:[#allocation22_spill] sm:$0xff] %v5315_v50  ;;  %v1409_v36 = vsub.f32 %v5280_v41, %v7950_v5  ;;  %v5320_v23 = vadd.f32 %v2383_v12, %v7951_v9  ;;  %v7953_v42 = vld [vmem:[#allocation70_spill] sm:$0xff]  ;;  %v7956_v61 = vld [vmem:[#allocation16_spill] sm:$0xff] }
 0x192   :  { %v5323_v19 = vadd.f32 %v1326_v60, %v7953_v42  ;;  %v7955_v62 = vld [vmem:[#allocation98_spill] sm:$0xff]  ;;  %v7959_v35 = vld [vmem:[#allocation45_spill] sm:$0xff]  ;;  %v5334_v41 = vld [vmem:[#allocation2 + $0xe0] sm:$0xff]  ;;  %7969 = vst [vmem:[#allocation68_spill] sm:$0xff] %v5343_v43  ;;  %v1423_v34 = vmul.f32 1.442695, %v7979_v30 }
 0x193   :  { %7952 = vst [vmem:[#allocation13_spill] sm:$0xff] %v5320_v23  ;;  %v1410_v8 = vsub.f32 %v5293_v28, %v7955_v62  ;;  %v7957_v4 = vld [vmem:[#allocation78_spill] sm:$0xff]  ;;  %v5331_v11 = vadd.f32 %v2385_v20, %v7959_v35  ;;  %v7961_v52 = vld [vmem:[#allocation37_spill] sm:$0xff]  ;;  %7962 = vst [vmem:[#allocation23_spill] sm:$0xff] %v5334_v41 }
 0x194   :  { %7954 = vst [vmem:[#allocation67_spill] sm:$0xff] %v5323_v19  ;;  %v7958_v22 = vsub.f32 %v7956_v61, %v7957_v4  ;;  %v1329_v5 = vmul.f32 %v2385_v20, %v7961_v52  ;;  %v7963_v12 = vld [vmem:[#allocation99_spill] sm:$0xff]  ;;  %v7964_v42 = vld [vmem:[#allocation28_spill] sm:$0xff]  ;;  %v7967_v62 = vld [vmem:[#allocation105_spill] sm:$0xff]  ;;  %v7972_v52 = vsub.f32 %v5041_v39, %v7262_v17 }
 0x195   :  { %7960 = vst [vmem:[#allocation50_spill] sm:$0xff] %v5331_v11  ;;  %v1411_v9 = vsub.f32 %v5304_v53, %v7963_v12  ;;  %v7965_v60 = vld [vmem:[#allocation79_spill] sm:$0xff]  ;;  %v1330_v28 = vmul.f32 %v2387_v16, %v7967_v62  ;;  %v7971_v35 = vld [vmem:[#allocation100_spill] sm:$0xff]  ;;  %v7973_v37 = vld [vmem:[#allocation21_spill] sm:$0xff] }
 0x196   :  { %v1417_v7 = vmul.f32 1.442695, %v7958_v22  ;;  %v7966_v19 = vsub.f32 %v7964_v42, %v7965_v60  ;;  %v5345_v22 = vld [vmem:[#allocation2 + $0xe8] sm:$0x3f]  ;;  %v1412_v11 = vsub.f32 %v5315_v50, %v7971_v35  ;;  %v1421_v20 = vmul.f32 1.442695, %v7972_v52 }
 0x197   :  { %7970 = vst [vmem:[#allocation36_spill] sm:$0xff] %v5345_v22  ;;  %v5353_v12 = vadd.f32 %v2387_v16, %v7973_v37  ;;  %v7975_v53 = vld [vmem:[#allocation18_spill] sm:$0xff]  ;;  %v7980_v43 = vld [vmem:[#allocation11_spill] sm:$0xff]  ;;  %v7983_v52 = vld [vmem:[#allocation101_spill] sm:$0xff] }
 0x198   :  { %v1419_v23 = vmul.f32 1.442695, %v7966_v19  ;;  %v1331_v48 = vmul.f32 %v2389_v31, %v7975_v53  ;;  %v7976_v19 = vld [vmem:[#allocation62_spill] sm:$0xff]  ;;  %v5365_v35 = vadd.f32 %v2389_v31, %v7980_v43  ;;  %v5367_v50 = vld [vmem:[#allocation2 + $0xf8] sm:$0x3f]  ;;  %v1413_v37 = vsub.f32 %v5334_v41, %v7983_v52  ;;  %v5416_v41 = vld [vmem:[#allocation2 + $0x21] sm:$0xff] }
 0x199   :  { %7974 = vst [vmem:[#allocation66_spill] sm:$0xff] %v5353_v12  ;;  %v5357_v57 = vadd.f32 %v1328_v40, %v7976_v19  ;;  %v5359_v62 = vld [vmem:[#allocation2 + $0xf0] sm:$0xff]  ;;  %7982 = vst [vmem:[#allocation71_spill] sm:$0xff] %v5367_v50  ;;  %2390 = vpow2.f32 %v1417_v7  ;;  %v7984_v53 = vsub.f32 %v5045_v29, %v7273_v44  ;;  %v7985_v16 = vld [vmem:[#allocation31_spill] sm:$0xff]  ;;  %v7988_v43 = vsub.f32 %v5052_v15, %v3061_v27 }
 0x19a   :  { %7978 = vst [vmem:[#allocation20_spill] sm:$0xff] %v5359_v62  ;;  %7981 = vst [vmem:[#allocation10_spill] sm:$0xff] %v5365_v35  ;;  %v5375_v19 = vadd.f32 %v1329_v5, %v7985_v16  ;;  %2392 = vpow2.f32 %v1419_v23  ;;  %v7989_v30 = vld [vmem:[#allocation26_spill] sm:$0xff]  ;;  %v7991_v52 = vld [vmem:[#allocation103_spill] sm:$0xff] }
 0x19b   :  { %7977 = vst [vmem:[#allocation14_spill] sm:$0xff] %v5357_v57  ;;  %v1425_v40 = vmul.f32 1.442695, %v7984_v53  ;;  %v7987_v57 = vld [vmem:[#allocation102_spill] sm:$0xff]  ;;  %v1427_v31 = vmul.f32 1.442695, %v7988_v43  ;;  %v5383_v35 = vadd.f32 %v1330_v28, %v7989_v30  ;;  %v1415_v7 = vsub.f32 %v5359_v62, %v7991_v52 }
 0x19c   :  { %7986 = vst [vmem:[#allocation70_spill] sm:$0xff] %v5375_v19  ;;  %v1414_v12 = vsub.f32 %v5345_v22, %v7987_v57  ;;  %2394 = vpow2.f32 %v1421_v20  ;;  %v7992_v53 = vsub.f32 %v5054_v46, %v7819_v13  ;;  %v7993_v16 = vld [vmem:[#allocation17_spill] sm:$0xff]  ;;  %v7995_v57 = vld [vmem:[#allocation8_spill] sm:$0xff]  ;;  %v8001_v62 = vld [vmem:[#allocation38_spill] sm:$0xff] }
 0x19d   :  { %7990 = vst [vmem:[#allocation16_spill] sm:$0xff] %v5383_v35  ;;  %v5391_v19 = vadd.f32 %v1331_v48, %v7993_v16  ;;  %v1416_v23 = vsub.f32 %v5367_v50, %v7995_v57  ;;  %2396 = vpow2.f32 %v1423_v34  ;;  %v7996_v43 = vld [vmem:[#allocation84_spill] sm:$0xff]  ;;  %v7998_v30 = vld [vmem:[#allocation85_spill] sm:$0xff]  ;;  %v8000_v35 = vsub.f32 %v5066_v33, %v3073_v6  ;;  %v8002_v48 = vld [vmem:[#allocation87_spill] sm:$0xff] }
 0x19e   :  { %v1429_v5 = vmul.f32 1.442695, %v7992_v53  ;;  %v7997_v22 = vsub.f32 %v5056_v45, %v7996_v43  ;;  %2398 = vpow2.f32 %v1425_v40  ;;  %v7999_v52 = vsub.f32 %v5064_v54, %v7998_v30 }
 0x19f   :  { %7994 = vst [vmem:[#allocation45_spill] sm:$0xff] %v5391_v19  ;;  %v1435_v53 = vmul.f32 1.442695, %v8000_v35  ;;  %v8003_v16 = vsub.f32 %v8001_v62, %v8002_v48  ;;  %2400 = vpow2.f32 %v1427_v31  ;;  %v8004_v34 = vsub.f32 %v5082_v55, %v7732_v1 }
 0x1a0   :  { %v1431_v28 = vmul.f32 1.442695, %v7997_v22  ;;  %v1433_v20 = vmul.f32 1.442695, %v7999_v52  ;;  %v8005_v22 = vsub.f32 %v5084_v38, %v7739_v0  ;;  %v8006_v52 = vsub.f32 %v5098_v24, %v7747_v14  ;;  %v5429_v38 = vld [vmem:[#allocation2 + $0x31] sm:$0xff]  ;;  %v5439_v14 = vld [vmem:[#allocation2 + $0x41] sm:$0xff] }
 0x1a1   :  { %v1437_v19 = vmul.f32 1.442695, %v8003_v16  ;;  %v1439_v57 = vmul.f32 1.442695, %v8004_v34  ;;  %2402 = vpow2.f32 %v1429_v5  ;;  %v8007_v35 = vsub.f32 %v5107_v10, %v7753_v56  ;;  %v5449_v10 = vld [vmem:[#allocation2 + $0x59] sm:$0x3f] }
 0x1a2   :  { %v1441_v40 = vmul.f32 1.442695, %v8005_v22  ;;  %v1443_v50 = vmul.f32 1.442695, %v8006_v52  ;;  %v8008_v31 = vsub.f32 %v5227_v3, %v7914_v25  ;;  %v8009_v34 = vsub.f32 %v5239_v49, %v7921_v2  ;;  %v5427_v22 = vld [vmem:[#allocation2 + $0x29] sm:$0x3f] }
 0x1a3   :  { %v1445_v16 = vmul.f32 1.442695, %v8007_v35  ;;  %v5431_v52 = vld [vmem:[#allocation2 + $0x39] sm:$0x3f]  ;;  %2404 = vpow2.f32 %v1431_v28  ;;  %v8010_v5 = vsub.f32 %v5249_v47, %v7928_v32  ;;  %v8011_v35 = vsub.f32 %v5258_v18, %v7936_v21  ;;  %v5441_v2 = vld [vmem:[#allocation2 + $0x49] sm:$0x3f] }
 0x1a4   :  { %v1447_v1 = vmul.f32 1.442695, %v8008_v31  ;;  %v1449_v0 = vmul.f32 1.442695, %v8009_v34  ;;  %v1455_v31 = vmul.f32 1.442695, %v1408_v58  ;;  %2406 = vpow2.f32 %v1433_v20 }
 0x1a5   :  { %v1451_v56 = vmul.f32 1.442695, %v8010_v5  ;;  %v1453_v25 = vmul.f32 1.442695, %v8011_v35  ;;  %v5443_v34 = vld [vmem:[#allocation2 + $0x51] sm:$0xff]  ;;  %2408 = vpow2.f32 %v1435_v53  ;;  %v2391_v35 = vpop.eup %2390 }
 0x1a6   :  { %v1457_v49 = vmul.f32 1.442695, %v1409_v36  ;;  %v5445_v3 = vmul.f32 1.442695, %v1410_v8  ;;  %v5447_v28 = vmul.f32 1.442695, %v1411_v9  ;;  %2410 = vpow2.f32 %v1437_v19  ;;  %v2393_v9 = vpop.eup %2392 }
 0x1a7   :  { %v5451_v5 = vmul.f32 1.442695, %v1412_v11  ;;  %v5453_v21 = vmul.f32 1.442695, %v1413_v37  ;;  %v5455_v58 = vmul.f32 1.442695, %v1414_v12  ;;  %2412 = vpow2.f32 %v1439_v57  ;;  %v2395_v19 = vpop.eup %2394 }
 0x1a8   :  { %v5457_v32 = vmul.f32 1.442695, %v1415_v7  ;;  %v5459_v18 = vmul.f32 1.442695, %v1416_v23  ;;  %v5461_v36 = vld [vmem:[#allocation2 + $0x61] sm:$0xff]  ;;  %2414 = vpow2.f32 %v1441_v40  ;;  %v5473_v7 = vld [vmem:[#allocation2 + $0x71] sm:$0xff]  ;;  %v2397_v11 = vpop.eup %2396  ;;  %v1501_v12 = vmul.f32 %v2391_v35, %v7956_v61 }
 0x1a9   :  { %v5465_v20 = vld [vmem:[#allocation2 + $0x69] sm:$0x3f]  ;;  %2416 = vpow2.f32 %v1443_v50  ;;  %v2399_v8 = vpop.eup %2398  ;;  %v5487_v23 = vadd.f32 %v2391_v35, %v5114_v59  ;;  %v1502_v57 = vmul.f32 %v2393_v9, %v7964_v42  ;;  %v5493_v50 = vadd.f32 %v2393_v9, %v5119_v63 }
 0x1aa   :  { %2418 = vpow2.f32 %v1445_v16  ;;  %v2401_v13 = vpop.eup %2400  ;;  %v1503_v61 = vmul.f32 %v2395_v19, %v5041_v39  ;;  %v8014_v16 = vld [vmem:[#allocation29_spill] sm:$0xff]  ;;  %v1504_v42 = vmul.f32 %v2397_v11, %v5043_v26  ;;  %v1505_v35 = vmul.f32 %v2399_v8, %v5045_v29  ;;  %v8020_v26 = vld [vmem:[#allocation44_spill] sm:$0xff] }
 0x1ab   :  { %8012 = vst [vmem:[#allocation37_spill] sm:$0xff] %v5487_v23  ;;  %2420 = vpow2.f32 %v1447_v1  ;;  %8013 = vst [vmem:[#allocation28_spill] sm:$0xff] %v5493_v50  ;;  %v2403_v37 = vpop.eup %2402  ;;  %v5499_v59 = vadd.f32 %v2395_v19, %v8014_v16  ;;  %v8015_v1 = vld [vmem:[#allocation63_spill] sm:$0xff]  ;;  %v1506_v63 = vmul.f32 %v2401_v13, %v5052_v15  ;;  %v8017_v39 = vld [vmem:[#allocation61_spill] sm:$0xff]  ;;  %v5515_v16 = vadd.f32 %v1502_v57, %v8020_v26 }
 0x1ac   :  { %2422 = vpow2.f32 %v1449_v0  ;;  %v5504_v23 = vadd.f32 %v2397_v11, %v8015_v1  ;;  %v5508_v9 = vadd.f32 %v1501_v12, %v8017_v39  ;;  %v8018_v0 = vld [vmem:[#allocation110_spill] sm:$0xff]  ;;  %v1507_v19 = vmul.f32 %v2403_v37, %v5054_v46  ;;  %v8030_v57 = vld [vmem:[#allocation107_spill] sm:$0xff] }
 0x1ad   :  { %v2405_v53 = vpop.eup %2404  ;;  %2424 = vpow2.f32 %v1451_v56  ;;  %v5511_v50 = vadd.f32 %v2399_v8, %v8018_v0  ;;  %8021 = vst [vmem:[#allocation21_spill] sm:$0xff] %v5515_v16  ;;  %v8022_v56 = vld [vmem:[#allocation32_spill] sm:$0xff]  ;;  %v8024_v1 = vld [vmem:[#allocation34_spill] sm:$0xff]  ;;  %v5531_v26 = vadd.f32 %v1505_v35, %v8030_v57 }
 0x1ae   :  { %8016 = vst [vmem:[#allocation105_spill] sm:$0xff] %v5504_v23  ;;  %v2407_v40 = vpop.eup %2406  ;;  %2426 = vpow2.f32 %v1453_v25  ;;  %v5518_v11 = vadd.f32 %v2401_v13, %v8022_v56  ;;  %v1508_v15 = vmul.f32 %v2405_v53, %v5056_v45  ;;  %v5522_v12 = vadd.f32 %v1503_v61, %v8024_v1  ;;  %v8026_v25 = vld [vmem:[#allocation109_spill] sm:$0xff]  ;;  %v8028_v0 = vld [vmem:[#allocation24_spill] sm:$0xff]  ;;  %v8032_v13 = vld [vmem:[#allocation39_spill] sm:$0xff] }
 0x1af   :  { %8019 = vst [vmem:[#allocation57_spill] sm:$0xff] %v5511_v50  ;;  %v2409_v29 = vpop.eup %2408  ;;  %2428 = vpow2.f32 %v1455_v31  ;;  %v5525_v8 = vadd.f32 %v2403_v37, %v8026_v25  ;;  %v5528_v46 = vadd.f32 %v1504_v42, %v8028_v0  ;;  %8031 = vst [vmem:[#allocation26_spill] sm:$0xff] %v5531_v26  ;;  %v5535_v56 = vadd.f32 %v2405_v53, %v8032_v13  ;;  %v8034_v61 = vld [vmem:[#allocation27_spill] sm:$0xff]  ;;  %v8036_v37 = vld [vmem:[#allocation33_spill] sm:$0xff] }
 0x1b0   :  { %8023 = vst [vmem:[#allocation18_spill] sm:$0xff] %v5518_v11  ;;  %8025 = vst [vmem:[#allocation62_spill] sm:$0xff] %v5522_v12  ;;  %v2411_v39 = vpop.eup %2410  ;;  %2430 = vpow2.f32 %v1457_v49  ;;  %v1509_v45 = vmul.f32 %v2407_v40, %v5064_v54  ;;  %v5539_v1 = vadd.f32 %v1506_v63, %v8034_v61  ;;  %v5543_v42 = vadd.f32 %v2407_v40, %v8036_v37  ;;  %v8038_v25 = vld [vmem:[#allocation51_spill] sm:$0xff]  ;;  %v8040_v53 = vld [vmem:[#allocation108_spill] sm:$0xff] }
 0x1b1   :  { %8027 = vst [vmem:[#allocation11_spill] sm:$0xff] %v5525_v8  ;;  %8029 = vst [vmem:[#allocation31_spill] sm:$0xff] %v5528_v46  ;;  %v2413_v31 = vpop.eup %2412  ;;  %2432 = vpow2.f32 %v5445_v3  ;;  %v1510_v35 = vmul.f32 %v2409_v29, %v5066_v33  ;;  %v5547_v0 = vadd.f32 %v1507_v19, %v8038_v25  ;;  %v5551_v57 = vadd.f32 %v2409_v29, %v8040_v53  ;;  %v8042_v63 = vld [vmem:[#allocation19_spill] sm:$0xff]  ;;  %v8046_v19 = vld [vmem:[#allocation106_spill] sm:$0xff] }
 0x1b2   :  { %8033 = vst [vmem:[#allocation17_spill] sm:$0xff] %v5535_v56  ;;  %8035 = vst [vmem:[#allocation85_spill] sm:$0xff] %v5539_v1  ;;  %v2415_v49 = vpop.eup %2414  ;;  %2434 = vpow2.f32 %v5447_v28  ;;  %v1511_v54 = vmul.f32 %v2411_v39, %v8001_v62  ;;  %v5555_v13 = vadd.f32 %v1508_v15, %v8042_v63  ;;  %v8044_v40 = vld [vmem:[#allocation111_spill] sm:$0xff]  ;;  %v1512_v33 = vmul.f32 %v2413_v31, %v5082_v55  ;;  %v8049_v15 = vld [vmem:[#allocation64_spill] sm:$0xff] }
 0x1b3   :  { %8037 = vst [vmem:[#allocation38_spill] sm:$0xff] %v5543_v42  ;;  %8039 = vst [vmem:[#allocation87_spill] sm:$0xff] %v5547_v0  ;;  %v2417_v3 = vpop.eup %2416  ;;  %2436 = vpow2.f32 %v5451_v5  ;;  %v5559_v61 = vadd.f32 %v2411_v39, %v8044_v40  ;;  %v1513_v37 = vmul.f32 %v2415_v49, %v8046_v19  ;;  %v8047_v5 = vld [vmem:[#allocation112_spill] sm:$0xff]  ;;  %v5569_v53 = vadd.f32 %v1509_v45, %v8049_v15  ;;  %v8052_v40 = vld [vmem:[#allocation73_spill] sm:$0xff] }
 0x1b4   :  { %8041 = vst [vmem:[#allocation29_spill] sm:$0xff] %v5551_v57  ;;  %8043 = vst [vmem:[#allocation63_spill] sm:$0xff] %v5555_v13  ;;  %v2419_v28 = vpop.eup %2418  ;;  %2438 = vpow2.f32 %v5453_v21  ;;  %v5565_v29 = vadd.f32 %v2413_v31, %v8047_v5  ;;  %v1514_v62 = vmul.f32 %v2417_v3, %v5098_v24  ;;  %v8051_v21 = vld [vmem:[#allocation25_spill] sm:$0xff]  ;;  %v8059_v45 = vld [vmem:[#allocation75_spill] sm:$0xff]  ;;  %v8174_v23 = vsub.f32 %v5441_v2, %v3061_v27 }
 0x1b5   :  { %8045 = vst [vmem:[#allocation61_spill] sm:$0xff] %v5559_v61  ;;  %v2421_v25 = vpop.eup %2420  ;;  %2440 = vpow2.f32 %v5455_v58  ;;  %8050 = vst [vmem:[#allocation44_spill] sm:$0xff] %v5569_v53  ;;  %v1515_v39 = vmul.f32 %v2419_v28, %v8051_v21  ;;  %v8053_v61 = vld [vmem:[#allocation35_spill] sm:$0xff]  ;;  %v8055_v58 = vld [vmem:[#allocation52_spill] sm:$0xff]  ;;  %v5585_v15 = vadd.f32 %v1511_v54, %v8059_v45 }
 0x1b6   :  { %8048 = vst [vmem:[#allocation110_spill] sm:$0xff] %v5565_v29  ;;  %v2423_v63 = vpop.eup %2422  ;;  %2442 = vpow2.f32 %v5457_v32  ;;  %v1516_v55 = vmul.f32 %v2421_v25, %v8052_v40  ;;  %v5575_v19 = vadd.f32 %v1510_v35, %v8053_v61  ;;  %v5579_v31 = vadd.f32 %v2415_v49, %v8055_v58  ;;  %v8057_v24 = vld [vmem:[#allocation81_spill] sm:$0xff]  ;;  %v8063_v40 = vld [vmem:[#allocation42_spill] sm:$0xff]  ;;  %v5597_v49 = vld [vmem:[#allocation2 + $0x79] sm:$0x3f] }
 0x1b7   :  { %v2425_v13 = vpop.eup %2424  ;;  %2444 = vpow2.f32 %v5459_v18  ;;  %v5582_v5 = vadd.f32 %v2417_v3, %v8057_v24  ;;  %8060 = vst [vmem:[#allocation24_spill] sm:$0xff] %v5585_v15  ;;  %v8061_v53 = vld [vmem:[#allocation49_spill] sm:$0xff]  ;;  %v1517_v29 = vmul.f32 %v2423_v63, %v8063_v40  ;;  %v8070_v45 = vld [vmem:[#allocation74_spill] sm:$0xff]  ;;  %v8141_v12 = vld [vmem:[#allocation71_spill] sm:$0xff] }
 0x1b8   :  { %8054 = vst [vmem:[#allocation32_spill] sm:$0xff] %v5575_v19  ;;  %8056 = vst [vmem:[#allocation34_spill] sm:$0xff] %v5579_v31  ;;  %v2427_v32 = vpop.eup %2426  ;;  %v5588_v21 = vadd.f32 %v2419_v28, %v8061_v53  ;;  %v8064_v35 = vld [vmem:[#allocation53_spill] sm:$0xff]  ;;  %v1518_v54 = vmul.f32 %v2425_v13, %v5249_v47  ;;  %v8071_v28 = vld [vmem:[#allocation43_spill] sm:$0xff] }
 0x1b9   :  { %8058 = vst [vmem:[#allocation109_spill] sm:$0xff] %v5582_v5  ;;  %v5592_v61 = vadd.f32 %v1512_v33, %v8064_v35  ;;  %v8066_v19 = vld [vmem:[#allocation41_spill] sm:$0xff]  ;;  %v2429_v58 = vpop.eup %2428  ;;  %v1519_v15 = vmul.f32 %v2427_v32, %v8070_v45  ;;  %v5605_v53 = vadd.f32 %v1514_v62, %v8071_v28  ;;  %v8074_v35 = vld [vmem:[#allocation56_spill] sm:$0xff]  ;;  %v8083_v62 = vld [vmem:[#allocation58_spill] sm:$0xff] }
 0x1ba   :  { %8062 = vst [vmem:[#allocation107_spill] sm:$0xff] %v5588_v21  ;;  %v5595_v18 = vadd.f32 %v1513_v37, %v8066_v19  ;;  %v8068_v3 = vld [vmem:[#allocation9_spill] sm:$0xff]  ;;  %v2431_v33 = vpop.eup %2430  ;;  %v5610_v21 = vadd.f32 %v2423_v63, %v8074_v35  ;;  %v5624_v28 = vadd.f32 %v2427_v32, %v8083_v62  ;;  %v8086_v5 = vld [vmem:[#allocation55_spill] sm:$0xff]  ;;  %v8098_v31 = vld [vmem:[#allocation80_spill] sm:$0xff] }
 0x1bb   :  { %8065 = vst [vmem:[#allocation39_spill] sm:$0xff] %v5592_v61  ;;  %v5600_v24 = vadd.f32 %v2421_v25, %v8068_v3  ;;  %8072 = vst [vmem:[#allocation51_spill] sm:$0xff] %v5605_v53  ;;  %v5607_v40 = vld [vmem:[#allocation2 + $0x81] sm:$0xff]  ;;  %v5621_v47 = vld [vmem:[#allocation2 + $0x89] sm:$0x3f]  ;;  %v2433_v45 = vpop.eup %2432  ;;  %v1521_v63 = vmul.f32 %v2431_v33, %v8086_v5 }
 0x1bc   :  { %8067 = vst [vmem:[#allocation27_spill] sm:$0xff] %v5595_v18  ;;  %8073 = vst [vmem:[#allocation108_spill] sm:$0xff] %v5607_v40  ;;  %v8076_v37 = vld [vmem:[#allocation69_spill] sm:$0xff]  ;;  %v8078_v18 = vld [vmem:[#allocation47_spill] sm:$0xff] }
 0x1bd   :  { %8069 = vst [vmem:[#allocation33_spill] sm:$0xff] %v5600_v24  ;;  %8075 = vst [vmem:[#allocation19_spill] sm:$0xff] %v5610_v21  ;;  %v5613_v19 = vadd.f32 %v2425_v13, %v8076_v37  ;;  %v5616_v61 = vadd.f32 %v1515_v39, %v8078_v18  ;;  %v8080_v25 = vld [vmem:[#allocation104_spill] sm:$0xff]  ;;  %v8085_v53 = vld [vmem:[#allocation15_spill] sm:$0xff]  ;;  %v2435_v39 = vpop.eup %2434  ;;  %v5647_v37 = vadd.f32 %v1518_v54, %v8098_v31 }
 0x1be   :  { %v5619_v3 = vadd.f32 %v1516_v55, %v8080_v25  ;;  %8082 = vst [vmem:[#allocation64_spill] sm:$0xff] %v5621_v47  ;;  %8084 = vst [vmem:[#allocation25_spill] sm:$0xff] %v5624_v28  ;;  %v1520_v24 = vmul.f32 %v2429_v58, %v8085_v53  ;;  %v5628_v35 = vld [vmem:[#allocation2 + $0x91] sm:$0xff]  ;;  %v8088_v13 = vld [vmem:[#allocation88_spill] sm:$0xff]  ;;  %v2437_v5 = vpop.eup %2436 }
 0x1bf   :  { %8077 = vst [vmem:[#allocation111_spill] sm:$0xff] %v5613_v19  ;;  %8079 = vst [vmem:[#allocation106_spill] sm:$0xff] %v5616_v61  ;;  %v8089_v18 = vld [vmem:[#allocation48_spill] sm:$0xff]  ;;  %v5639_v32 = vld [vmem:[#allocation2 + $0x99] sm:$0x3f] }
 0x1c0   :  { %8081 = vst [vmem:[#allocation112_spill] sm:$0xff] %v5619_v3  ;;  %8087 = vst [vmem:[#allocation73_spill] sm:$0xff] %v5628_v35  ;;  %v5633_v19 = vadd.f32 %v2429_v58, %v8089_v18  ;;  %v8091_v55 = vld [vmem:[#allocation12_spill] sm:$0xff]  ;;  %v8095_v62 = vld [vmem:[#allocation89_spill] sm:$0xff] }
 0x1c1   :  { %v1522_v25 = vmul.f32 %v2433_v45, %v8091_v55  ;;  %v8092_v3 = vld [vmem:[#allocation72_spill] sm:$0xff]  ;;  %8094 = vst [vmem:[#allocation81_spill] sm:$0xff] %v5639_v32  ;;  %8099 = vst [vmem:[#allocation49_spill] sm:$0xff] %v5647_v37  ;;  %v8100_v57 = vld [vmem:[#allocation46_spill] sm:$0xff] }
 0x1c2   :  { %8090 = vst [vmem:[#allocation35_spill] sm:$0xff] %v5633_v19  ;;  %v5637_v61 = vadd.f32 %v1517_v29, %v8092_v3  ;;  %v8096_v28 = vld [vmem:[#allocation40_spill] sm:$0xff]  ;;  %v5650_v58 = vadd.f32 %v1519_v15, %v8100_v57  ;;  %v8103_v55 = vld [vmem:[#allocation90_spill] sm:$0xff]  ;;  %v2439_v3 = vpop.eup %2438  ;;  %v8104_v19 = vld [vmem:[#allocation59_spill] sm:$0xff] }
 0x1c3   :  { %v5644_v21 = vadd.f32 %v2431_v33, %v8096_v28  ;;  %v5652_v18 = vld [vmem:[#allocation2 + $0xa1] sm:$0xff]  ;;  %v8106_v53 = vld [vmem:[#allocation30_spill] sm:$0xff]  ;;  %v5661_v28 = vld [vmem:[#allocation2 + $0xa9] sm:$0x3f]  ;;  %v2441_v57 = vpop.eup %2440 }
 0x1c4   :  { %8093 = vst [vmem:[#allocation52_spill] sm:$0xff] %v5637_v61  ;;  %8101 = vst [vmem:[#allocation42_spill] sm:$0xff] %v5650_v58  ;;  %v5657_v61 = vadd.f32 %v2433_v45, %v8104_v19  ;;  %v1523_v0 = vmul.f32 %v2435_v39, %v8106_v53  ;;  %v8107_v42 = vld [vmem:[#allocation22_spill] sm:$0xff]  ;;  %v8109_v31 = vld [vmem:[#allocation91_spill] sm:$0xff]  ;;  %v2443_v53 = vpop.eup %2442 }
 0x1c5   :  { %8097 = vst [vmem:[#allocation75_spill] sm:$0xff] %v5644_v21  ;;  %8102 = vst [vmem:[#allocation53_spill] sm:$0xff] %v5652_v18  ;;  %v1524_v33 = vmul.f32 %v2437_v5, %v8107_v42  ;;  %v8110_v15 = vld [vmem:[#allocation77_spill] sm:$0xff]  ;;  %v8112_v21 = vld [vmem:[#allocation60_spill] sm:$0xff] }
 0x1c6   :  { %8105 = vst [vmem:[#allocation41_spill] sm:$0xff] %v5657_v61  ;;  %8108 = vst [vmem:[#allocation9_spill] sm:$0xff] %v5661_v28  ;;  %v5666_v58 = vadd.f32 %v2435_v39, %v8110_v15  ;;  %v5669_v37 = vadd.f32 %v1520_v24, %v8112_v21  ;;  %v8114_v29 = vld [vmem:[#allocation76_spill] sm:$0xff]  ;;  %v5674_v19 = vld [vmem:[#allocation2 + $0xb1] sm:$0xff] }
 0x1c7   :  { %v5672_v1 = vadd.f32 %v1521_v63, %v8114_v29  ;;  %8116 = vst [vmem:[#allocation69_spill] sm:$0xff] %v5674_v19  ;;  %v8117_v45 = vld [vmem:[#allocation92_spill] sm:$0xff]  ;;  %v8118_v61 = vld [vmem:[#allocation54_spill] sm:$0xff]  ;;  %v8120_v54 = vld [vmem:[#allocation23_spill] sm:$0xff]  ;;  %v2445_v63 = vpop.eup %2444 }
 0x1c8   :  { %8111 = vst [vmem:[#allocation74_spill] sm:$0xff] %v5666_v58  ;;  %8113 = vst [vmem:[#allocation43_spill] sm:$0xff] %v5669_v37  ;;  %v5679_v56 = vadd.f32 %v2437_v5, %v8118_v61  ;;  %v1525_v26 = vmul.f32 %v2439_v3, %v8120_v54  ;;  %v8121_v8 = vld [vmem:[#allocation65_spill] sm:$0xff]  ;;  %v5685_v15 = vld [vmem:[#allocation2 + $0xb9] sm:$0x3f]  ;;  %v1528_v50 = vmul.f32 %v2445_v63, %v8141_v12 }
 0x1c9   :  { %8115 = vst [vmem:[#allocation56_spill] sm:$0xff] %v5672_v1  ;;  %v5683_v39 = vadd.f32 %v1522_v25, %v8121_v8  ;;  %8123 = vst [vmem:[#allocation58_spill] sm:$0xff] %v5685_v15  ;;  %v8124_v21 = vld [vmem:[#allocation93_spill] sm:$0xff]  ;;  %v8127_v58 = vld [vmem:[#allocation36_spill] sm:$0xff] }
 0x1ca   :  { %8119 = vst [vmem:[#allocation47_spill] sm:$0xff] %v5679_v56  ;;  %v8125_v29 = vld [vmem:[#allocation13_spill] sm:$0xff]  ;;  %v1526_v42 = vmul.f32 %v2441_v57, %v8127_v58  ;;  %v8128_v37 = vld [vmem:[#allocation20_spill] sm:$0xff]  ;;  %v8130_v5 = vld [vmem:[#allocation94_spill] sm:$0xff] }
 0x1cb   :  { %8122 = vst [vmem:[#allocation104_spill] sm:$0xff] %v5683_v39  ;;  %v5690_v1 = vadd.f32 %v2439_v3, %v8125_v29  ;;  %v1527_v46 = vmul.f32 %v2443_v53, %v8128_v37  ;;  %v5694_v61 = vld [vmem:[#allocation2 + $0xc1] sm:$0xff]  ;;  %v1602_v54 = vsub.f32 %v5661_v28, %v8130_v5  ;;  %v8131_v8 = vld [vmem:[#allocation50_spill] sm:$0xff]  ;;  %v8133_v39 = vld [vmem:[#allocation67_spill] sm:$0xff] }
 0x1cc   :  { %8129 = vst [vmem:[#allocation55_spill] sm:$0xff] %v5694_v61  ;;  %v5699_v25 = vadd.f32 %v2441_v57, %v8131_v8  ;;  %v5702_v56 = vadd.f32 %v1523_v0, %v8133_v39  ;;  %v8135_v24 = vld [vmem:[#allocation68_spill] sm:$0xff]  ;;  %v5707_v3 = vld [vmem:[#allocation2 + $0xc9] sm:$0x3f]  ;;  %v8138_v29 = vld [vmem:[#allocation95_spill] sm:$0xff]  ;;  %v8146_v39 = vsub.f32 %v5416_v41, %v7957_v4 }
 0x1cd   :  { %8126 = vst [vmem:[#allocation15_spill] sm:$0xff] %v5690_v1  ;;  %v5705_v11 = vadd.f32 %v1524_v33, %v8135_v24  ;;  %8137 = vst [vmem:[#allocation72_spill] sm:$0xff] %v5707_v3  ;;  %v1603_v58 = vsub.f32 %v5674_v19, %v8138_v29  ;;  %v8139_v37 = vld [vmem:[#allocation66_spill] sm:$0xff]  ;;  %v5717_v57 = vld [vmem:[#allocation2 + $0xd9] sm:$0x3f]  ;;  %v8153_v29 = vsub.f32 %v5427_v22, %v7965_v60 }
 0x1ce   :  { %8132 = vst [vmem:[#allocation88_spill] sm:$0xff] %v5699_v25  ;;  %8134 = vst [vmem:[#allocation48_spill] sm:$0xff] %v5702_v56  ;;  %v5712_v1 = vadd.f32 %v2443_v53, %v8139_v37  ;;  %v5715_v5 = vld [vmem:[#allocation2 + $0xd1] sm:$0xff]  ;;  %v5719_v8 = vld [vmem:[#allocation2 + $0xe1] sm:$0xff]  ;;  %v1613_v24 = vmul.f32 1.442695, %v8146_v39 }
 0x1cf   :  { %8136 = vst [vmem:[#allocation12_spill] sm:$0xff] %v5705_v11  ;;  %8142 = vst [vmem:[#allocation40_spill] sm:$0xff] %v5715_v5  ;;  %v8145_v0 = vld [vmem:[#allocation96_spill] sm:$0xff]  ;;  %v8147_v11 = vld [vmem:[#allocation10_spill] sm:$0xff]  ;;  %v1615_v19 = vmul.f32 1.442695, %v8153_v29 }
 0x1d0   :  { %8140 = vst [vmem:[#allocation89_spill] sm:$0xff] %v5712_v1  ;;  %8143 = vst [vmem:[#allocation80_spill] sm:$0xff] %v5717_v57  ;;  %v1604_v33 = vsub.f32 %v5685_v15, %v8145_v0  ;;  %v5727_v56 = vadd.f32 %v2445_v63, %v8147_v11  ;;  %v8149_v53 = vld [vmem:[#allocation14_spill] sm:$0xff]  ;;  %v5732_v12 = vld [vmem:[#allocation2 + $0xe9] sm:$0x3f]  ;;  %2446 = vpow2.f32 %v1613_v24 }
 0x1d1   :  { %8144 = vst [vmem:[#allocation46_spill] sm:$0xff] %v5719_v8  ;;  %v5730_v37 = vadd.f32 %v1525_v26, %v8149_v53  ;;  %8151 = vst [vmem:[#allocation30_spill] sm:$0xff] %v5732_v12  ;;  %v8152_v1 = vld [vmem:[#allocation97_spill] sm:$0xff]  ;;  %v8154_v0 = vld [vmem:[#allocation70_spill] sm:$0xff]  ;;  %2448 = vpow2.f32 %v1615_v19 }
 0x1d2   :  { %8148 = vst [vmem:[#allocation90_spill] sm:$0xff] %v5727_v56  ;;  %v1605_v25 = vsub.f32 %v5694_v61, %v8152_v1  ;;  %v5740_v15 = vadd.f32 %v1526_v42, %v8154_v0  ;;  %v8156_v28 = vld [vmem:[#allocation16_spill] sm:$0xff]  ;;  %v5745_v11 = vld [vmem:[#allocation2 + $0xf1] sm:$0xff]  ;;  %v5747_v63 = vld [vmem:[#allocation2 + $0xf9] sm:$0x3f]  ;;  %v8161_v56 = vsub.f32 %v5429_v38, %v7262_v17 }
 0x1d3   :  { %8150 = vst [vmem:[#allocation59_spill] sm:$0xff] %v5730_v37  ;;  %v5743_v39 = vadd.f32 %v1527_v46, %v8156_v28  ;;  %8158 = vst [vmem:[#allocation77_spill] sm:$0xff] %v5745_v11  ;;  %v8160_v26 = vld [vmem:[#allocation98_spill] sm:$0xff]  ;;  %v8162_v1 = vld [vmem:[#allocation99_spill] sm:$0xff]  ;;  %v8165_v28 = vsub.f32 %v5431_v52, %v7452_v51 }
 0x1d4   :  { %8155 = vst [vmem:[#allocation22_spill] sm:$0xff] %v5740_v15  ;;  %8159 = vst [vmem:[#allocation60_spill] sm:$0xff] %v5747_v63  ;;  %v1606_v53 = vsub.f32 %v5707_v3, %v8160_v26  ;;  %v1617_v37 = vmul.f32 1.442695, %v8161_v56  ;;  %v1607_v29 = vsub.f32 %v5715_v5, %v8162_v1  ;;  %v8163_v61 = vld [vmem:[#allocation100_spill] sm:$0xff]  ;;  %v8164_v0 = vld [vmem:[#allocation101_spill] sm:$0xff] }
 0x1d5   :  { %8157 = vst [vmem:[#allocation91_spill] sm:$0xff] %v5743_v39  ;;  %v1608_v42 = vsub.f32 %v5717_v57, %v8163_v61  ;;  %v1609_v46 = vsub.f32 %v5719_v8, %v8164_v0  ;;  %v1619_v39 = vmul.f32 1.442695, %v8165_v28  ;;  %v5763_v15 = vld [vmem:[#allocation2 + $0x22] sm:$0xff]  ;;  %v5765_v3 = vld [vmem:[#allocation2 + $0x2a] sm:$0x3f]  ;;  %v8171_v57 = vsub.f32 %v5439_v14, %v7273_v44 }
 0x1d6   :  { %8166 = vst [vmem:[#allocation76_spill] sm:$0xff] %v5763_v15  ;;  %8167 = vst [vmem:[#allocation54_spill] sm:$0xff] %v5765_v3  ;;  %v8168_v26 = vld [vmem:[#allocation45_spill] sm:$0xff]  ;;  %v8170_v56 = vld [vmem:[#allocation102_spill] sm:$0xff]  ;;  %2450 = vpow2.f32 %v1617_v37  ;;  %v8179_v37 = vsub.f32 %v5465_v20, %v3073_v6  ;;  %v5827_v15 = vmul.f32 1.442695, %v1603_v58 }
 0x1d7   :  { %v5768_v16 = vadd.f32 %v1528_v50, %v8168_v26  ;;  %v1610_v5 = vsub.f32 %v5732_v12, %v8170_v56  ;;  %v1621_v61 = vmul.f32 1.442695, %v8171_v57  ;;  %v8172_v8 = vld [vmem:[#allocation103_spill] sm:$0xff]  ;;  %v8173_v1 = vld [vmem:[#allocation8_spill] sm:$0xff]  ;;  %v1623_v50 = vmul.f32 1.442695, %v8174_v23 }
 0x1d8   :  { %v1611_v0 = vsub.f32 %v5745_v11, %v8172_v8  ;;  %v1612_v28 = vsub.f32 %v5747_v63, %v8173_v1  ;;  %v8175_v26 = vld [vmem:[#allocation83_spill] sm:$0xff]  ;;  %2452 = vpow2.f32 %v1619_v39  ;;  %v8177_v63 = vsub.f32 %v5449_v10, %v7996_v43  ;;  %v5820_v4 = vld [vmem:[#allocation2 + $0x42] sm:$0xff] }
 0x1d9   :  { %8169 = vst [vmem:[#allocation23_spill] sm:$0xff] %v5768_v16  ;;  %v8176_v16 = vsub.f32 %v5443_v34, %v8175_v26  ;;  %v8178_v11 = vsub.f32 %v5461_v36, %v7998_v30  ;;  %v1631_v1 = vmul.f32 1.442695, %v8179_v37  ;;  %2454 = vpow2.f32 %v1621_v61  ;;  %v5816_v3 = vld [vmem:[#allocation2 + $0x32] sm:$0xff]  ;;  %8186 = vst [vmem:[#allocation65_spill] sm:$0xff] %v5820_v4 }
 0x1da   :  { %v1627_v19 = vmul.f32 1.442695, %v8177_v63  ;;  %v8181_v39 = vsub.f32 %v5597_v49, %v8088_v13  ;;  %v8182_v63 = vsub.f32 %v5607_v40, %v8095_v62  ;;  %2456 = vpow2.f32 %v1623_v50  ;;  %v5859_v40 = vld [vmem:[#allocation2 + $0x7a] sm:$0x3f] }
 0x1db   :  { %v1625_v24 = vmul.f32 1.442695, %v8176_v16  ;;  %v1629_v23 = vmul.f32 1.442695, %v8178_v11  ;;  %v8180_v16 = vsub.f32 %v5473_v7, %v8002_v48  ;;  %v8183_v11 = vsub.f32 %v5621_v47, %v8103_v55  ;;  %v5841_v47 = vld [vmem:[#allocation2 + $0x62] sm:$0xff]  ;;  %8190 = vst [vmem:[#allocation20_spill] sm:$0xff] %v5859_v40 }
 0x1dc   :  { %v1635_v57 = vmul.f32 1.442695, %v8181_v39  ;;  %v1637_v8 = vmul.f32 1.442695, %v8182_v63  ;;  %v8184_v61 = vsub.f32 %v5628_v35, %v8109_v31  ;;  %v5818_v39 = vld [vmem:[#allocation2 + $0x3a] sm:$0x3f]  ;;  %v8187_v50 = vsub.f32 %v5652_v18, %v8124_v21 }
 0x1dd   :  { %v1633_v12 = vmul.f32 1.442695, %v8180_v16  ;;  %v1639_v56 = vmul.f32 1.442695, %v8183_v11  ;;  %v8185_v16 = vsub.f32 %v5639_v32, %v8117_v45  ;;  %2458 = vpow2.f32 %v1625_v24  ;;  %v5831_v35 = vld [vmem:[#allocation2 + $0x52] sm:$0xff] }
 0x1de   :  { %v1641_v37 = vmul.f32 1.442695, %v8184_v61  ;;  %v1645_v63 = vmul.f32 1.442695, %v8187_v50  ;;  %v5825_v11 = vmul.f32 1.442695, %v1602_v54  ;;  %2460 = vpow2.f32 %v1627_v19 }
 0x1df   :  { %v1643_v60 = vmul.f32 1.442695, %v8185_v16  ;;  %v5829_v61 = vld [vmem:[#allocation2 + $0x4a] sm:$0x3f]  ;;  %v5833_v16 = vld [vmem:[#allocation2 + $0x5a] sm:$0x3f]  ;;  %2462 = vpow2.f32 %v1629_v23 }
 0x1e0   :  { %8188 = vst [vmem:[#allocation13_spill] sm:$0xff] %v5833_v16  ;;  %v5835_v45 = vmul.f32 1.442695, %v1604_v33  ;;  %v5837_v32 = vmul.f32 1.442695, %v1605_v25  ;;  %2464 = vpow2.f32 %v1631_v1  ;;  %v5857_v19 = vld [vmem:[#allocation2 + $0x72] sm:$0xff] }
 0x1e1   :  { %v5839_v24 = vmul.f32 1.442695, %v1606_v53  ;;  %v5843_v50 = vld [vmem:[#allocation2 + $0x6a] sm:$0x3f]  ;;  %v5845_v54 = vmul.f32 1.442695, %v1607_v29  ;;  %v2447_v53 = vpop.eup %2446  ;;  %2466 = vpow2.f32 %v1633_v12 }
 0x1e2   :  { %v5847_v58 = vmul.f32 1.442695, %v1608_v42  ;;  %v5849_v21 = vmul.f32 1.442695, %v1609_v46  ;;  %v5851_v18 = vmul.f32 1.442695, %v1610_v5  ;;  %v2449_v5 = vpop.eup %2448  ;;  %2468 = vpow2.f32 %v1635_v57 }
 0x1e3   :  { %v5853_v33 = vmul.f32 1.442695, %v1611_v0  ;;  %v5855_v25 = vmul.f32 1.442695, %v1612_v28  ;;  %8189 = vst [vmem:[#allocation36_spill] sm:$0xff] %v5857_v19  ;;  %v5867_v0 = vld [vmem:[#allocation2 + $0x82] sm:$0xff]  ;;  %v2451_v29 = vpop.eup %2450  ;;  %2470 = vpow2.f32 %v1637_v8  ;;  %v1697_v42 = vmul.f32 %v2447_v53, %v5416_v41 }
 0x1e4   :  { %8191 = vst [vmem:[#allocation50_spill] sm:$0xff] %v5867_v0  ;;  %v5869_v46 = vld [vmem:[#allocation2 + $0x8a] sm:$0x3f]  ;;  %v5878_v1 = vld [vmem:[#allocation2 + $0x92] sm:$0xff]  ;;  %v2453_v4 = vpop.eup %2452  ;;  %2472 = vpow2.f32 %v1639_v56  ;;  %v1698_v12 = vmul.f32 %v2449_v5, %v5427_v22  ;;  %v1699_v16 = vmul.f32 %v2451_v29, %v5429_v38  ;;  %v8195_v22 = vld [vmem:[#allocation28_spill] sm:$0xff]  ;;  %v5904_v38 = vadd.f32 %v2451_v29, %v5499_v59 }
 0x1e5   :  { %8192 = vst [vmem:[#allocation67_spill] sm:$0xff] %v5869_v46  ;;  %8193 = vst [vmem:[#allocation68_spill] sm:$0xff] %v5878_v1  ;;  %v2455_v23 = vpop.eup %2454  ;;  %v8194_v41 = vld [vmem:[#allocation37_spill] sm:$0xff]  ;;  %2474 = vpow2.f32 %v1641_v37  ;;  %v5898_v6 = vadd.f32 %v2449_v5, %v8195_v22  ;;  %v1700_v28 = vmul.f32 %v2453_v4, %v5431_v52  ;;  %v5908_v57 = vadd.f32 %v1697_v42, %v5508_v9  ;;  %v8200_v9 = vld [vmem:[#allocation62_spill] sm:$0xff] }
 0x1e6   :  { %v5890_v43 = vadd.f32 %v2447_v53, %v8194_v41  ;;  %v2457_v44 = vpop.eup %2456  ;;  %2476 = vpow2.f32 %v1643_v60  ;;  %v1701_v41 = vmul.f32 %v2455_v23, %v5439_v14  ;;  %v8197_v37 = vld [vmem:[#allocation105_spill] sm:$0xff]  ;;  %v5923_v29 = vadd.f32 %v1699_v16, %v8200_v9  ;;  %v8204_v16 = vld [vmem:[#allocation26_spill] sm:$0xff] }
 0x1e7   :  { %8196 = vst [vmem:[#allocation66_spill] sm:$0xff] %v5898_v6  ;;  %v2459_v53 = vpop.eup %2458  ;;  %2478 = vpow2.f32 %v1645_v63  ;;  %v5911_v5 = vadd.f32 %v2453_v4, %v8197_v37  ;;  %v1702_v52 = vmul.f32 %v2457_v44, %v5441_v2  ;;  %v8198_v22 = vld [vmem:[#allocation21_spill] sm:$0xff]  ;;  %v8201_v4 = vld [vmem:[#allocation18_spill] sm:$0xff] }
 0x1e8   :  { %v2461_v56 = vpop.eup %2460  ;;  %v5915_v6 = vadd.f32 %v1698_v12, %v8198_v22  ;;  %2480 = vpow2.f32 %v5825_v11  ;;  %v8199_v60 = vld [vmem:[#allocation57_spill] sm:$0xff]  ;;  %v1703_v14 = vmul.f32 %v2459_v53, %v5443_v34  ;;  %v5927_v42 = vadd.f32 %v2457_v44, %v8201_v4  ;;  %v8202_v12 = vld [vmem:[#allocation31_spill] sm:$0xff] }
 0x1e9   :  { %v2463_v8 = vpop.eup %2462  ;;  %v5919_v59 = vadd.f32 %v2455_v23, %v8199_v60  ;;  %2482 = vpow2.f32 %v5827_v15  ;;  %v1704_v2 = vmul.f32 %v2461_v56, %v5449_v10  ;;  %v5931_v37 = vadd.f32 %v1700_v28, %v8202_v12  ;;  %v8203_v23 = vld [vmem:[#allocation11_spill] sm:$0xff]  ;;  %v8205_v44 = vld [vmem:[#allocation17_spill] sm:$0xff] }
 0x1ea   :  { %v2465_v63 = vpop.eup %2464  ;;  %2484 = vpow2.f32 %v5835_v45  ;;  %v5935_v22 = vadd.f32 %v2459_v53, %v8203_v23  ;;  %v1705_v34 = vmul.f32 %v2463_v8, %v5461_v36  ;;  %v5939_v60 = vadd.f32 %v1701_v41, %v8204_v16  ;;  %v8206_v28 = vld [vmem:[#allocation85_spill] sm:$0xff]  ;;  %v8208_v53 = vld [vmem:[#allocation38_spill] sm:$0xff]  ;;  %v8209_v41 = vld [vmem:[#allocation87_spill] sm:$0xff] }
 0x1eb   :  { %v2467_v11 = vpop.eup %2466  ;;  %2486 = vpow2.f32 %v5837_v32  ;;  %v5943_v9 = vadd.f32 %v2461_v56, %v8205_v44  ;;  %v1706_v10 = vmul.f32 %v2465_v63, %v5465_v20  ;;  %v5947_v4 = vadd.f32 %v1702_v52, %v8206_v28  ;;  %v8211_v56 = vld [vmem:[#allocation29_spill] sm:$0xff]  ;;  %v8212_v52 = vld [vmem:[#allocation63_spill] sm:$0xff] }
 0x1ec   :  { %v2469_v15 = vpop.eup %2468  ;;  %2488 = vpow2.f32 %v5839_v24  ;;  %v5951_v12 = vadd.f32 %v2463_v8, %v8208_v53  ;;  %v1707_v36 = vmul.f32 %v2467_v11, %v5473_v7  ;;  %v5955_v23 = vadd.f32 %v1703_v14, %v8209_v41  ;;  %v8214_v24 = vld [vmem:[#allocation61_spill] sm:$0xff]  ;;  %v8216_v7 = vld [vmem:[#allocation110_spill] sm:$0xff]  ;;  %v8218_v14 = vld [vmem:[#allocation44_spill] sm:$0xff] }
 0x1ed   :  { %8207 = vst [vmem:[#allocation71_spill] sm:$0xff] %v5947_v4  ;;  %v2471_v45 = vpop.eup %2470  ;;  %2490 = vpow2.f32 %v5845_v54  ;;  %v5959_v16 = vadd.f32 %v2465_v63, %v8211_v56  ;;  %v1708_v20 = vmul.f32 %v2469_v15, %v5597_v49  ;;  %v5963_v44 = vadd.f32 %v1704_v2, %v8212_v52  ;;  %v8220_v63 = vld [vmem:[#allocation34_spill] sm:$0xff]  ;;  %v8222_v49 = vld [vmem:[#allocation108_spill] sm:$0xff]  ;;  %v6095_v4 = vld [vmem:[#allocation2 + $0xba] sm:$0x3f] }
 0x1ee   :  { %8210 = vst [vmem:[#allocation10_spill] sm:$0xff] %v5955_v23  ;;  %v2473_v32 = vpop.eup %2472  ;;  %2492 = vpow2.f32 %v5847_v58  ;;  %v5967_v8 = vadd.f32 %v2467_v11, %v8214_v24  ;;  %v5970_v28 = vadd.f32 %v2469_v15, %v8216_v7  ;;  %v5973_v53 = vadd.f32 %v1705_v34, %v8218_v14  ;;  %v8223_v56 = vld [vmem:[#allocation32_spill] sm:$0xff]  ;;  %v8225_v11 = vld [vmem:[#allocation109_spill] sm:$0xff]  ;;  %8287 = vst [vmem:[#allocation34_spill] sm:$0xff] %v6095_v4 }
 0x1ef   :  { %8213 = vst [vmem:[#allocation14_spill] sm:$0xff] %v5963_v44  ;;  %v2475_v54 = vpop.eup %2474  ;;  %2494 = vpow2.f32 %v5849_v21  ;;  %v5977_v41 = vadd.f32 %v2471_v45, %v8220_v63  ;;  %v1709_v2 = vmul.f32 %v2471_v45, %v8222_v49  ;;  %v5981_v52 = vadd.f32 %v1706_v10, %v8223_v56  ;;  %v8227_v24 = vld [vmem:[#allocation64_spill] sm:$0xff]  ;;  %v8230_v63 = vld [vmem:[#allocation73_spill] sm:$0xff]  ;;  %v8231_v45 = vld [vmem:[#allocation39_spill] sm:$0xff] }
 0x1f0   :  { %8215 = vst [vmem:[#allocation70_spill] sm:$0xff] %v5967_v8  ;;  %8217 = vst [vmem:[#allocation16_spill] sm:$0xff] %v5970_v28  ;;  %v2477_v58 = vpop.eup %2476  ;;  %2496 = vpow2.f32 %v5851_v18  ;;  %v5985_v15 = vadd.f32 %v2473_v32, %v8225_v11  ;;  %v1710_v34 = vmul.f32 %v2473_v32, %v8227_v24  ;;  %v8228_v7 = vld [vmem:[#allocation24_spill] sm:$0xff]  ;;  %v5994_v49 = vadd.f32 %v1708_v20, %v8231_v45  ;;  %v8234_v56 = vld [vmem:[#allocation78_spill] sm:$0xff] }
 0x1f1   :  { %8219 = vst [vmem:[#allocation45_spill] sm:$0xff] %v5973_v53  ;;  %8221 = vst [vmem:[#allocation83_spill] sm:$0xff] %v5977_v41  ;;  %v5989_v14 = vadd.f32 %v1707_v36, %v8228_v7  ;;  %v2479_v21 = vpop.eup %2478  ;;  %2498 = vpow2.f32 %v5853_v33  ;;  %v1711_v53 = vmul.f32 %v2475_v54, %v8230_v63  ;;  %v8233_v10 = vld [vmem:[#allocation76_spill] sm:$0xff]  ;;  %v8236_v11 = vld [vmem:[#allocation54_spill] sm:$0xff]  ;;  %v8239_v7 = vsub.f32 %v5816_v3, %v7262_v17 }
 0x1f2   :  { %8224 = vst [vmem:[#allocation37_spill] sm:$0xff] %v5981_v52  ;;  %8226 = vst [vmem:[#allocation28_spill] sm:$0xff] %v5985_v15  ;;  %v8235_v52 = vsub.f32 %v8233_v10, %v8234_v56  ;;  %v2481_v44 = vpop.eup %2480  ;;  %2500 = vpow2.f32 %v5855_v25  ;;  %v8237_v32 = vld [vmem:[#allocation79_spill] sm:$0xff]  ;;  %v8240_v63 = vsub.f32 %v5818_v39, %v7452_v51  ;;  %v8245_v25 = vld [vmem:[#allocation65_spill] sm:$0xff]  ;;  %v8251_v51 = vsub.f32 %v5829_v61, %v3061_v27 }
 0x1f3   :  { %8229 = vst [vmem:[#allocation105_spill] sm:$0xff] %v5989_v14  ;;  %8232 = vst [vmem:[#allocation21_spill] sm:$0xff] %v5994_v49  ;;  %v8238_v24 = vsub.f32 %v8236_v11, %v8237_v32  ;;  %v1813_v33 = vmul.f32 1.442695, %v8239_v7  ;;  %v2483_v45 = vpop.eup %2482  ;;  %v8241_v49 = vld [vmem:[#allocation107_spill] sm:$0xff]  ;;  %v8246_v15 = vld [vmem:[#allocation82_spill] sm:$0xff] }
 0x1f4   :  { %v1809_v18 = vmul.f32 1.442695, %v8235_v52  ;;  %v1815_v20 = vmul.f32 1.442695, %v8240_v63  ;;  %v6010_v14 = vadd.f32 %v2475_v54, %v8241_v49  ;;  %v8243_v52 = vld [vmem:[#allocation27_spill] sm:$0xff]  ;;  %v8247_v32 = vsub.f32 %v8245_v25, %v8246_v15  ;;  %v2485_v41 = vpop.eup %2484  ;;  %v8248_v23 = vld [vmem:[#allocation33_spill] sm:$0xff] }
 0x1f5   :  { %v1811_v36 = vmul.f32 1.442695, %v8238_v24  ;;  %v6013_v56 = vadd.f32 %v1709_v2, %v8243_v52  ;;  %v6019_v17 = vadd.f32 %v2477_v58, %v8248_v23  ;;  %v8250_v7 = vld [vmem:[#allocation81_spill] sm:$0xff]  ;;  %v1819_v54 = vmul.f32 1.442695, %v8251_v51  ;;  %v2487_v49 = vpop.eup %2486  ;;  %v8252_v63 = vld [vmem:[#allocation19_spill] sm:$0xff] }
 0x1f6   :  { %8242 = vst [vmem:[#allocation57_spill] sm:$0xff] %v6010_v14  ;;  %2502 = vpow2.f32 %v1809_v18  ;;  %v1817_v24 = vmul.f32 1.442695, %v8247_v32  ;;  %v1712_v28 = vmul.f32 %v2477_v58, %v8250_v7  ;;  %v6026_v2 = vadd.f32 %v2479_v21, %v8252_v63  ;;  %v8254_v18 = vld [vmem:[#allocation51_spill] sm:$0xff]  ;;  %v6036_v58 = vpop.eup %2488  ;;  %v8259_v27 = vld [vmem:[#allocation106_spill] sm:$0xff]  ;;  %v8261_v63 = vld [vmem:[#allocation13_spill] sm:$0xff] }
 0x1f7   :  { %8244 = vst [vmem:[#allocation62_spill] sm:$0xff] %v6013_v56  ;;  %8249 = vst [vmem:[#allocation18_spill] sm:$0xff] %v6019_v17  ;;  %2504 = vpow2.f32 %v1811_v36  ;;  %v6029_v52 = vadd.f32 %v1710_v34, %v8254_v18  ;;  %v6031_v15 = vld [vmem:[#allocation2 + $0x9a] sm:$0x3f]  ;;  %v8257_v23 = vsub.f32 %v5831_v35, %v8175_v26  ;;  %v8258_v36 = vld [vmem:[#allocation53_spill] sm:$0xff]  ;;  %v6040_v51 = vadd.f32 %v1711_v53, %v8259_v27  ;;  %v6045_v18 = vpop.eup %2490 }
 0x1f8   :  { %8253 = vst [vmem:[#allocation31_spill] sm:$0xff] %v6026_v2  ;;  %8256 = vst [vmem:[#allocation26_spill] sm:$0xff] %v6031_v15  ;;  %2506 = vpow2.f32 %v1813_v33  ;;  %v1713_v7 = vmul.f32 %v2479_v21, %v8258_v36  ;;  %v8262_v56 = vld [vmem:[#allocation84_spill] sm:$0xff]  ;;  %v8266_v17 = vld [vmem:[#allocation9_spill] sm:$0xff]  ;;  %v8268_v21 = vsub.f32 %v5841_v47, %v7998_v30  ;;  %v6056_v36 = vpop.eup %2492 }
 0x1f9   :  { %8255 = vst [vmem:[#allocation11_spill] sm:$0xff] %v6029_v52  ;;  %v1821_v32 = vmul.f32 1.442695, %v8257_v23  ;;  %8260 = vst [vmem:[#allocation17_spill] sm:$0xff] %v6040_v51  ;;  %2508 = vpow2.f32 %v1815_v20  ;;  %v8263_v2 = vsub.f32 %v8261_v63, %v8262_v56  ;;  %v8264_v52 = vld [vmem:[#allocation111_spill] sm:$0xff]  ;;  %v1714_v26 = vmul.f32 %v2481_v44, %v8266_v17  ;;  %v6051_v23 = vld [vmem:[#allocation2 + $0xa2] sm:$0xff]  ;;  %v6066_v17 = vpop.eup %2494 }
 0x1fa   :  { %v6048_v33 = vadd.f32 %v2481_v44, %v8264_v52  ;;  %8267 = vst [vmem:[#allocation38_spill] sm:$0xff] %v6051_v23  ;;  %2510 = vpow2.f32 %v1817_v24  ;;  %v1825_v53 = vmul.f32 1.442695, %v8268_v21  ;;  %v8269_v20 = vld [vmem:[#allocation112_spill] sm:$0xff]  ;;  %v8272_v52 = vld [vmem:[#allocation86_spill] sm:$0xff]  ;;  %v8274_v24 = vld [vmem:[#allocation25_spill] sm:$0xff] }
 0x1fb   :  { %v1823_v34 = vmul.f32 1.442695, %v8263_v2  ;;  %v6059_v27 = vadd.f32 %v1712_v28, %v8269_v20  ;;  %v8271_v56 = vld [vmem:[#allocation92_spill] sm:$0xff]  ;;  %2512 = vpow2.f32 %v1819_v54  ;;  %v8273_v51 = vsub.f32 %v5843_v50, %v8272_v52  ;;  %v8276_v30 = vld [vmem:[#allocation69_spill] sm:$0xff]  ;;  %v8325_v8 = vld [vmem:[#allocation103_spill] sm:$0xff] }
 0x1fc   :  { %8265 = vst [vmem:[#allocation85_spill] sm:$0xff] %v6048_v33  ;;  %v1796_v2 = vsub.f32 %v6031_v15, %v8271_v56  ;;  %v6069_v33 = vadd.f32 %v2483_v45, %v8274_v24  ;;  %v1715_v21 = vmul.f32 %v2483_v45, %v8276_v30  ;;  %v6072_v14 = vld [vmem:[#allocation2 + $0xaa] sm:$0x3f]  ;;  %2514 = vpow2.f32 %v1821_v32  ;;  %v6077_v56 = vpop.eup %2496  ;;  %v8279_v54 = vld [vmem:[#allocation52_spill] sm:$0xff]  ;;  %v8284_v15 = vld [vmem:[#allocation35_spill] sm:$0xff] }
 0x1fd   :  { %8270 = vst [vmem:[#allocation87_spill] sm:$0xff] %v6059_v27  ;;  %v1827_v44 = vmul.f32 1.442695, %v8273_v51  ;;  %8277 = vst [vmem:[#allocation63_spill] sm:$0xff] %v6072_v14  ;;  %v8278_v28 = vsub.f32 %v5857_v19, %v8002_v48  ;;  %v6080_v27 = vadd.f32 %v1713_v7, %v8279_v54  ;;  %v6082_v51 = vld [vmem:[#allocation2 + $0xb2] sm:$0xff]  ;;  %v8282_v52 = vld [vmem:[#allocation93_spill] sm:$0xff]  ;;  %2516 = vpow2.f32 %v1823_v34  ;;  %v6089_v32 = vpop.eup %2498 }
 0x1fe   :  { %8275 = vst [vmem:[#allocation29_spill] sm:$0xff] %v6069_v33  ;;  %8281 = vst [vmem:[#allocation110_spill] sm:$0xff] %v6082_v51  ;;  %v1797_v24 = vsub.f32 %v6051_v23, %v8282_v52  ;;  %v8283_v45 = vsub.f32 %v5859_v40, %v8088_v13  ;;  %v6092_v48 = vadd.f32 %v2485_v41, %v8284_v15  ;;  %2518 = vpow2.f32 %v1825_v53  ;;  %v6100_v52 = vpop.eup %2500  ;;  %v8289_v34 = vld [vmem:[#allocation49_spill] sm:$0xff]  ;;  %v8294_v23 = vld [vmem:[#allocation75_spill] sm:$0xff] }
 0x1ff   :  { %v1829_v20 = vmul.f32 1.442695, %v8278_v28  ;;  %8280 = vst [vmem:[#allocation61_spill] sm:$0xff] %v6080_v27  ;;  %v8286_v28 = vld [vmem:[#allocation58_spill] sm:$0xff]  ;;  %v8288_v7 = vsub.f32 %v5867_v0, %v8095_v62  ;;  %v6103_v27 = vadd.f32 %v1714_v26, %v8289_v34  ;;  %v6105_v13 = vld [vmem:[#allocation2 + $0xc2] sm:$0xff]  ;;  %2520 = vpow2.f32 %v1827_v44 }
 0x200   :  { %v1831_v30 = vmul.f32 1.442695, %v8283_v45  ;;  %8285 = vst [vmem:[#allocation44_spill] sm:$0xff] %v6092_v48  ;;  %v1716_v33 = vmul.f32 %v2485_v41, %v8286_v28  ;;  %8291 = vst [vmem:[#allocation32_spill] sm:$0xff] %v6105_v13  ;;  %v8292_v45 = vld [vmem:[#allocation94_spill] sm:$0xff]  ;;  %v8293_v41 = vsub.f32 %v5869_v46, %v8103_v55  ;;  %v6112_v53 = vpop.eup %2502  ;;  %v6115_v62 = vadd.f32 %v2487_v49, %v8294_v23  ;;  %v8297_v48 = vld [vmem:[#allocation95_spill] sm:$0xff] }
 0x201   :  { %v1833_v54 = vmul.f32 1.442695, %v8288_v7  ;;  %8290 = vst [vmem:[#allocation108_spill] sm:$0xff] %v6103_v27  ;;  %v1798_v15 = vsub.f32 %v6072_v14, %v8292_v45  ;;  %v6117_v7 = vld [vmem:[#allocation2 + $0xca] sm:$0x3f]  ;;  %v1799_v26 = vsub.f32 %v6082_v51, %v8297_v48  ;;  %2522 = vpow2.f32 %v1829_v20  ;;  %v6124_v44 = vpop.eup %2504  ;;  %v8299_v27 = vld [vmem:[#allocation55_spill] sm:$0xff] }
 0x202   :  { %v1835_v28 = vmul.f32 1.442695, %v8293_v41  ;;  %8295 = vst [vmem:[#allocation109_spill] sm:$0xff] %v6115_v62  ;;  %8296 = vst [vmem:[#allocation64_spill] sm:$0xff] %v6117_v7  ;;  %v8298_v34 = vsub.f32 %v5878_v1, %v8109_v31  ;;  %v1717_v55 = vmul.f32 %v2487_v49, %v8299_v27  ;;  %v6127_v41 = vld [vmem:[#allocation2 + $0xd2] sm:$0xff]  ;;  %v8301_v14 = vld [vmem:[#allocation96_spill] sm:$0xff]  ;;  %2524 = vpow2.f32 %v1831_v30  ;;  %v6131_v46 = vpop.eup %2506 }
 0x203   :  { %8300 = vst [vmem:[#allocation24_spill] sm:$0xff] %v6127_v41  ;;  %v1800_v23 = vsub.f32 %v6095_v4, %v8301_v14  ;;  %v1839_v62 = vmul.f32 1.442695, %v1796_v2  ;;  %v8302_v0 = vld [vmem:[#allocation42_spill] sm:$0xff]  ;;  %v6136_v20 = vld [vmem:[#allocation2 + $0xda] sm:$0x3f]  ;;  %2526 = vpow2.f32 %v1833_v54  ;;  %v6140_v49 = vpop.eup %2508 }
 0x204   :  { %v1837_v45 = vmul.f32 1.442695, %v8298_v34  ;;  %v6134_v48 = vadd.f32 %v1715_v21, %v8302_v0  ;;  %8304 = vst [vmem:[#allocation39_spill] sm:$0xff] %v6136_v20  ;;  %v8305_v31 = vld [vmem:[#allocation97_spill] sm:$0xff]  ;;  %v1841_v51 = vmul.f32 1.442695, %v1797_v24  ;;  %2528 = vpow2.f32 %v1835_v28  ;;  %v6150_v21 = vpop.eup %2510 }
 0x205   :  { %v1801_v34 = vsub.f32 %v6105_v13, %v8305_v31  ;;  %v8306_v27 = vld [vmem:[#allocation41_spill] sm:$0xff]  ;;  %v8309_v2 = vld [vmem:[#allocation98_spill] sm:$0xff]  ;;  %v1843_v0 = vmul.f32 1.442695, %v1798_v15  ;;  %v8312_v24 = vld [vmem:[#allocation99_spill] sm:$0xff]  ;;  %v6158_v4 = vpop.eup %2512 }
 0x206   :  { %8303 = vst [vmem:[#allocation73_spill] sm:$0xff] %v6134_v48  ;;  %v6144_v1 = vadd.f32 %v6036_v58, %v8306_v27  ;;  %v6146_v14 = vld [vmem:[#allocation2 + $0xe2] sm:$0xff]  ;;  %v1802_v30 = vsub.f32 %v6117_v7, %v8309_v2  ;;  %v6154_v54 = vld [vmem:[#allocation2 + $0xea] sm:$0x3f]  ;;  %v1803_v13 = vsub.f32 %v6127_v41, %v8312_v24  ;;  %2530 = vpow2.f32 %v1837_v45  ;;  %v6163_v2 = vld [vmem:[#allocation2 + $0xf2] sm:$0xff] }
 0x207   :  { %8308 = vst [vmem:[#allocation78_spill] sm:$0xff] %v6146_v14  ;;  %v8310_v48 = vld [vmem:[#allocation72_spill] sm:$0xff]  ;;  %8311 = vst [vmem:[#allocation54_spill] sm:$0xff] %v6154_v54  ;;  %v1845_v27 = vmul.f32 1.442695, %v1799_v26  ;;  %2532 = vpow2.f32 %v1839_v62  ;;  %v8320_v26 = vld [vmem:[#allocation101_spill] sm:$0xff] }
 0x208   :  { %8307 = vst [vmem:[#allocation76_spill] sm:$0xff] %v6144_v1  ;;  %v1718_v31 = vmul.f32 %v6036_v58, %v8310_v48  ;;  %v8313_v1 = vld [vmem:[#allocation43_spill] sm:$0xff]  ;;  %8315 = vst [vmem:[#allocation107_spill] sm:$0xff] %v6163_v2  ;;  %v8316_v15 = vld [vmem:[#allocation100_spill] sm:$0xff]  ;;  %v1847_v7 = vmul.f32 1.442695, %v1800_v23  ;;  %v6167_v58 = vpop.eup %2514  ;;  %v1805_v24 = vsub.f32 %v6146_v14, %v8320_v26  ;;  %2534 = vpow2.f32 %v1841_v51 }
 0x209   :  { %v6161_v40 = vadd.f32 %v1716_v33, %v8313_v1  ;;  %v1804_v28 = vsub.f32 %v6136_v20, %v8316_v15  ;;  %v8317_v48 = vld [vmem:[#allocation74_spill] sm:$0xff]  ;;  %v6173_v45 = vld [vmem:[#allocation2 + $0xfa] sm:$0x3f]  ;;  %v1849_v1 = vmul.f32 1.442695, %v1801_v34  ;;  %v6177_v33 = vpop.eup %2516  ;;  %2536 = vpow2.f32 %v1843_v0  ;;  %v8326_v14 = vld [vmem:[#allocation80_spill] sm:$0xff] }
 0x20a   :  { %v6171_v19 = vadd.f32 %v6045_v18, %v8317_v48  ;;  %8319 = vst [vmem:[#allocation65_spill] sm:$0xff] %v6173_v45  ;;  %v8322_v62 = vld [vmem:[#allocation102_spill] sm:$0xff]  ;;  %v1851_v20 = vmul.f32 1.442695, %v1802_v30  ;;  %v6183_v41 = vpop.eup %2518  ;;  %v8323_v48 = vld [vmem:[#allocation56_spill] sm:$0xff]  ;;  %v1807_v26 = vsub.f32 %v6163_v2, %v8325_v8  ;;  %2538 = vpow2.f32 %v1845_v27  ;;  %v8331_v2 = vld [vmem:[#allocation15_spill] sm:$0xff] }
 0x20b   :  { %8314 = vst [vmem:[#allocation79_spill] sm:$0xff] %v6161_v40  ;;  %v8321_v40 = vld [vmem:[#allocation40_spill] sm:$0xff]  ;;  %v1806_v23 = vsub.f32 %v6154_v54, %v8322_v62  ;;  %v1853_v51 = vmul.f32 1.442695, %v1803_v13  ;;  %v6190_v34 = vpop.eup %2520  ;;  %2540 = vpow2.f32 %v1847_v7  ;;  %v1855_v30 = vmul.f32 1.442695, %v1804_v28 }
 0x20c   :  { %8318 = vst [vmem:[#allocation27_spill] sm:$0xff] %v6171_v19  ;;  %v1719_v15 = vmul.f32 %v6045_v18, %v8321_v40  ;;  %v6186_v19 = vadd.f32 %v1717_v55, %v8323_v48  ;;  %v1720_v40 = vmul.f32 %v6056_v36, %v8326_v14  ;;  %v8327_v18 = vld [vmem:[#allocation8_spill] sm:$0xff]  ;;  %v6196_v0 = vpop.eup %2522  ;;  %v8328_v54 = vld [vmem:[#allocation47_spill] sm:$0xff]  ;;  %2542 = vpow2.f32 %v1849_v1 }
 0x20d   :  { %v1808_v62 = vsub.f32 %v6173_v45, %v8327_v18  ;;  %v6200_v55 = vadd.f32 %v6056_v36, %v8328_v54  ;;  %v8329_v48 = vld [vmem:[#allocation104_spill] sm:$0xff]  ;;  %v1857_v13 = vmul.f32 1.442695, %v1805_v24  ;;  %v6205_v27 = vpop.eup %2524  ;;  %v6209_v14 = vadd.f32 %v6066_v17, %v8331_v2  ;;  %v8332_v18 = vld [vmem:[#allocation46_spill] sm:$0xff] }
 0x20e   :  { %8324 = vst [vmem:[#allocation82_spill] sm:$0xff] %v6186_v19  ;;  %v6203_v8 = vadd.f32 %v1718_v31, %v8329_v48  ;;  %v1721_v7 = vmul.f32 %v6066_v17, %v8332_v18  ;;  %2544 = vpow2.f32 %v1851_v20  ;;  %v1859_v28 = vmul.f32 1.442695, %v1806_v23  ;;  %v6213_v45 = vpop.eup %2526  ;;  %v8333_v36 = vld [vmem:[#allocation88_spill] sm:$0xff]  ;;  %v8335_v2 = vld [vmem:[#allocation30_spill] sm:$0xff] }
 0x20f   :  { %v6217_v54 = vadd.f32 %v6077_v56, %v8333_v36  ;;  %v8334_v31 = vld [vmem:[#allocation48_spill] sm:$0xff]  ;;  %2546 = vpow2.f32 %v1853_v51  ;;  %v1861_v24 = vmul.f32 1.442695, %v1807_v26  ;;  %v6222_v48 = vpop.eup %2528  ;;  %v1863_v23 = vmul.f32 1.442695, %v1808_v62  ;;  %v8337_v36 = vld [vmem:[#allocation89_spill] sm:$0xff] }
 0x210   :  { %8330 = vst [vmem:[#allocation33_spill] sm:$0xff] %v6203_v8  ;;  %v6220_v1 = vadd.f32 %v1719_v15, %v8334_v31  ;;  %v6226_v8 = vmul.f32 %v6077_v56, %v8335_v2  ;;  %v8336_v17 = vld [vmem:[#allocation12_spill] sm:$0xff]  ;;  %2548 = vpow2.f32 %v1855_v30  ;;  %v6231_v18 = vpop.eup %2530  ;;  %v6235_v19 = vadd.f32 %v6089_v32, %v8337_v36  ;;  %v8338_v51 = vld [vmem:[#allocation77_spill] sm:$0xff]  ;;  %v8339_v62 = vld [vmem:[#allocation66_spill] sm:$0xff] }
 0x211   :  { %v6229_v20 = vadd.f32 %v1720_v40, %v8336_v17  ;;  %2550 = vpow2.f32 %v1857_v13  ;;  %v1865_v15 = vadd.f32 %v6112_v53, %v5890_v43  ;;  %v1893_v26 = vmul.f32 %v6112_v53, %v8233_v10  ;;  %v6241_v56 = vpop.eup %2532  ;;  %v8340_v2 = vld [vmem:[#allocation59_spill] sm:$0xff] }
 0x212   :  { %v6245_v40 = vmul.f32 %v6089_v32, %v8338_v51  ;;  %2552 = vpow2.f32 %v1859_v28  ;;  %v1866_v30 = vadd.f32 %v6124_v44, %v8339_v62  ;;  %v1894_v31 = vmul.f32 %v6124_v44, %v8236_v11  ;;  %v6251_v13 = vpop.eup %2534  ;;  %v8341_v28 = vld [vmem:[#allocation90_spill] sm:$0xff] }
 0x213   :  { %v6254_v43 = vadd.f32 %v1721_v7, %v8340_v2  ;;  %2554 = vpow2.f32 %v1861_v24  ;;  %v1867_v10 = vadd.f32 %v6131_v46, %v5904_v38  ;;  %v1895_v32 = vmul.f32 %v6131_v46, %v5816_v3  ;;  %v6260_v53 = vpop.eup %2536  ;;  %v8342_v24 = vld [vmem:[#allocation60_spill] sm:$0xff]  ;;  %v8349_v2 = vld [vmem:[#allocation83_spill] sm:$0xff] }
 0x214   :  { %v6264_v17 = vadd.f32 %v6100_v52, %v8341_v28  ;;  %2556 = vpow2.f32 %v1863_v23  ;;  %v1868_v11 = vadd.f32 %v6140_v49, %v5911_v5  ;;  %v1896_v44 = vmul.f32 %v6140_v49, %v5818_v39  ;;  %v6270_v7 = vpop.eup %2538  ;;  %v8351_v28 = vld [vmem:[#allocation45_spill] sm:$0xff] }
 0x215   :  { %v6274_v38 = vmul.f32 %v6100_v52, %v8342_v24  ;;  %v1869_v3 = vadd.f32 %v6150_v21, %v5919_v59  ;;  %v1921_v46 = vadd.f32 %v1893_v26, %v5908_v57  ;;  %2558 = vrcp.f32 %v1865_v15  ;;  %v6279_v36 = vpop.eup %2540  ;;  %v8352_v24 = vld [vmem:[#allocation28_spill] sm:$0xff] }
 0x216   :  { %v1870_v5 = vadd.f32 %v6158_v4, %v5927_v42  ;;  %v1897_v39 = vmul.f32 %v6150_v21, %v8245_v25  ;;  %v1922_v49 = vadd.f32 %v1894_v31, %v5915_v6  ;;  %2560 = vrcp.f32 %v1866_v30  ;;  %v6286_v23 = vpop.eup %2542 }
 0x217   :  { %v1871_v52 = vadd.f32 %v6167_v58, %v5935_v22  ;;  %v1898_v57 = vmul.f32 %v6158_v4, %v5829_v61  ;;  %v1923_v59 = vadd.f32 %v1895_v32, %v5923_v29  ;;  %2562 = vrcp.f32 %v1867_v10 }
 0x218   :  { %v6293_v15 = vpop.eup %2544  ;;  %v1872_v42 = vadd.f32 %v6177_v33, %v5943_v9  ;;  %v1899_v6 = vmul.f32 %v6167_v58, %v5831_v35  ;;  %v1924_v25 = vadd.f32 %v1896_v44, %v5931_v37  ;;  %2564 = vrcp.f32 %v1868_v11 }
 0x219   :  { %v6300_v21 = vpop.eup %2546  ;;  %v1873_v22 = vadd.f32 %v6183_v41, %v5951_v12  ;;  %v1900_v61 = vmul.f32 %v6177_v33, %v8261_v63  ;;  %v1901_v29 = vmul.f32 %v6183_v41, %v5841_v47  ;;  %2566 = vrcp.f32 %v1869_v3  ;;  %v8343_v12 = vld [vmem:[#allocation70_spill] sm:$0xff]  ;;  %v8344_v33 = vld [vmem:[#allocation36_spill] sm:$0xff]  ;;  %v8345_v41 = vld [vmem:[#allocation71_spill] sm:$0xff] }
 0x21a   :  { %v6308_v4 = vpop.eup %2548  ;;  %v1874_v35 = vadd.f32 %v6190_v34, %v5959_v16  ;;  %v1902_v37 = vmul.f32 %v6190_v34, %v5843_v50  ;;  %v1925_v9 = vadd.f32 %v1897_v39, %v5939_v60  ;;  %2568 = vrcp.f32 %v1870_v5  ;;  %v8346_v16 = vld [vmem:[#allocation16_spill] sm:$0xff]  ;;  %v8348_v34 = vld [vmem:[#allocation10_spill] sm:$0xff]  ;;  %v8354_v39 = vld [vmem:[#allocation37_spill] sm:$0xff] }
 0x21b   :  { %v6315_v58 = vpop.eup %2550  ;;  %v1875_v63 = vadd.f32 %v6196_v0, %v8343_v12  ;;  %v1903_v47 = vmul.f32 %v6196_v0, %v8344_v33  ;;  %v1926_v26 = vadd.f32 %v1898_v57, %v8345_v41  ;;  %2570 = vrcp.f32 %v1871_v52  ;;  %v8347_v50 = vld [vmem:[#allocation20_spill] sm:$0xff]  ;;  %v8350_v0 = vld [vmem:[#allocation14_spill] sm:$0xff]  ;;  %v8356_v12 = vld [vmem:[#allocation67_spill] sm:$0xff] }
 0x21c   :  { %v6322_v51 = vpop.eup %2552  ;;  %v1876_v62 = vadd.f32 %v6205_v27, %v8346_v16  ;;  %v1904_v60 = vmul.f32 %v6205_v27, %v8347_v50  ;;  %v1927_v30 = vadd.f32 %v1899_v6, %v8348_v34  ;;  %2572 = vrcp.f32 %v1872_v42  ;;  %v8353_v5 = vld [vmem:[#allocation50_spill] sm:$0xff]  ;;  %v8355_v42 = vld [vmem:[#allocation57_spill] sm:$0xff]  ;;  %v8360_v34 = vld [vmem:[#allocation31_spill] sm:$0xff] }
 0x21d   :  { %v6329_v31 = vpop.eup %2554  ;;  %v1877_v10 = vadd.f32 %v6213_v45, %v8349_v2  ;;  %v1928_v32 = vadd.f32 %v1900_v61, %v8350_v0  ;;  %v1929_v11 = vadd.f32 %v1901_v29, %v8351_v28  ;;  %2574 = vrcp.f32 %v1873_v22  ;;  %v8357_v29 = vld [vmem:[#allocation105_spill] sm:$0xff]  ;;  %v8358_v41 = vld [vmem:[#allocation18_spill] sm:$0xff]  ;;  %v8361_v0 = vld [vmem:[#allocation68_spill] sm:$0xff] }
 0x21e   :  { %v6335_v44 = vpop.eup %2556  ;;  %v1878_v3 = vadd.f32 %v6222_v48, %v8352_v24  ;;  %v1905_v27 = vmul.f32 %v6213_v45, %v8353_v5  ;;  %v1930_v52 = vadd.f32 %v1902_v37, %v8354_v39  ;;  %2576 = vrcp.f32 %v1874_v35  ;;  %v8359_v50 = vld [vmem:[#allocation21_spill] sm:$0xff]  ;;  %v8363_v5 = vld [vmem:[#allocation62_spill] sm:$0xff] }
 0x21f   :  { %v2559_v57 = vpop.eup %2558  ;;  %v1879_v6 = vadd.f32 %v6231_v18, %v8355_v42  ;;  %v1906_v61 = vmul.f32 %v6222_v48, %v8356_v12  ;;  %v6347_v22 = vadd.f32 %v1903_v47, %v8357_v29  ;;  %2578 = vrcp.f32 %v1875_v63  ;;  %v8362_v63 = vld [vmem:[#allocation85_spill] sm:$0xff] }
 0x220   :  { %v2561_v33 = vpop.eup %2560  ;;  %v1880_v16 = vadd.f32 %v6241_v56, %v8358_v41  ;;  %v6352_v45 = vadd.f32 %v1904_v60, %v8359_v50  ;;  %v1950_v37 = vmul.f32 %v2559_v57, %v1921_v46  ;;  %2580 = vrcp.f32 %v1876_v62  ;;  %v8364_v62 = vld [vmem:[#allocation29_spill] sm:$0xff]  ;;  %v8365_v57 = vld [vmem:[#allocation26_spill] sm:$0xff] }
 0x221   :  { %v2563_v35 = vpop.eup %2562  ;;  %v1881_v2 = vadd.f32 %v6251_v13, %v8360_v34  ;;  %v1907_v48 = vmul.f32 %v6231_v18, %v8361_v0  ;;  %v1952_v28 = vmul.f32 %v2561_v33, %v1922_v49  ;;  %2582 = vrcp.f32 %v1877_v10  ;;  %v8366_v49 = vld [vmem:[#allocation44_spill] sm:$0xff]  ;;  %v8367_v33 = vld [vmem:[#allocation11_spill] sm:$0xff]  ;;  %v8371_v0 = vld [vmem:[#allocation17_spill] sm:$0xff] }
 0x222   :  { %v2565_v47 = vpop.eup %2564  ;;  %v1882_v24 = vadd.f32 %v6260_v53, %v8362_v63  ;;  %v1933_v39 = vadd.f32 %v1905_v27, %v8363_v5  ;;  %v1954_v42 = vmul.f32 %v2563_v35, %v1923_v59  ;;  %2584 = vrcp.f32 %v1878_v3  ;;  %2005 = vst [vmem:[#allocation5] sm:$0xff] %v1950_v37  ;;  %v8368_v3 = vld [vmem:[#allocation109_spill] sm:$0xff]  ;;  %v8369_v37 = vld [vmem:[#allocation38_spill] sm:$0xff]  ;;  %v8373_v63 = vld [vmem:[#allocation63_spill] sm:$0xff] }
 0x223   :  { %v2567_v46 = vpop.eup %2566  ;;  %v1883_v60 = vadd.f32 %v6270_v7, %v8364_v62  ;;  %v1908_v12 = vmul.f32 %v6241_v56, %v8365_v57  ;;  %v1956_v29 = vmul.f32 %v2565_v47, %v1924_v25  ;;  %2586 = vrcp.f32 %v1879_v6  ;;  %2006 = vst [vmem:[#allocation5 + $0x8] sm:$0x3f] %v1952_v28  ;;  %v8370_v6 = vld [vmem:[#allocation76_spill] sm:$0xff]  ;;  %v8375_v62 = vld [vmem:[#allocation110_spill] sm:$0xff] }
 0x224   :  { %v2569_v18 = vpop.eup %2568  ;;  %v1884_v10 = vadd.f32 %v6279_v36, %v8366_v49  ;;  %v1934_v41 = vadd.f32 %v1906_v61, %v8367_v33  ;;  %v1958_v27 = vmul.f32 %v2567_v46, %v1925_v9  ;;  %2588 = vrcp.f32 %v1880_v16  ;;  %2007 = vst [vmem:[#allocation5 + $0x10] sm:$0xff] %v1954_v42  ;;  %v8372_v16 = vld [vmem:[#allocation27_spill] sm:$0xff] }
 0x225   :  { %v2571_v59 = vpop.eup %2570  ;;  %v1885_v50 = vadd.f32 %v6286_v23, %v8368_v3  ;;  %v1909_v35 = vmul.f32 %v6251_v13, %v8369_v37  ;;  %v1960_v56 = vmul.f32 %v2569_v18, %v1926_v26  ;;  %2590 = vrcp.f32 %v1881_v2  ;;  %2008 = vst [vmem:[#allocation5 + $0x18] sm:$0x3f] %v1956_v29  ;;  %v8374_v42 = vld [vmem:[#allocation87_spill] sm:$0xff]  ;;  %v8377_v18 = vld [vmem:[#allocation34_spill] sm:$0xff]  ;;  %v8380_v3 = vld [vmem:[#allocation108_spill] sm:$0xff] }
 0x226   :  { %v2573_v25 = vpop.eup %2572  ;;  %v1886_v34 = vadd.f32 %v6293_v15, %v8370_v6  ;;  %v1935_v28 = vadd.f32 %v1907_v48, %v8371_v0  ;;  %v1962_v61 = vmul.f32 %v2571_v59, %v1927_v30  ;;  %2592 = vrcp.f32 %v1882_v24  ;;  %2009 = vst [vmem:[#allocation5 + $0x20] sm:$0xff] %v1958_v27  ;;  %v8379_v59 = vld [vmem:[#allocation64_spill] sm:$0xff] }
 0x227   :  { %v2575_v9 = vpop.eup %2574  ;;  %v1887_v47 = vadd.f32 %v6300_v21, %v8372_v16  ;;  %v1910_v5 = vmul.f32 %v6260_v53, %v8373_v63  ;;  %v1964_v13 = vmul.f32 %v2573_v25, %v1928_v32  ;;  %2594 = vrcp.f32 %v1883_v60  ;;  %2010 = vst [vmem:[#allocation5 + $0x28] sm:$0x3f] %v1960_v56  ;;  %v8381_v37 = vld [vmem:[#allocation24_spill] sm:$0xff]  ;;  %v8386_v16 = vld [vmem:[#allocation82_spill] sm:$0xff] }
 0x228   :  { %v2577_v26 = vpop.eup %2576  ;;  %v1888_v2 = vadd.f32 %v6308_v4, %v6200_v55  ;;  %v1936_v46 = vadd.f32 %v1908_v12, %v8374_v42  ;;  %v1966_v48 = vmul.f32 %v2575_v9, %v1929_v11  ;;  %2596 = vrcp.f32 %v1884_v10  ;;  %2011 = vst [vmem:[#allocation5 + $0x30] sm:$0xff] %v1962_v61  ;;  %v8376_v55 = vld [vmem:[#allocation61_spill] sm:$0xff]  ;;  %v8378_v10 = vld [vmem:[#allocation32_spill] sm:$0xff]  ;;  %v8385_v61 = vld [vmem:[#allocation78_spill] sm:$0xff] }
 0x229   :  { %v2579_v30 = vpop.eup %2578  ;;  %v1889_v24 = vadd.f32 %v6315_v58, %v6209_v14  ;;  %v1911_v57 = vmul.f32 %v6270_v7, %v8375_v62  ;;  %v1968_v53 = vmul.f32 %v2577_v26, %v1930_v52  ;;  %2598 = vrcp.f32 %v1885_v50  ;;  %2012 = vst [vmem:[#allocation5 + $0x38] sm:$0x3f] %v1964_v13  ;;  %v8387_v63 = vld [vmem:[#allocation22_spill] sm:$0xff]  ;;  %v8389_v26 = vld [vmem:[#allocation33_spill] sm:$0xff] }
 0x22a   :  { %v2581_v32 = vpop.eup %2580  ;;  %v1890_v60 = vadd.f32 %v6322_v51, %v6217_v54  ;;  %v1937_v29 = vadd.f32 %v1909_v35, %v8376_v55  ;;  %v1970_v11 = vmul.f32 %v2579_v30, %v6347_v22  ;;  %2600 = vrcp.f32 %v1886_v34  ;;  %2013 = vst [vmem:[#allocation5 + $0x40] sm:$0xff] %v1966_v48  ;;  %v8384_v34 = vld [vmem:[#allocation79_spill] sm:$0xff]  ;;  %v8388_v13 = vld [vmem:[#allocation54_spill] sm:$0xff] }
 0x22b   :  { %v2583_v12 = vpop.eup %2582  ;;  %v1891_v14 = vadd.f32 %v6329_v31, %v6235_v19  ;;  %v1912_v7 = vmul.f32 %v6279_v36, %v8377_v18  ;;  %v1972_v52 = vmul.f32 %v2581_v32, %v6352_v45  ;;  %2602 = vrcp.f32 %v1887_v47  ;;  %2014 = vst [vmem:[#allocation5 + $0x48] sm:$0x3f] %v1968_v53  ;;  %v8390_v48 = vld [vmem:[#allocation91_spill] sm:$0xff] }
 0x22c   :  { %v2585_v49 = vpop.eup %2584  ;;  %v1892_v54 = vadd.f32 %v6335_v44, %v6264_v17  ;;  %v1913_v22 = vmul.f32 %v6286_v23, %v8378_v10  ;;  %v1974_v33 = vmul.f32 %v2583_v12, %v1933_v39  ;;  %2604 = vrcp.f32 %v1888_v2  ;;  %2015 = vst [vmem:[#allocation5 + $0x50] sm:$0xff] %v1970_v11  ;;  %v8382_v17 = vld [vmem:[#allocation73_spill] sm:$0xff]  ;;  %v8383_v39 = vld [vmem:[#allocation39_spill] sm:$0xff] }
 0x22d   :  { %v2587_v27 = vpop.eup %2586  ;;  %v1914_v19 = vmul.f32 %v6293_v15, %v8379_v59  ;;  %v1938_v36 = vadd.f32 %v1910_v5, %v8380_v3  ;;  %v1976_v50 = vmul.f32 %v2585_v49, %v1934_v41  ;;  %2606 = vrcp.f32 %v1889_v24  ;;  %2016 = vst [vmem:[#allocation5 + $0x58] sm:$0x3f] %v1972_v52  ;;  %v8391_v30 = vld [vmem:[#allocation107_spill] sm:$0xff] }
 0x22e   :  { %v2589_v45 = vpop.eup %2588  ;;  %v1915_v35 = vmul.f32 %v6300_v21, %v8381_v37  ;;  %v1939_v56 = vadd.f32 %v1911_v57, %v8382_v17  ;;  %v1978_v25 = vmul.f32 %v2587_v27, %v1935_v28  ;;  %2608 = vrcp.f32 %v1890_v60  ;;  %2017 = vst [vmem:[#allocation5 + $0x60] sm:$0xff] %v1974_v33 }
 0x22f   :  { %v2591_v23 = vpop.eup %2590  ;;  %v1916_v6 = vmul.f32 %v6308_v4, %v8383_v39  ;;  %v1940_v15 = vadd.f32 %v1912_v7, %v8384_v34  ;;  %v1980_v0 = vmul.f32 %v2589_v45, %v1936_v46  ;;  %2610 = vrcp.f32 %v1891_v14  ;;  %2018 = vst [vmem:[#allocation5 + $0x68] sm:$0x3f] %v1976_v50 }
 0x230   :  { %v2593_v41 = vpop.eup %2592  ;;  %v1917_v9 = vmul.f32 %v6315_v58, %v8385_v61  ;;  %v1941_v21 = vadd.f32 %v1913_v22, %v8386_v16  ;;  %v1982_v47 = vmul.f32 %v2591_v23, %v1937_v29  ;;  %2612 = vrcp.f32 %v1892_v54  ;;  %2019 = vst [vmem:[#allocation5 + $0x70] sm:$0xff] %v1978_v25 }
 0x231   :  { %v2595_v28 = vpop.eup %2594  ;;  %v1750_v5 = vadd.f32 %v6226_v8, %v8387_v63  ;;  %v1918_v4 = vmul.f32 %v6322_v51, %v8388_v13  ;;  %v1942_v2 = vadd.f32 %v1914_v19, %v8389_v26  ;;  %v1984_v42 = vmul.f32 %v2593_v41, %v1938_v36  ;;  %2020 = vst [vmem:[#allocation5 + $0x78] sm:$0x3f] %v1980_v0  ;;  %v8392_v8 = vld [vmem:[#allocation23_spill] sm:$0xff]  ;;  %v8393_v51 = vld [vmem:[#allocation65_spill] sm:$0xff] }
 0x232   :  { %v2597_v46 = vpop.eup %2596  ;;  %v1751_v58 = vadd.f32 %v6245_v40, %v8390_v48  ;;  %v1919_v24 = vmul.f32 %v6329_v31, %v8391_v30  ;;  %v1943_v62 = vadd.f32 %v1915_v35, %v6220_v1  ;;  %v1986_v57 = vmul.f32 %v2595_v28, %v1939_v56  ;;  %2021 = vst [vmem:[#allocation5 + $0x80] sm:$0xff] %v1982_v47 }
 0x233   :  { %v2599_v53 = vpop.eup %2598  ;;  %v1752_v32 = vadd.f32 %v6274_v38, %v8392_v8  ;;  %v1920_v60 = vmul.f32 %v6335_v44, %v8393_v51  ;;  %v1944_v55 = vadd.f32 %v1916_v6, %v6229_v20  ;;  %v1988_v29 = vmul.f32 %v2597_v46, %v1940_v15  ;;  %2022 = vst [vmem:[#allocation5 + $0x88] sm:$0x3f] %v1984_v42 }
 0x234   :  { %v2601_v11 = vpop.eup %2600  ;;  %v1945_v40 = vadd.f32 %v1917_v9, %v6254_v43  ;;  %v1990_v12 = vmul.f32 %v2599_v53, %v1941_v21  ;;  %2023 = vst [vmem:[#allocation5 + $0x90] sm:$0xff] %v1986_v57  ;;  %v1946_v1 = vadd.f32 %v1918_v4, %v1750_v5  ;;  %v1947_v7 = vadd.f32 %v1919_v24, %v1751_v58 }
 0x235   :  { %v2603_v31 = vpop.eup %2602  ;;  %v1992_v14 = vmul.f32 %v2601_v11, %v1942_v2  ;;  %2024 = vst [vmem:[#allocation5 + $0x98] sm:$0x3f] %v1988_v29  ;;  %v1948_v49 = vadd.f32 %v1920_v60, %v1752_v32 }
 0x236   :  { %v2605_v18 = vpop.eup %2604  ;;  %v1994_v52 = vmul.f32 %v2603_v31, %v1943_v62  ;;  %2025 = vst [vmem:[#allocation5 + $0xa0] sm:$0xff] %v1990_v12 }
 0x237   :  { %v2607_v38 = vpop.eup %2606  ;;  %v1996_v44 = vmul.f32 %v2605_v18, %v1944_v55  ;;  %2026 = vst [vmem:[#allocation5 + $0xa8] sm:$0x3f] %v1992_v14 }
 0x238   :  { %v2609_v20 = vpop.eup %2608  ;;  %v1998_v54 = vmul.f32 %v2607_v38, %v1945_v40  ;;  %2027 = vst [vmem:[#allocation5 + $0xb0] sm:$0xff] %v1994_v52 }
 0x239   :  { %v2611_v43 = vpop.eup %2610  ;;  %v2000_v10 = vmul.f32 %v2609_v20, %v1946_v1  ;;  %2028 = vst [vmem:[#allocation5 + $0xb8] sm:$0x3f] %v1996_v44 }
 0x23a   :  { %v2613_v22 = vpop.eup %2612  ;;  %v2002_v33 = vmul.f32 %v2611_v43, %v1947_v7  ;;  %2029 = vst [vmem:[#allocation5 + $0xc0] sm:$0xff] %v1998_v54 }
 0x23b   :  { %v2004_v27 = vmul.f32 %v2613_v22, %v1948_v49  ;;  %2030 = vst [vmem:[#allocation5 + $0xc8] sm:$0x3f] %v2000_v10 }
 0x23c   :  { %2031 = vst [vmem:[#allocation5 + $0xd0] sm:$0xff] %v2002_v33 }
 0x23d   :  { %2032 = vst [vmem:[#allocation5 + $0xd8] sm:$0x3f] %v2004_v27 }
 0x23e   :  { %2665 = shalt.err (!%p2662_p12)
}
 0x23f   :  { %s2666_s24 = scalar_lea.hbm %s6443_s1, 3584 }
 0x240   :  { %p2667_p13 = scmp.ne.s32.totalorder %s6443_s1, %s2666_s24  ;;  %p2670_p0 = scmp.lt.u32.totalorder %s2666_s24, %s6443_s1 }
 0x242   :  { %p2672_p1 = pnand %p2670_p0, %p2667_p13 }
 0x244   :  { %2675 = shalt.err (!%p2672_p1)
}
 0x245   :  { %2044 = dma.vmem_to_hbm [thread:$0]  %s2039_s20, 3584, %s6443_s1, [#allocation4], %s2681_s16, %s2681_s16, %s2682_s17  }
 0x246   :  { %2678 = dma.done.wait [#allocation4], 3584  }
 0x247   :  { %2679 = vsyncadd [#allocation4], 4294963712 }
 0x248   :  { %2048 = vsyncpa [#allocation3], 1 }
 0x249   :  { %2049 = vsyncpa [#allocation4], 1 }

</bundles_post_ra>
